<compile_context>
chip_gen: v7x
topology: tpu7x:2x2x1
jax: 0.10.0
libtpu: 0.0.40
codegen_flags: <defaults>
</compile_context>

<pallas_src>
import functools

import jax
import jax.numpy as jnp
from jax import lax
from jax.experimental import pallas as pl
from jax.experimental.pallas import tpu as pltpu

EPS = 1e-5  # BatchNorm2d eps


# ----------------------------------------------------------------------------
# Fused Pallas kernel
# ----------------------------------------------------------------------------
def _depthwise_taps(buf_ref, y, wd, bd, cm, *, K, W, HW, PAD, relu):
    """KxK depthwise conv (stride 1, pad K//2) on a lane-flattened image.

    buf_ref: (C, HW + 2*PAD) VMEM scratch used for zero padding / lane shifts.
    y:       (C, HW)   activation, H*W flattened into lanes.
    wd:      (C, K*K)  per-channel tap weights (BN scale folded in).
    bd:      (C, 1)    folded BN bias.
    cm:      (K, HW)   column masks handling W-boundary wrap of the flat shift.
    """
    half = K // 2
    buf_ref[...] = jnp.zeros_like(buf_ref)
    buf_ref[:, PAD:PAD + HW] = y                       # aligned lane store
    acc = jnp.zeros(y.shape, jnp.float32)
    for dy in range(K):
        for dx in range(K):
            off = (dy - half) * W + (dx - half)
            tap = buf_ref[:, PAD + off:PAD + off + HW]  # lane-shifted window
            if dx != half:
                tap = tap * cm[dx:dx + 1, :]            # mask W-boundary wrap
            acc = acc + wd[:, dy * K + dx:dy * K + dx + 1] * tap
    acc = acc + bd
    if relu:
        acc = jnp.maximum(acc, 0.0)
    return acc


def _ghost_bottleneck_kernel(x_ref, cm_ref, w1_ref, b1_ref, wd1_ref, bd1_ref,
                             w2a_ref, w2b_ref, b2_ref, wd2_ref, bd2_ref,
                             o_ref, buf1, buf2, *, K, W, HW, PAD, c_g1, c_g2):
    x = x_ref[0].astype(jnp.float32)                    # (C1, HW)
    cm = cm_ref[...]                                    # (K, HW)
    c1 = x.shape[0]

    # GhostConv #1 primary: 1x1 conv as VPU broadcast-MAC over Cin, +BN +ReLU
    w1 = w1_ref[...]                                    # (c_g1, C1)
    y1 = jnp.zeros((c_g1, HW), jnp.float32)
    for i in range(c1):
        y1 = y1 + w1[:, i:i + 1] * x[i:i + 1, :]
    y1 = jnp.maximum(y1 + b1_ref[...], 0.0)

    # GhostConv #1 cheap half: 5x5 depthwise +BN +ReLU
    y2 = _depthwise_taps(buf1, y1, wd1_ref[...], bd1_ref[...], cm,
                         K=K, W=W, HW=HW, PAD=PAD, relu=True)

    # GhostConv #2 primary: 1x1 conv over cat(y1, y2) without materializing it
    w2a = w2a_ref[...]                                  # (c_g2, c_g1)
    w2b = w2b_ref[...]                                  # (c_g2, c_g1)
    z1 = jnp.zeros((c_g2, HW), jnp.float32)
    for i in range(c_g1):
        z1 = z1 + w2a[:, i:i + 1] * y1[i:i + 1, :]
        z1 = z1 + w2b[:, i:i + 1] * y2[i:i + 1, :]
    z1 = z1 + b2_ref[...]                               # act=False

    # GhostConv #2 cheap half: 5x5 depthwise +BN (act=False)
    z2 = _depthwise_taps(buf2, z1, wd2_ref[...], bd2_ref[...], cm,
                         K=K, W=W, HW=HW, PAD=PAD, relu=False)

    # Residual fused into the store: out = cat(z1, z2) + x
    o_ref[0, 0:c_g2, :] = (z1 + x[0:c_g2, :]).astype(o_ref.dtype)
    o_ref[0, c_g2:2 * c_g2, :] = (z2 + x[c_g2:2 * c_g2, :]).astype(o_ref.dtype)


# ----------------------------------------------------------------------------
# Wrapper: BN folding, weight reshaping, pallas_call
# ----------------------------------------------------------------------------
def _fold_pw(w, bn):
    # w: (Cin, Cout) -> folded (Cout, Cin); bias (Cout, 1)
    s, b = bn
    return (w * s[None, :]).T, b.reshape(-1, 1)


def _fold_dw(w, bn):
    # w: (K, K, C) -> folded (C, K*K); bias (C, 1)
    s, b = bn
    k, _, c = w.shape
    return w.reshape(k * k, c).T * s[:, None], b.reshape(-1, 1)


def ghost_bottleneck_forward(x_nchw, params, *, k_dw=5):
    """GhostBottleneck(c1, c2, k=3, s=1) forward.  Input/output: NCHW."""
    N, C1, H, W = x_nchw.shape
    c_g1 = params["w1"].shape[1]
    c_g2 = params["w2"].shape[1]
    C2 = 2 * c_g2
    assert C1 == C2, "s=1 identity shortcut requires c1 == c2"
    HW = H * W
    # lane pad for depthwise shifts, rounded up to 128 so the scratch store is aligned
    PAD = -(-((k_dw // 2) * W + k_dw // 2) // 128) * 128

    w1f, b1f = _fold_pw(params["w1"], params["bn1"])
    wd1f, bd1f = _fold_dw(params["wd1"], params["bnd1"])
    w2f, b2f = _fold_pw(params["w2"], params["bn2"])
    w2af, w2bf = w2f[:, :c_g1], w2f[:, c_g1:]
    wd2f, bd2f = _fold_dw(params["wd2"], params["bnd2"])

    # column masks for the W-boundary of flattened-spatial tap shifts
    cols = jnp.arange(HW, dtype=jnp.int32) % W
    d = jnp.arange(k_dw, dtype=jnp.int32) - k_dw // 2
    cm = ((cols[None, :] + d[:, None] >= 0) &
          (cols[None, :] + d[:, None] < W)).astype(jnp.float32)

    x_flat = x_nchw.reshape(N, C1, HW)   # NCHW consumed directly; no transpose

    kernel = functools.partial(_ghost_bottleneck_kernel, K=k_dw, W=W, HW=HW,
                               PAD=PAD, c_g1=c_g1, c_g2=c_g2)
    const = lambda n: (0, 0)
    out = pl.pallas_call(
        kernel,
        out_shape=jax.ShapeDtypeStruct((N, C2, HW), x_nchw.dtype),
        grid_spec=pltpu.PrefetchScalarGridSpec(
            num_scalar_prefetch=0,
            grid=(N,),
            in_specs=[
                pl.BlockSpec((1, C1, HW), lambda n: (n, 0, 0)),
                pl.BlockSpec((k_dw, HW), const),
                pl.BlockSpec(w1f.shape, const),
                pl.BlockSpec(b1f.shape, const),
                pl.BlockSpec(wd1f.shape, const),
                pl.BlockSpec(bd1f.shape, const),
                pl.BlockSpec(w2af.shape, const),
                pl.BlockSpec(w2bf.shape, const),
                pl.BlockSpec(b2f.shape, const),
                pl.BlockSpec(wd2f.shape, const),
                pl.BlockSpec(bd2f.shape, const),
            ],
            out_specs=pl.BlockSpec((1, C2, HW), lambda n: (n, 0, 0)),
            scratch_shapes=[
                pltpu.VMEM((c_g1, HW + 2 * PAD), jnp.float32),
                pltpu.VMEM((c_g2, HW + 2 * PAD), jnp.float32),
            ],
        ),
        compiler_params=pltpu.CompilerParams(dimension_semantics=("parallel",)),
    )(x_flat, cm, w1f, b1f, wd1f, bd1f, w2af, w2bf, b2f, wd2f, bd2f)
    return out.reshape(N, C2, H, W)


# ----------------------------------------------------------------------------
# Parameters (deterministic, synthetic)
# ----------------------------------------------------------------------------
def _bn_fold(key, c):
    kg, kb, km, kv = jax.random.split(key, 4)
    gamma = 1.0 + 0.1 * jax.random.normal(kg, (c,), jnp.float32)
    beta = 0.1 * jax.random.normal(kb, (c,), jnp.float32)
    mean = 0.1 * jax.random.normal(km, (c,), jnp.float32)
    var = jnp.abs(1.0 + 0.1 * jax.random.normal(kv, (c,), jnp.float32))
    scale = gamma / jnp.sqrt(var + EPS)
    bias = beta - mean * scale
    return scale, bias


def init_params(key, c1, c2):
    assert c1 == c2, "s=1 GhostBottleneck identity shortcut requires c1 == c2"
    c_mid = c2 // 2          # GhostBottleneck hidden channels
    c_g1 = c_mid // 2        # inner channels of first GhostConv
    c_g2 = c2 // 2           # inner channels of second GhostConv
    ks = jax.random.split(key, 8)
    p = {}
    p["w1"] = 0.3 * jax.random.normal(ks[0], (c1, c_g1), jnp.float32)     # 1x1
    p["bn1"] = _bn_fold(ks[1], c_g1)
    p["wd1"] = 0.3 * jax.random.normal(ks[2], (5, 5, c_g1), jnp.float32)  # dw 5x5
    p["bnd1"] = _bn_fold(ks[3], c_g1)
    p["w2"] = 0.3 * jax.random.normal(ks[4], (c_mid, c_g2), jnp.float32)  # 1x1
    p["bn2"] = _bn_fold(ks[5], c_g2)
    p["wd2"] = 0.3 * jax.random.normal(ks[6], (5, 5, c_g2), jnp.float32)  # dw 5x5
    p["bnd2"] = _bn_fold(ks[7], c_g2)
    return p


# ----------------------------------------------------------------------------
# Pure-JAX reference (for correctness check)
# ----------------------------------------------------------------------------
def _ref_pw(x, w, s, b, act):
    y = lax.conv_general_dilated(
        x, w.reshape(1, 1, *w.shape), (1, 1), "VALID",
        dimension_numbers=("NHWC", "HWIO", "NHWC"))
    y = y * s + b
    return jnp.maximum(y, 0.0) if act else y


def _ref_dw(x, w, s, b, act, k=5):
    C = x.shape[-1]
    pad = k // 2
    y = lax.conv_general_dilated(
        x, w.reshape(k, k, 1, C), (1, 1), [(pad, pad), (pad, pad)],
        dimension_numbers=("NHWC", "HWIO", "NHWC"), feature_group_count=C)
    y = y * s + b
    return jnp.maximum(y, 0.0) if act else y


def ref_forward(x_nchw, p):
    x = jnp.transpose(x_nchw, (0, 2, 3, 1))
    y1 = _ref_pw(x, p["w1"], *p["bn1"], True)
    y2 = _ref_dw(y1, p["wd1"], *p["bnd1"], True)
    g1 = jnp.concatenate([y1, y2], axis=-1)
    z1 = _ref_pw(g1, p["w2"], *p["bn2"], False)
    z2 = _ref_dw(z1, p["wd2"], *p["bnd2"], False)
    g2 = jnp.concatenate([z1, z2], axis=-1)
    return jnp.transpose(g2 + x, (0, 3, 1, 2))


# ----------------------------------------------------------------------------
if __name__ == "__main__":
    key = jax.random.PRNGKey(0)
    kx, kp = jax.random.split(key)

    N, C1, H, W = 2, 8, 16, 16
    C2 = 8  # == C1 so the identity shortcut add is shape-valid (as in PyTorch)

    x = jax.random.normal(kx, (N, C1, H, W), jnp.float32)
    params = init_params(kp, C1, C2)

    out = ghost_bottleneck_forward(x, params)
    out = jax.block_until_ready(out)

    ref = ref_forward(x, params)
    assert out.shape == (N, C2, H, W)
    assert jnp.allclose(out, ref, atol=1e-4, rtol=1e-4), "Pallas vs reference mismatch"

    print("KERNEL_OK")
</pallas_src>

<mosaic_0001>
module attributes {stable_mosaic.version = 11 : i64} {
  func.func @_ghost_bottleneck_kernel(%arg0: i32, %arg1: memref<1x8x256xf32, #tpu.memory_space<vmem>>, %arg2: memref<5x256xf32, #tpu.memory_space<vmem>>, %arg3: memref<2x8xf32, #tpu.memory_space<vmem>>, %arg4: memref<2x1xf32, #tpu.memory_space<vmem>>, %arg5: memref<2x25xf32, #tpu.memory_space<vmem>>, %arg6: memref<2x1xf32, #tpu.memory_space<vmem>>, %arg7: memref<4x2xf32, #tpu.memory_space<vmem>>, %arg8: memref<4x2xf32, #tpu.memory_space<vmem>>, %arg9: memref<4x1xf32, #tpu.memory_space<vmem>>, %arg10: memref<4x25xf32, #tpu.memory_space<vmem>>, %arg11: memref<4x1xf32, #tpu.memory_space<vmem>>, %arg12: memref<1x8x256xf32, #tpu.memory_space<vmem>>, %arg13: memref<2x512xf32, #tpu.memory_space<vmem>>, %arg14: memref<4x512xf32, #tpu.memory_space<vmem>>) attributes {dimension_semantics = [#tpu.dimension_semantics<parallel>], iteration_bounds = array<i64: 2>, scalar_prefetch = 0 : i64, scratch_operands = 2 : i64, tpu.core_type = #tpu.core_type<tc>, window_params = [{transform_indices = @transform_0, window_bounds = array<i64: 1, 8, 256>}, {pipeline_mode = #tpu.pipeline_mode<synchronous>, transform_indices = @transform_1, window_bounds = array<i64: 5, 256>}, {pipeline_mode = #tpu.pipeline_mode<synchronous>, transform_indices = @transform_2, window_bounds = array<i64: 2, 8>}, {pipeline_mode = #tpu.pipeline_mode<synchronous>, transform_indices = @transform_3, window_bounds = array<i64: 2, 1>}, {pipeline_mode = #tpu.pipeline_mode<synchronous>, transform_indices = @transform_4, window_bounds = array<i64: 2, 25>}, {pipeline_mode = #tpu.pipeline_mode<synchronous>, transform_indices = @transform_5, window_bounds = array<i64: 2, 1>}, {pipeline_mode = #tpu.pipeline_mode<synchronous>, transform_indices = @transform_6, window_bounds = array<i64: 4, 2>}, {pipeline_mode = #tpu.pipeline_mode<synchronous>, transform_indices = @transform_7, window_bounds = array<i64: 4, 2>}, {pipeline_mode = #tpu.pipeline_mode<synchronous>, transform_indices = @transform_8, window_bounds = array<i64: 4, 1>}, {pipeline_mode = #tpu.pipeline_mode<synchronous>, transform_indices = @transform_9, window_bounds = array<i64: 4, 25>}, {pipeline_mode = #tpu.pipeline_mode<synchronous>, transform_indices = @transform_10, window_bounds = array<i64: 4, 1>}, {transform_indices = @transform_11, window_bounds = array<i64: 1, 8, 256>}]} {
    %c0 = arith.constant 0 : index
    %c0_0 = arith.constant 0 : index
    %c0_1 = arith.constant 0 : index
    %0 = vector.load %arg1[%c0, %c0_0, %c0_1] : memref<1x8x256xf32, #tpu.memory_space<vmem>>, vector<1x8x256xf32>
    %1 = vector.shape_cast %0 : vector<1x8x256xf32> to vector<8x256xf32>
    %c0_2 = arith.constant 0 : index
    %c0_3 = arith.constant 0 : index
    %2 = vector.load %arg2[%c0_2, %c0_3] : memref<5x256xf32, #tpu.memory_space<vmem>>, vector<5x256xf32>
    %c0_4 = arith.constant 0 : index
    %c0_5 = arith.constant 0 : index
    %3 = vector.load %arg3[%c0_4, %c0_5] : memref<2x8xf32, #tpu.memory_space<vmem>>, vector<2x8xf32>
    %cst = arith.constant 0.000000e+00 : f32
    %4 = vector.broadcast %cst : f32 to vector<2x256xf32>
    %5 = vector.extract_strided_slice %3 {offsets = [0, 0], sizes = [2, 1], strides = [1, 1]} : vector<2x8xf32> to vector<2x1xf32>
    %6 = vector.extract_strided_slice %1 {offsets = [0, 0], sizes = [1, 256], strides = [1, 1]} : vector<8x256xf32> to vector<1x256xf32>
    %7 = vector.broadcast %5 : vector<2x1xf32> to vector<2x256xf32>
    %8 = vector.broadcast %6 : vector<1x256xf32> to vector<2x256xf32>
    %9 = arith.mulf %7, %8 : vector<2x256xf32>
    %10 = arith.addf %4, %9 : vector<2x256xf32>
    %11 = vector.extract_strided_slice %3 {offsets = [0, 1], sizes = [2, 1], strides = [1, 1]} : vector<2x8xf32> to vector<2x1xf32>
    %12 = vector.extract_strided_slice %1 {offsets = [1, 0], sizes = [1, 256], strides = [1, 1]} : vector<8x256xf32> to vector<1x256xf32>
    %13 = vector.broadcast %11 : vector<2x1xf32> to vector<2x256xf32>
    %14 = vector.broadcast %12 : vector<1x256xf32> to vector<2x256xf32>
    %15 = arith.mulf %13, %14 : vector<2x256xf32>
    %16 = arith.addf %10, %15 : vector<2x256xf32>
    %17 = vector.extract_strided_slice %3 {offsets = [0, 2], sizes = [2, 1], strides = [1, 1]} : vector<2x8xf32> to vector<2x1xf32>
    %18 = vector.extract_strided_slice %1 {offsets = [2, 0], sizes = [1, 256], strides = [1, 1]} : vector<8x256xf32> to vector<1x256xf32>
    %19 = vector.broadcast %17 : vector<2x1xf32> to vector<2x256xf32>
    %20 = vector.broadcast %18 : vector<1x256xf32> to vector<2x256xf32>
    %21 = arith.mulf %19, %20 : vector<2x256xf32>
    %22 = arith.addf %16, %21 : vector<2x256xf32>
    %23 = vector.extract_strided_slice %3 {offsets = [0, 3], sizes = [2, 1], strides = [1, 1]} : vector<2x8xf32> to vector<2x1xf32>
    %24 = vector.extract_strided_slice %1 {offsets = [3, 0], sizes = [1, 256], strides = [1, 1]} : vector<8x256xf32> to vector<1x256xf32>
    %25 = vector.broadcast %23 : vector<2x1xf32> to vector<2x256xf32>
    %26 = vector.broadcast %24 : vector<1x256xf32> to vector<2x256xf32>
    %27 = arith.mulf %25, %26 : vector<2x256xf32>
    %28 = arith.addf %22, %27 : vector<2x256xf32>
    %29 = vector.extract_strided_slice %3 {offsets = [0, 4], sizes = [2, 1], strides = [1, 1]} : vector<2x8xf32> to vector<2x1xf32>
    %30 = vector.extract_strided_slice %1 {offsets = [4, 0], sizes = [1, 256], strides = [1, 1]} : vector<8x256xf32> to vector<1x256xf32>
    %31 = vector.broadcast %29 : vector<2x1xf32> to vector<2x256xf32>
    %32 = vector.broadcast %30 : vector<1x256xf32> to vector<2x256xf32>
    %33 = arith.mulf %31, %32 : vector<2x256xf32>
    %34 = arith.addf %28, %33 : vector<2x256xf32>
    %35 = vector.extract_strided_slice %3 {offsets = [0, 5], sizes = [2, 1], strides = [1, 1]} : vector<2x8xf32> to vector<2x1xf32>
    %36 = vector.extract_strided_slice %1 {offsets = [5, 0], sizes = [1, 256], strides = [1, 1]} : vector<8x256xf32> to vector<1x256xf32>
    %37 = vector.broadcast %35 : vector<2x1xf32> to vector<2x256xf32>
    %38 = vector.broadcast %36 : vector<1x256xf32> to vector<2x256xf32>
    %39 = arith.mulf %37, %38 : vector<2x256xf32>
    %40 = arith.addf %34, %39 : vector<2x256xf32>
    %41 = vector.extract_strided_slice %3 {offsets = [0, 6], sizes = [2, 1], strides = [1, 1]} : vector<2x8xf32> to vector<2x1xf32>
    %42 = vector.extract_strided_slice %1 {offsets = [6, 0], sizes = [1, 256], strides = [1, 1]} : vector<8x256xf32> to vector<1x256xf32>
    %43 = vector.broadcast %41 : vector<2x1xf32> to vector<2x256xf32>
    %44 = vector.broadcast %42 : vector<1x256xf32> to vector<2x256xf32>
    %45 = arith.mulf %43, %44 : vector<2x256xf32>
    %46 = arith.addf %40, %45 : vector<2x256xf32>
    %47 = vector.extract_strided_slice %3 {offsets = [0, 7], sizes = [2, 1], strides = [1, 1]} : vector<2x8xf32> to vector<2x1xf32>
    %48 = vector.extract_strided_slice %1 {offsets = [7, 0], sizes = [1, 256], strides = [1, 1]} : vector<8x256xf32> to vector<1x256xf32>
    %49 = vector.broadcast %47 : vector<2x1xf32> to vector<2x256xf32>
    %50 = vector.broadcast %48 : vector<1x256xf32> to vector<2x256xf32>
    %51 = arith.mulf %49, %50 : vector<2x256xf32>
    %52 = arith.addf %46, %51 : vector<2x256xf32>
    %c0_6 = arith.constant 0 : index
    %c0_7 = arith.constant 0 : index
    %53 = vector.load %arg4[%c0_6, %c0_7] : memref<2x1xf32, #tpu.memory_space<vmem>>, vector<2x1xf32>
    %54 = vector.broadcast %53 : vector<2x1xf32> to vector<2x256xf32>
    %55 = arith.addf %52, %54 : vector<2x256xf32>
    %cst_8 = arith.constant 0.000000e+00 : f32
    %56 = vector.broadcast %cst_8 : f32 to vector<2x256xf32>
    %57 = arith.maximumf %55, %56 : vector<2x256xf32>
    %c0_9 = arith.constant 0 : index
    %c0_10 = arith.constant 0 : index
    %58 = vector.load %arg5[%c0_9, %c0_10] : memref<2x25xf32, #tpu.memory_space<vmem>>, vector<2x25xf32>
    %c0_11 = arith.constant 0 : index
    %c0_12 = arith.constant 0 : index
    %59 = vector.load %arg6[%c0_11, %c0_12] : memref<2x1xf32, #tpu.memory_space<vmem>>, vector<2x1xf32>
    %cst_13 = arith.constant 0.000000e+00 : f32
    %60 = vector.broadcast %cst_13 : f32 to vector<2x512xf32>
    %c0_14 = arith.constant 0 : index
    %c0_15 = arith.constant 0 : index
    %61 = vector.load %arg13[%c0_14, %c0_15] : memref<2x512xf32, #tpu.memory_space<vmem>>, vector<2x512xf32>
    tpu.vector_store %arg13[%c0_14, %c0_15], %60 {strides = array<i32>} : memref<2x512xf32, #tpu.memory_space<vmem>>, vector<2x512xf32>,
    %c0_16 = arith.constant 0 : index
    %c128 = arith.constant 128 : index
    %62 = vector.load %arg13[%c0_16, %c128] : memref<2x512xf32, #tpu.memory_space<vmem>>, vector<2x256xf32>
    tpu.vector_store %arg13[%c0_16, %c128], %57 {strides = array<i32>} : memref<2x512xf32, #tpu.memory_space<vmem>>, vector<2x256xf32>,
    %cst_17 = arith.constant 0.000000e+00 : f32
    %63 = vector.broadcast %cst_17 : f32 to vector<2x256xf32>
    %c0_18 = arith.constant 0 : index
    %c94 = arith.constant 94 : index
    %64 = vector.load %arg13[%c0_18, %c94] : memref<2x512xf32, #tpu.memory_space<vmem>>, vector<2x256xf32>
    %65 = vector.extract_strided_slice %2 {offsets = [0, 0], sizes = [1, 256], strides = [1, 1]} : vector<5x256xf32> to vector<1x256xf32>
    %66 = vector.broadcast %65 : vector<1x256xf32> to vector<2x256xf32>
    %67 = arith.mulf %64, %66 : vector<2x256xf32>
    %68 = vector.extract_strided_slice %58 {offsets = [0, 0], sizes = [2, 1], strides = [1, 1]} : vector<2x25xf32> to vector<2x1xf32>
    %69 = vector.broadcast %68 : vector<2x1xf32> to vector<2x256xf32>
    %70 = arith.mulf %69, %67 : vector<2x256xf32>
    %71 = arith.addf %63, %70 : vector<2x256xf32>
    %c0_19 = arith.constant 0 : index
    %c95 = arith.constant 95 : index
    %72 = vector.load %arg13[%c0_19, %c95] : memref<2x512xf32, #tpu.memory_space<vmem>>, vector<2x256xf32>
    %73 = vector.extract_strided_slice %2 {offsets = [1, 0], sizes = [1, 256], strides = [1, 1]} : vector<5x256xf32> to vector<1x256xf32>
    %74 = vector.broadcast %73 : vector<1x256xf32> to vector<2x256xf32>
    %75 = arith.mulf %72, %74 : vector<2x256xf32>
    %76 = vector.extract_strided_slice %58 {offsets = [0, 1], sizes = [2, 1], strides = [1, 1]} : vector<2x25xf32> to vector<2x1xf32>
    %77 = vector.broadcast %76 : vector<2x1xf32> to vector<2x256xf32>
    %78 = arith.mulf %77, %75 : vector<2x256xf32>
    %79 = arith.addf %71, %78 : vector<2x256xf32>
    %c0_20 = arith.constant 0 : index
    %c96 = arith.constant 96 : index
    %80 = vector.load %arg13[%c0_20, %c96] : memref<2x512xf32, #tpu.memory_space<vmem>>, vector<2x256xf32>
    %81 = vector.extract_strided_slice %58 {offsets = [0, 2], sizes = [2, 1], strides = [1, 1]} : vector<2x25xf32> to vector<2x1xf32>
    %82 = vector.broadcast %81 : vector<2x1xf32> to vector<2x256xf32>
    %83 = arith.mulf %82, %80 : vector<2x256xf32>
    %84 = arith.addf %79, %83 : vector<2x256xf32>
    %c0_21 = arith.constant 0 : index
    %c97 = arith.constant 97 : index
    %85 = vector.load %arg13[%c0_21, %c97] : memref<2x512xf32, #tpu.memory_space<vmem>>, vector<2x256xf32>
    %86 = vector.extract_strided_slice %2 {offsets = [3, 0], sizes = [1, 256], strides = [1, 1]} : vector<5x256xf32> to vector<1x256xf32>
    %87 = vector.broadcast %86 : vector<1x256xf32> to vector<2x256xf32>
    %88 = arith.mulf %85, %87 : vector<2x256xf32>
    %89 = vector.extract_strided_slice %58 {offsets = [0, 3], sizes = [2, 1], strides = [1, 1]} : vector<2x25xf32> to vector<2x1xf32>
    %90 = vector.broadcast %89 : vector<2x1xf32> to vector<2x256xf32>
    %91 = arith.mulf %90, %88 : vector<2x256xf32>
    %92 = arith.addf %84, %91 : vector<2x256xf32>
    %c0_22 = arith.constant 0 : index
    %c98 = arith.constant 98 : index
    %93 = vector.load %arg13[%c0_22, %c98] : memref<2x512xf32, #tpu.memory_space<vmem>>, vector<2x256xf32>
    %94 = vector.extract_strided_slice %2 {offsets = [4, 0], sizes = [1, 256], strides = [1, 1]} : vector<5x256xf32> to vector<1x256xf32>
    %95 = vector.broadcast %94 : vector<1x256xf32> to vector<2x256xf32>
    %96 = arith.mulf %93, %95 : vector<2x256xf32>
    %97 = vector.extract_strided_slice %58 {offsets = [0, 4], sizes = [2, 1], strides = [1, 1]} : vector<2x25xf32> to vector<2x1xf32>
    %98 = vector.broadcast %97 : vector<2x1xf32> to vector<2x256xf32>
    %99 = arith.mulf %98, %96 : vector<2x256xf32>
    %100 = arith.addf %92, %99 : vector<2x256xf32>
    %c0_23 = arith.constant 0 : index
    %c110 = arith.constant 110 : index
    %101 = vector.load %arg13[%c0_23, %c110] : memref<2x512xf32, #tpu.memory_space<vmem>>, vector<2x256xf32>
    %102 = vector.extract_strided_slice %2 {offsets = [0, 0], sizes = [1, 256], strides = [1, 1]} : vector<5x256xf32> to vector<1x256xf32>
    %103 = vector.broadcast %102 : vector<1x256xf32> to vector<2x256xf32>
    %104 = arith.mulf %101, %103 : vector<2x256xf32>
    %105 = vector.extract_strided_slice %58 {offsets = [0, 5], sizes = [2, 1], strides = [1, 1]} : vector<2x25xf32> to vector<2x1xf32>
    %106 = vector.broadcast %105 : vector<2x1xf32> to vector<2x256xf32>
    %107 = arith.mulf %106, %104 : vector<2x256xf32>
    %108 = arith.addf %100, %107 : vector<2x256xf32>
    %c0_24 = arith.constant 0 : index
    %c111 = arith.constant 111 : index
    %109 = vector.load %arg13[%c0_24, %c111] : memref<2x512xf32, #tpu.memory_space<vmem>>, vector<2x256xf32>
    %110 = vector.extract_strided_slice %2 {offsets = [1, 0], sizes = [1, 256], strides = [1, 1]} : vector<5x256xf32> to vector<1x256xf32>
    %111 = vector.broadcast %110 : vector<1x256xf32> to vector<2x256xf32>
    %112 = arith.mulf %109, %111 : vector<2x256xf32>
    %113 = vector.extract_strided_slice %58 {offsets = [0, 6], sizes = [2, 1], strides = [1, 1]} : vector<2x25xf32> to vector<2x1xf32>
    %114 = vector.broadcast %113 : vector<2x1xf32> to vector<2x256xf32>
    %115 = arith.mulf %114, %112 : vector<2x256xf32>
    %116 = arith.addf %108, %115 : vector<2x256xf32>
    %c0_25 = arith.constant 0 : index
    %c112 = arith.constant 112 : index
    %117 = vector.load %arg13[%c0_25, %c112] : memref<2x512xf32, #tpu.memory_space<vmem>>, vector<2x256xf32>
    %118 = vector.extract_strided_slice %58 {offsets = [0, 7], sizes = [2, 1], strides = [1, 1]} : vector<2x25xf32> to vector<2x1xf32>
    %119 = vector.broadcast %118 : vector<2x1xf32> to vector<2x256xf32>
    %120 = arith.mulf %119, %117 : vector<2x256xf32>
    %121 = arith.addf %116, %120 : vector<2x256xf32>
    %c0_26 = arith.constant 0 : index
    %c113 = arith.constant 113 : index
    %122 = vector.load %arg13[%c0_26, %c113] : memref<2x512xf32, #tpu.memory_space<vmem>>, vector<2x256xf32>
    %123 = vector.extract_strided_slice %2 {offsets = [3, 0], sizes = [1, 256], strides = [1, 1]} : vector<5x256xf32> to vector<1x256xf32>
    %124 = vector.broadcast %123 : vector<1x256xf32> to vector<2x256xf32>
    %125 = arith.mulf %122, %124 : vector<2x256xf32>
    %126 = vector.extract_strided_slice %58 {offsets = [0, 8], sizes = [2, 1], strides = [1, 1]} : vector<2x25xf32> to vector<2x1xf32>
    %127 = vector.broadcast %126 : vector<2x1xf32> to vector<2x256xf32>
    %128 = arith.mulf %127, %125 : vector<2x256xf32>
    %129 = arith.addf %121, %128 : vector<2x256xf32>
    %c0_27 = arith.constant 0 : index
    %c114 = arith.constant 114 : index
    %130 = vector.load %arg13[%c0_27, %c114] : memref<2x512xf32, #tpu.memory_space<vmem>>, vector<2x256xf32>
    %131 = vector.extract_strided_slice %2 {offsets = [4, 0], sizes = [1, 256], strides = [1, 1]} : vector<5x256xf32> to vector<1x256xf32>
    %132 = vector.broadcast %131 : vector<1x256xf32> to vector<2x256xf32>
    %133 = arith.mulf %130, %132 : vector<2x256xf32>
    %134 = vector.extract_strided_slice %58 {offsets = [0, 9], sizes = [2, 1], strides = [1, 1]} : vector<2x25xf32> to vector<2x1xf32>
    %135 = vector.broadcast %134 : vector<2x1xf32> to vector<2x256xf32>
    %136 = arith.mulf %135, %133 : vector<2x256xf32>
    %137 = arith.addf %129, %136 : vector<2x256xf32>
    %c0_28 = arith.constant 0 : index
    %c126 = arith.constant 126 : index
    %138 = vector.load %arg13[%c0_28, %c126] : memref<2x512xf32, #tpu.memory_space<vmem>>, vector<2x256xf32>
    %139 = vector.extract_strided_slice %2 {offsets = [0, 0], sizes = [1, 256], strides = [1, 1]} : vector<5x256xf32> to vector<1x256xf32>
    %140 = vector.broadcast %139 : vector<1x256xf32> to vector<2x256xf32>
    %141 = arith.mulf %138, %140 : vector<2x256xf32>
    %142 = vector.extract_strided_slice %58 {offsets = [0, 10], sizes = [2, 1], strides = [1, 1]} : vector<2x25xf32> to vector<2x1xf32>
    %143 = vector.broadcast %142 : vector<2x1xf32> to vector<2x256xf32>
    %144 = arith.mulf %143, %141 : vector<2x256xf32>
    %145 = arith.addf %137, %144 : vector<2x256xf32>
    %c0_29 = arith.constant 0 : index
    %c127 = arith.constant 127 : index
    %146 = vector.load %arg13[%c0_29, %c127] : memref<2x512xf32, #tpu.memory_space<vmem>>, vector<2x256xf32>
    %147 = vector.extract_strided_slice %2 {offsets = [1, 0], sizes = [1, 256], strides = [1, 1]} : vector<5x256xf32> to vector<1x256xf32>
    %148 = vector.broadcast %147 : vector<1x256xf32> to vector<2x256xf32>
    %149 = arith.mulf %146, %148 : vector<2x256xf32>
    %150 = vector.extract_strided_slice %58 {offsets = [0, 11], sizes = [2, 1], strides = [1, 1]} : vector<2x25xf32> to vector<2x1xf32>
    %151 = vector.broadcast %150 : vector<2x1xf32> to vector<2x256xf32>
    %152 = arith.mulf %151, %149 : vector<2x256xf32>
    %153 = arith.addf %145, %152 : vector<2x256xf32>
    %c0_30 = arith.constant 0 : index
    %c128_31 = arith.constant 128 : index
    %154 = vector.load %arg13[%c0_30, %c128_31] : memref<2x512xf32, #tpu.memory_space<vmem>>, vector<2x256xf32>
    %155 = vector.extract_strided_slice %58 {offsets = [0, 12], sizes = [2, 1], strides = [1, 1]} : vector<2x25xf32> to vector<2x1xf32>
    %156 = vector.broadcast %155 : vector<2x1xf32> to vector<2x256xf32>
    %157 = arith.mulf %156, %154 : vector<2x256xf32>
    %158 = arith.addf %153, %157 : vector<2x256xf32>
    %c0_32 = arith.constant 0 : index
    %c129 = arith.constant 129 : index
    %159 = vector.load %arg13[%c0_32, %c129] : memref<2x512xf32, #tpu.memory_space<vmem>>, vector<2x256xf32>
    %160 = vector.extract_strided_slice %2 {offsets = [3, 0], sizes = [1, 256], strides = [1, 1]} : vector<5x256xf32> to vector<1x256xf32>
    %161 = vector.broadcast %160 : vector<1x256xf32> to vector<2x256xf32>
    %162 = arith.mulf %159, %161 : vector<2x256xf32>
    %163 = vector.extract_strided_slice %58 {offsets = [0, 13], sizes = [2, 1], strides = [1, 1]} : vector<2x25xf32> to vector<2x1xf32>
    %164 = vector.broadcast %163 : vector<2x1xf32> to vector<2x256xf32>
    %165 = arith.mulf %164, %162 : vector<2x256xf32>
    %166 = arith.addf %158, %165 : vector<2x256xf32>
    %c0_33 = arith.constant 0 : index
    %c130 = arith.constant 130 : index
    %167 = vector.load %arg13[%c0_33, %c130] : memref<2x512xf32, #tpu.memory_space<vmem>>, vector<2x256xf32>
    %168 = vector.extract_strided_slice %2 {offsets = [4, 0], sizes = [1, 256], strides = [1, 1]} : vector<5x256xf32> to vector<1x256xf32>
    %169 = vector.broadcast %168 : vector<1x256xf32> to vector<2x256xf32>
    %170 = arith.mulf %167, %169 : vector<2x256xf32>
    %171 = vector.extract_strided_slice %58 {offsets = [0, 14], sizes = [2, 1], strides = [1, 1]} : vector<2x25xf32> to vector<2x1xf32>
    %172 = vector.broadcast %171 : vector<2x1xf32> to vector<2x256xf32>
    %173 = arith.mulf %172, %170 : vector<2x256xf32>
    %174 = arith.addf %166, %173 : vector<2x256xf32>
    %c0_34 = arith.constant 0 : index
    %c142 = arith.constant 142 : index
    %175 = vector.load %arg13[%c0_34, %c142] : memref<2x512xf32, #tpu.memory_space<vmem>>, vector<2x256xf32>
    %176 = vector.extract_strided_slice %2 {offsets = [0, 0], sizes = [1, 256], strides = [1, 1]} : vector<5x256xf32> to vector<1x256xf32>
    %177 = vector.broadcast %176 : vector<1x256xf32> to vector<2x256xf32>
    %178 = arith.mulf %175, %177 : vector<2x256xf32>
    %179 = vector.extract_strided_slice %58 {offsets = [0, 15], sizes = [2, 1], strides = [1, 1]} : vector<2x25xf32> to vector<2x1xf32>
    %180 = vector.broadcast %179 : vector<2x1xf32> to vector<2x256xf32>
    %181 = arith.mulf %180, %178 : vector<2x256xf32>
    %182 = arith.addf %174, %181 : vector<2x256xf32>
    %c0_35 = arith.constant 0 : index
    %c143 = arith.constant 143 : index
    %183 = vector.load %arg13[%c0_35, %c143] : memref<2x512xf32, #tpu.memory_space<vmem>>, vector<2x256xf32>
    %184 = vector.extract_strided_slice %2 {offsets = [1, 0], sizes = [1, 256], strides = [1, 1]} : vector<5x256xf32> to vector<1x256xf32>
    %185 = vector.broadcast %184 : vector<1x256xf32> to vector<2x256xf32>
    %186 = arith.mulf %183, %185 : vector<2x256xf32>
    %187 = vector.extract_strided_slice %58 {offsets = [0, 16], sizes = [2, 1], strides = [1, 1]} : vector<2x25xf32> to vector<2x1xf32>
    %188 = vector.broadcast %187 : vector<2x1xf32> to vector<2x256xf32>
    %189 = arith.mulf %188, %186 : vector<2x256xf32>
    %190 = arith.addf %182, %189 : vector<2x256xf32>
    %c0_36 = arith.constant 0 : index
    %c144 = arith.constant 144 : index
    %191 = vector.load %arg13[%c0_36, %c144] : memref<2x512xf32, #tpu.memory_space<vmem>>, vector<2x256xf32>
    %192 = vector.extract_strided_slice %58 {offsets = [0, 17], sizes = [2, 1], strides = [1, 1]} : vector<2x25xf32> to vector<2x1xf32>
    %193 = vector.broadcast %192 : vector<2x1xf32> to vector<2x256xf32>
    %194 = arith.mulf %193, %191 : vector<2x256xf32>
    %195 = arith.addf %190, %194 : vector<2x256xf32>
    %c0_37 = arith.constant 0 : index
    %c145 = arith.constant 145 : index
    %196 = vector.load %arg13[%c0_37, %c145] : memref<2x512xf32, #tpu.memory_space<vmem>>, vector<2x256xf32>
    %197 = vector.extract_strided_slice %2 {offsets = [3, 0], sizes = [1, 256], strides = [1, 1]} : vector<5x256xf32> to vector<1x256xf32>
    %198 = vector.broadcast %197 : vector<1x256xf32> to vector<2x256xf32>
    %199 = arith.mulf %196, %198 : vector<2x256xf32>
    %200 = vector.extract_strided_slice %58 {offsets = [0, 18], sizes = [2, 1], strides = [1, 1]} : vector<2x25xf32> to vector<2x1xf32>
    %201 = vector.broadcast %200 : vector<2x1xf32> to vector<2x256xf32>
    %202 = arith.mulf %201, %199 : vector<2x256xf32>
    %203 = arith.addf %195, %202 : vector<2x256xf32>
    %c0_38 = arith.constant 0 : index
    %c146 = arith.constant 146 : index
    %204 = vector.load %arg13[%c0_38, %c146] : memref<2x512xf32, #tpu.memory_space<vmem>>, vector<2x256xf32>
    %205 = vector.extract_strided_slice %2 {offsets = [4, 0], sizes = [1, 256], strides = [1, 1]} : vector<5x256xf32> to vector<1x256xf32>
    %206 = vector.broadcast %205 : vector<1x256xf32> to vector<2x256xf32>
    %207 = arith.mulf %204, %206 : vector<2x256xf32>
    %208 = vector.extract_strided_slice %58 {offsets = [0, 19], sizes = [2, 1], strides = [1, 1]} : vector<2x25xf32> to vector<2x1xf32>
    %209 = vector.broadcast %208 : vector<2x1xf32> to vector<2x256xf32>
    %210 = arith.mulf %209, %207 : vector<2x256xf32>
    %211 = arith.addf %203, %210 : vector<2x256xf32>
    %c0_39 = arith.constant 0 : index
    %c158 = arith.constant 158 : index
    %212 = vector.load %arg13[%c0_39, %c158] : memref<2x512xf32, #tpu.memory_space<vmem>>, vector<2x256xf32>
    %213 = vector.extract_strided_slice %2 {offsets = [0, 0], sizes = [1, 256], strides = [1, 1]} : vector<5x256xf32> to vector<1x256xf32>
    %214 = vector.broadcast %213 : vector<1x256xf32> to vector<2x256xf32>
    %215 = arith.mulf %212, %214 : vector<2x256xf32>
    %216 = vector.extract_strided_slice %58 {offsets = [0, 20], sizes = [2, 1], strides = [1, 1]} : vector<2x25xf32> to vector<2x1xf32>
    %217 = vector.broadcast %216 : vector<2x1xf32> to vector<2x256xf32>
    %218 = arith.mulf %217, %215 : vector<2x256xf32>
    %219 = arith.addf %211, %218 : vector<2x256xf32>
    %c0_40 = arith.constant 0 : index
    %c159 = arith.constant 159 : index
    %220 = vector.load %arg13[%c0_40, %c159] : memref<2x512xf32, #tpu.memory_space<vmem>>, vector<2x256xf32>
    %221 = vector.extract_strided_slice %2 {offsets = [1, 0], sizes = [1, 256], strides = [1, 1]} : vector<5x256xf32> to vector<1x256xf32>
    %222 = vector.broadcast %221 : vector<1x256xf32> to vector<2x256xf32>
    %223 = arith.mulf %220, %222 : vector<2x256xf32>
    %224 = vector.extract_strided_slice %58 {offsets = [0, 21], sizes = [2, 1], strides = [1, 1]} : vector<2x25xf32> to vector<2x1xf32>
    %225 = vector.broadcast %224 : vector<2x1xf32> to vector<2x256xf32>
    %226 = arith.mulf %225, %223 : vector<2x256xf32>
    %227 = arith.addf %219, %226 : vector<2x256xf32>
    %c0_41 = arith.constant 0 : index
    %c160 = arith.constant 160 : index
    %228 = vector.load %arg13[%c0_41, %c160] : memref<2x512xf32, #tpu.memory_space<vmem>>, vector<2x256xf32>
    %229 = vector.extract_strided_slice %58 {offsets = [0, 22], sizes = [2, 1], strides = [1, 1]} : vector<2x25xf32> to vector<2x1xf32>
    %230 = vector.broadcast %229 : vector<2x1xf32> to vector<2x256xf32>
    %231 = arith.mulf %230, %228 : vector<2x256xf32>
    %232 = arith.addf %227, %231 : vector<2x256xf32>
    %c0_42 = arith.constant 0 : index
    %c161 = arith.constant 161 : index
    %233 = vector.load %arg13[%c0_42, %c161] : memref<2x512xf32, #tpu.memory_space<vmem>>, vector<2x256xf32>
    %234 = vector.extract_strided_slice %2 {offsets = [3, 0], sizes = [1, 256], strides = [1, 1]} : vector<5x256xf32> to vector<1x256xf32>
    %235 = vector.broadcast %234 : vector<1x256xf32> to vector<2x256xf32>
    %236 = arith.mulf %233, %235 : vector<2x256xf32>
    %237 = vector.extract_strided_slice %58 {offsets = [0, 23], sizes = [2, 1], strides = [1, 1]} : vector<2x25xf32> to vector<2x1xf32>
    %238 = vector.broadcast %237 : vector<2x1xf32> to vector<2x256xf32>
    %239 = arith.mulf %238, %236 : vector<2x256xf32>
    %240 = arith.addf %232, %239 : vector<2x256xf32>
    %c0_43 = arith.constant 0 : index
    %c162 = arith.constant 162 : index
    %241 = vector.load %arg13[%c0_43, %c162] : memref<2x512xf32, #tpu.memory_space<vmem>>, vector<2x256xf32>
    %242 = vector.extract_strided_slice %2 {offsets = [4, 0], sizes = [1, 256], strides = [1, 1]} : vector<5x256xf32> to vector<1x256xf32>
    %243 = vector.broadcast %242 : vector<1x256xf32> to vector<2x256xf32>
    %244 = arith.mulf %241, %243 : vector<2x256xf32>
    %245 = vector.extract_strided_slice %58 {offsets = [0, 24], sizes = [2, 1], strides = [1, 1]} : vector<2x25xf32> to vector<2x1xf32>
    %246 = vector.broadcast %245 : vector<2x1xf32> to vector<2x256xf32>
    %247 = arith.mulf %246, %244 : vector<2x256xf32>
    %248 = arith.addf %240, %247 : vector<2x256xf32>
    %249 = vector.broadcast %59 : vector<2x1xf32> to vector<2x256xf32>
    %250 = arith.addf %248, %249 : vector<2x256xf32>
    %cst_44 = arith.constant 0.000000e+00 : f32
    %251 = vector.broadcast %cst_44 : f32 to vector<2x256xf32>
    %252 = arith.maximumf %250, %251 : vector<2x256xf32>
    %c0_45 = arith.constant 0 : index
    %c0_46 = arith.constant 0 : index
    %253 = vector.load %arg7[%c0_45, %c0_46] : memref<4x2xf32, #tpu.memory_space<vmem>>, vector<4x2xf32>
    %c0_47 = arith.constant 0 : index
    %c0_48 = arith.constant 0 : index
    %254 = vector.load %arg8[%c0_47, %c0_48] : memref<4x2xf32, #tpu.memory_space<vmem>>, vector<4x2xf32>
    %cst_49 = arith.constant 0.000000e+00 : f32
    %255 = vector.broadcast %cst_49 : f32 to vector<4x256xf32>
    %256 = vector.extract_strided_slice %253 {offsets = [0, 0], sizes = [4, 1], strides = [1, 1]} : vector<4x2xf32> to vector<4x1xf32>
    %257 = vector.extract_strided_slice %57 {offsets = [0, 0], sizes = [1, 256], strides = [1, 1]} : vector<2x256xf32> to vector<1x256xf32>
    %258 = vector.broadcast %256 : vector<4x1xf32> to vector<4x256xf32>
    %259 = vector.broadcast %257 : vector<1x256xf32> to vector<4x256xf32>
    %260 = arith.mulf %258, %259 : vector<4x256xf32>
    %261 = arith.addf %255, %260 : vector<4x256xf32>
    %262 = vector.extract_strided_slice %254 {offsets = [0, 0], sizes = [4, 1], strides = [1, 1]} : vector<4x2xf32> to vector<4x1xf32>
    %263 = vector.extract_strided_slice %252 {offsets = [0, 0], sizes = [1, 256], strides = [1, 1]} : vector<2x256xf32> to vector<1x256xf32>
    %264 = vector.broadcast %262 : vector<4x1xf32> to vector<4x256xf32>
    %265 = vector.broadcast %263 : vector<1x256xf32> to vector<4x256xf32>
    %266 = arith.mulf %264, %265 : vector<4x256xf32>
    %267 = arith.addf %261, %266 : vector<4x256xf32>
    %268 = vector.extract_strided_slice %253 {offsets = [0, 1], sizes = [4, 1], strides = [1, 1]} : vector<4x2xf32> to vector<4x1xf32>
    %269 = vector.extract_strided_slice %57 {offsets = [1, 0], sizes = [1, 256], strides = [1, 1]} : vector<2x256xf32> to vector<1x256xf32>
    %270 = vector.broadcast %268 : vector<4x1xf32> to vector<4x256xf32>
    %271 = vector.broadcast %269 : vector<1x256xf32> to vector<4x256xf32>
    %272 = arith.mulf %270, %271 : vector<4x256xf32>
    %273 = arith.addf %267, %272 : vector<4x256xf32>
    %274 = vector.extract_strided_slice %254 {offsets = [0, 1], sizes = [4, 1], strides = [1, 1]} : vector<4x2xf32> to vector<4x1xf32>
    %275 = vector.extract_strided_slice %252 {offsets = [1, 0], sizes = [1, 256], strides = [1, 1]} : vector<2x256xf32> to vector<1x256xf32>
    %276 = vector.broadcast %274 : vector<4x1xf32> to vector<4x256xf32>
    %277 = vector.broadcast %275 : vector<1x256xf32> to vector<4x256xf32>
    %278 = arith.mulf %276, %277 : vector<4x256xf32>
    %279 = arith.addf %273, %278 : vector<4x256xf32>
    %c0_50 = arith.constant 0 : index
    %c0_51 = arith.constant 0 : index
    %280 = vector.load %arg9[%c0_50, %c0_51] : memref<4x1xf32, #tpu.memory_space<vmem>>, vector<4x1xf32>
    %281 = vector.broadcast %280 : vector<4x1xf32> to vector<4x256xf32>
    %282 = arith.addf %279, %281 : vector<4x256xf32>
    %c0_52 = arith.constant 0 : index
    %c0_53 = arith.constant 0 : index
    %283 = vector.load %arg10[%c0_52, %c0_53] : memref<4x25xf32, #tpu.memory_space<vmem>>, vector<4x25xf32>
    %c0_54 = arith.constant 0 : index
    %c0_55 = arith.constant 0 : index
    %284 = vector.load %arg11[%c0_54, %c0_55] : memref<4x1xf32, #tpu.memory_space<vmem>>, vector<4x1xf32>
    %cst_56 = arith.constant 0.000000e+00 : f32
    %285 = vector.broadcast %cst_56 : f32 to vector<4x512xf32>
    %c0_57 = arith.constant 0 : index
    %c0_58 = arith.constant 0 : index
    %286 = vector.load %arg14[%c0_57, %c0_58] : memref<4x512xf32, #tpu.memory_space<vmem>>, vector<4x512xf32>
    tpu.vector_store %arg14[%c0_57, %c0_58], %285 {strides = array<i32>} : memref<4x512xf32, #tpu.memory_space<vmem>>, vector<4x512xf32>,
    %c0_59 = arith.constant 0 : index
    %c128_60 = arith.constant 128 : index
    %287 = vector.load %arg14[%c0_59, %c128_60] : memref<4x512xf32, #tpu.memory_space<vmem>>, vector<4x256xf32>
    tpu.vector_store %arg14[%c0_59, %c128_60], %282 {strides = array<i32>} : memref<4x512xf32, #tpu.memory_space<vmem>>, vector<4x256xf32>,
    %cst_61 = arith.constant 0.000000e+00 : f32
    %288 = vector.broadcast %cst_61 : f32 to vector<4x256xf32>
    %c0_62 = arith.constant 0 : index
    %c94_63 = arith.constant 94 : index
    %289 = vector.load %arg14[%c0_62, %c94_63] : memref<4x512xf32, #tpu.memory_space<vmem>>, vector<4x256xf32>
    %290 = vector.extract_strided_slice %2 {offsets = [0, 0], sizes = [1, 256], strides = [1, 1]} : vector<5x256xf32> to vector<1x256xf32>
    %291 = vector.broadcast %290 : vector<1x256xf32> to vector<4x256xf32>
    %292 = arith.mulf %289, %291 : vector<4x256xf32>
    %293 = vector.extract_strided_slice %283 {offsets = [0, 0], sizes = [4, 1], strides = [1, 1]} : vector<4x25xf32> to vector<4x1xf32>
    %294 = vector.broadcast %293 : vector<4x1xf32> to vector<4x256xf32>
    %295 = arith.mulf %294, %292 : vector<4x256xf32>
    %296 = arith.addf %288, %295 : vector<4x256xf32>
    %c0_64 = arith.constant 0 : index
    %c95_65 = arith.constant 95 : index
    %297 = vector.load %arg14[%c0_64, %c95_65] : memref<4x512xf32, #tpu.memory_space<vmem>>, vector<4x256xf32>
    %298 = vector.extract_strided_slice %2 {offsets = [1, 0], sizes = [1, 256], strides = [1, 1]} : vector<5x256xf32> to vector<1x256xf32>
    %299 = vector.broadcast %298 : vector<1x256xf32> to vector<4x256xf32>
    %300 = arith.mulf %297, %299 : vector<4x256xf32>
    %301 = vector.extract_strided_slice %283 {offsets = [0, 1], sizes = [4, 1], strides = [1, 1]} : vector<4x25xf32> to vector<4x1xf32>
    %302 = vector.broadcast %301 : vector<4x1xf32> to vector<4x256xf32>
    %303 = arith.mulf %302, %300 : vector<4x256xf32>
    %304 = arith.addf %296, %303 : vector<4x256xf32>
    %c0_66 = arith.constant 0 : index
    %c96_67 = arith.constant 96 : index
    %305 = vector.load %arg14[%c0_66, %c96_67] : memref<4x512xf32, #tpu.memory_space<vmem>>, vector<4x256xf32>
    %306 = vector.extract_strided_slice %283 {offsets = [0, 2], sizes = [4, 1], strides = [1, 1]} : vector<4x25xf32> to vector<4x1xf32>
    %307 = vector.broadcast %306 : vector<4x1xf32> to vector<4x256xf32>
    %308 = arith.mulf %307, %305 : vector<4x256xf32>
    %309 = arith.addf %304, %308 : vector<4x256xf32>
    %c0_68 = arith.constant 0 : index
    %c97_69 = arith.constant 97 : index
    %310 = vector.load %arg14[%c0_68, %c97_69] : memref<4x512xf32, #tpu.memory_space<vmem>>, vector<4x256xf32>
    %311 = vector.extract_strided_slice %2 {offsets = [3, 0], sizes = [1, 256], strides = [1, 1]} : vector<5x256xf32> to vector<1x256xf32>
    %312 = vector.broadcast %311 : vector<1x256xf32> to vector<4x256xf32>
    %313 = arith.mulf %310, %312 : vector<4x256xf32>
    %314 = vector.extract_strided_slice %283 {offsets = [0, 3], sizes = [4, 1], strides = [1, 1]} : vector<4x25xf32> to vector<4x1xf32>
    %315 = vector.broadcast %314 : vector<4x1xf32> to vector<4x256xf32>
    %316 = arith.mulf %315, %313 : vector<4x256xf32>
    %317 = arith.addf %309, %316 : vector<4x256xf32>
    %c0_70 = arith.constant 0 : index
    %c98_71 = arith.constant 98 : index
    %318 = vector.load %arg14[%c0_70, %c98_71] : memref<4x512xf32, #tpu.memory_space<vmem>>, vector<4x256xf32>
    %319 = vector.extract_strided_slice %2 {offsets = [4, 0], sizes = [1, 256], strides = [1, 1]} : vector<5x256xf32> to vector<1x256xf32>
    %320 = vector.broadcast %319 : vector<1x256xf32> to vector<4x256xf32>
    %321 = arith.mulf %318, %320 : vector<4x256xf32>
    %322 = vector.extract_strided_slice %283 {offsets = [0, 4], sizes = [4, 1], strides = [1, 1]} : vector<4x25xf32> to vector<4x1xf32>
    %323 = vector.broadcast %322 : vector<4x1xf32> to vector<4x256xf32>
    %324 = arith.mulf %323, %321 : vector<4x256xf32>
    %325 = arith.addf %317, %324 : vector<4x256xf32>
    %c0_72 = arith.constant 0 : index
    %c110_73 = arith.constant 110 : index
    %326 = vector.load %arg14[%c0_72, %c110_73] : memref<4x512xf32, #tpu.memory_space<vmem>>, vector<4x256xf32>
    %327 = vector.extract_strided_slice %2 {offsets = [0, 0], sizes = [1, 256], strides = [1, 1]} : vector<5x256xf32> to vector<1x256xf32>
    %328 = vector.broadcast %327 : vector<1x256xf32> to vector<4x256xf32>
    %329 = arith.mulf %326, %328 : vector<4x256xf32>
    %330 = vector.extract_strided_slice %283 {offsets = [0, 5], sizes = [4, 1], strides = [1, 1]} : vector<4x25xf32> to vector<4x1xf32>
    %331 = vector.broadcast %330 : vector<4x1xf32> to vector<4x256xf32>
    %332 = arith.mulf %331, %329 : vector<4x256xf32>
    %333 = arith.addf %325, %332 : vector<4x256xf32>
    %c0_74 = arith.constant 0 : index
    %c111_75 = arith.constant 111 : index
    %334 = vector.load %arg14[%c0_74, %c111_75] : memref<4x512xf32, #tpu.memory_space<vmem>>, vector<4x256xf32>
    %335 = vector.extract_strided_slice %2 {offsets = [1, 0], sizes = [1, 256], strides = [1, 1]} : vector<5x256xf32> to vector<1x256xf32>
    %336 = vector.broadcast %335 : vector<1x256xf32> to vector<4x256xf32>
    %337 = arith.mulf %334, %336 : vector<4x256xf32>
    %338 = vector.extract_strided_slice %283 {offsets = [0, 6], sizes = [4, 1], strides = [1, 1]} : vector<4x25xf32> to vector<4x1xf32>
    %339 = vector.broadcast %338 : vector<4x1xf32> to vector<4x256xf32>
    %340 = arith.mulf %339, %337 : vector<4x256xf32>
    %341 = arith.addf %333, %340 : vector<4x256xf32>
    %c0_76 = arith.constant 0 : index
    %c112_77 = arith.constant 112 : index
    %342 = vector.load %arg14[%c0_76, %c112_77] : memref<4x512xf32, #tpu.memory_space<vmem>>, vector<4x256xf32>
    %343 = vector.extract_strided_slice %283 {offsets = [0, 7], sizes = [4, 1], strides = [1, 1]} : vector<4x25xf32> to vector<4x1xf32>
    %344 = vector.broadcast %343 : vector<4x1xf32> to vector<4x256xf32>
    %345 = arith.mulf %344, %342 : vector<4x256xf32>
    %346 = arith.addf %341, %345 : vector<4x256xf32>
    %c0_78 = arith.constant 0 : index
    %c113_79 = arith.constant 113 : index
    %347 = vector.load %arg14[%c0_78, %c113_79] : memref<4x512xf32, #tpu.memory_space<vmem>>, vector<4x256xf32>
    %348 = vector.extract_strided_slice %2 {offsets = [3, 0], sizes = [1, 256], strides = [1, 1]} : vector<5x256xf32> to vector<1x256xf32>
    %349 = vector.broadcast %348 : vector<1x256xf32> to vector<4x256xf32>
    %350 = arith.mulf %347, %349 : vector<4x256xf32>
    %351 = vector.extract_strided_slice %283 {offsets = [0, 8], sizes = [4, 1], strides = [1, 1]} : vector<4x25xf32> to vector<4x1xf32>
    %352 = vector.broadcast %351 : vector<4x1xf32> to vector<4x256xf32>
    %353 = arith.mulf %352, %350 : vector<4x256xf32>
    %354 = arith.addf %346, %353 : vector<4x256xf32>
    %c0_80 = arith.constant 0 : index
    %c114_81 = arith.constant 114 : index
    %355 = vector.load %arg14[%c0_80, %c114_81] : memref<4x512xf32, #tpu.memory_space<vmem>>, vector<4x256xf32>
    %356 = vector.extract_strided_slice %2 {offsets = [4, 0], sizes = [1, 256], strides = [1, 1]} : vector<5x256xf32> to vector<1x256xf32>
    %357 = vector.broadcast %356 : vector<1x256xf32> to vector<4x256xf32>
    %358 = arith.mulf %355, %357 : vector<4x256xf32>
    %359 = vector.extract_strided_slice %283 {offsets = [0, 9], sizes = [4, 1], strides = [1, 1]} : vector<4x25xf32> to vector<4x1xf32>
    %360 = vector.broadcast %359 : vector<4x1xf32> to vector<4x256xf32>
    %361 = arith.mulf %360, %358 : vector<4x256xf32>
    %362 = arith.addf %354, %361 : vector<4x256xf32>
    %c0_82 = arith.constant 0 : index
    %c126_83 = arith.constant 126 : index
    %363 = vector.load %arg14[%c0_82, %c126_83] : memref<4x512xf32, #tpu.memory_space<vmem>>, vector<4x256xf32>
    %364 = vector.extract_strided_slice %2 {offsets = [0, 0], sizes = [1, 256], strides = [1, 1]} : vector<5x256xf32> to vector<1x256xf32>
    %365 = vector.broadcast %364 : vector<1x256xf32> to vector<4x256xf32>
    %366 = arith.mulf %363, %365 : vector<4x256xf32>
    %367 = vector.extract_strided_slice %283 {offsets = [0, 10], sizes = [4, 1], strides = [1, 1]} : vector<4x25xf32> to vector<4x1xf32>
    %368 = vector.broadcast %367 : vector<4x1xf32> to vector<4x256xf32>
    %369 = arith.mulf %368, %366 : vector<4x256xf32>
    %370 = arith.addf %362, %369 : vector<4x256xf32>
    %c0_84 = arith.constant 0 : index
    %c127_85 = arith.constant 127 : index
    %371 = vector.load %arg14[%c0_84, %c127_85] : memref<4x512xf32, #tpu.memory_space<vmem>>, vector<4x256xf32>
    %372 = vector.extract_strided_slice %2 {offsets = [1, 0], sizes = [1, 256], strides = [1, 1]} : vector<5x256xf32> to vector<1x256xf32>
    %373 = vector.broadcast %372 : vector<1x256xf32> to vector<4x256xf32>
    %374 = arith.mulf %371, %373 : vector<4x256xf32>
    %375 = vector.extract_strided_slice %283 {offsets = [0, 11], sizes = [4, 1], strides = [1, 1]} : vector<4x25xf32> to vector<4x1xf32>
    %376 = vector.broadcast %375 : vector<4x1xf32> to vector<4x256xf32>
    %377 = arith.mulf %376, %374 : vector<4x256xf32>
    %378 = arith.addf %370, %377 : vector<4x256xf32>
    %c0_86 = arith.constant 0 : index
    %c128_87 = arith.constant 128 : index
    %379 = vector.load %arg14[%c0_86, %c128_87] : memref<4x512xf32, #tpu.memory_space<vmem>>, vector<4x256xf32>
    %380 = vector.extract_strided_slice %283 {offsets = [0, 12], sizes = [4, 1], strides = [1, 1]} : vector<4x25xf32> to vector<4x1xf32>
    %381 = vector.broadcast %380 : vector<4x1xf32> to vector<4x256xf32>
    %382 = arith.mulf %381, %379 : vector<4x256xf32>
    %383 = arith.addf %378, %382 : vector<4x256xf32>
    %c0_88 = arith.constant 0 : index
    %c129_89 = arith.constant 129 : index
    %384 = vector.load %arg14[%c0_88, %c129_89] : memref<4x512xf32, #tpu.memory_space<vmem>>, vector<4x256xf32>
    %385 = vector.extract_strided_slice %2 {offsets = [3, 0], sizes = [1, 256], strides = [1, 1]} : vector<5x256xf32> to vector<1x256xf32>
    %386 = vector.broadcast %385 : vector<1x256xf32> to vector<4x256xf32>
    %387 = arith.mulf %384, %386 : vector<4x256xf32>
    %388 = vector.extract_strided_slice %283 {offsets = [0, 13], sizes = [4, 1], strides = [1, 1]} : vector<4x25xf32> to vector<4x1xf32>
    %389 = vector.broadcast %388 : vector<4x1xf32> to vector<4x256xf32>
    %390 = arith.mulf %389, %387 : vector<4x256xf32>
    %391 = arith.addf %383, %390 : vector<4x256xf32>
    %c0_90 = arith.constant 0 : index
    %c130_91 = arith.constant 130 : index
    %392 = vector.load %arg14[%c0_90, %c130_91] : memref<4x512xf32, #tpu.memory_space<vmem>>, vector<4x256xf32>
    %393 = vector.extract_strided_slice %2 {offsets = [4, 0], sizes = [1, 256], strides = [1, 1]} : vector<5x256xf32> to vector<1x256xf32>
    %394 = vector.broadcast %393 : vector<1x256xf32> to vector<4x256xf32>
    %395 = arith.mulf %392, %394 : vector<4x256xf32>
    %396 = vector.extract_strided_slice %283 {offsets = [0, 14], sizes = [4, 1], strides = [1, 1]} : vector<4x25xf32> to vector<4x1xf32>
    %397 = vector.broadcast %396 : vector<4x1xf32> to vector<4x256xf32>
    %398 = arith.mulf %397, %395 : vector<4x256xf32>
    %399 = arith.addf %391, %398 : vector<4x256xf32>
    %c0_92 = arith.constant 0 : index
    %c142_93 = arith.constant 142 : index
    %400 = vector.load %arg14[%c0_92, %c142_93] : memref<4x512xf32, #tpu.memory_space<vmem>>, vector<4x256xf32>
    %401 = vector.extract_strided_slice %2 {offsets = [0, 0], sizes = [1, 256], strides = [1, 1]} : vector<5x256xf32> to vector<1x256xf32>
    %402 = vector.broadcast %401 : vector<1x256xf32> to vector<4x256xf32>
    %403 = arith.mulf %400, %402 : vector<4x256xf32>
    %404 = vector.extract_strided_slice %283 {offsets = [0, 15], sizes = [4, 1], strides = [1, 1]} : vector<4x25xf32> to vector<4x1xf32>
    %405 = vector.broadcast %404 : vector<4x1xf32> to vector<4x256xf32>
    %406 = arith.mulf %405, %403 : vector<4x256xf32>
    %407 = arith.addf %399, %406 : vector<4x256xf32>
    %c0_94 = arith.constant 0 : index
    %c143_95 = arith.constant 143 : index
    %408 = vector.load %arg14[%c0_94, %c143_95] : memref<4x512xf32, #tpu.memory_space<vmem>>, vector<4x256xf32>
    %409 = vector.extract_strided_slice %2 {offsets = [1, 0], sizes = [1, 256], strides = [1, 1]} : vector<5x256xf32> to vector<1x256xf32>
    %410 = vector.broadcast %409 : vector<1x256xf32> to vector<4x256xf32>
    %411 = arith.mulf %408, %410 : vector<4x256xf32>
    %412 = vector.extract_strided_slice %283 {offsets = [0, 16], sizes = [4, 1], strides = [1, 1]} : vector<4x25xf32> to vector<4x1xf32>
    %413 = vector.broadcast %412 : vector<4x1xf32> to vector<4x256xf32>
    %414 = arith.mulf %413, %411 : vector<4x256xf32>
    %415 = arith.addf %407, %414 : vector<4x256xf32>
    %c0_96 = arith.constant 0 : index
    %c144_97 = arith.constant 144 : index
    %416 = vector.load %arg14[%c0_96, %c144_97] : memref<4x512xf32, #tpu.memory_space<vmem>>, vector<4x256xf32>
    %417 = vector.extract_strided_slice %283 {offsets = [0, 17], sizes = [4, 1], strides = [1, 1]} : vector<4x25xf32> to vector<4x1xf32>
    %418 = vector.broadcast %417 : vector<4x1xf32> to vector<4x256xf32>
    %419 = arith.mulf %418, %416 : vector<4x256xf32>
    %420 = arith.addf %415, %419 : vector<4x256xf32>
    %c0_98 = arith.constant 0 : index
    %c145_99 = arith.constant 145 : index
    %421 = vector.load %arg14[%c0_98, %c145_99] : memref<4x512xf32, #tpu.memory_space<vmem>>, vector<4x256xf32>
    %422 = vector.extract_strided_slice %2 {offsets = [3, 0], sizes = [1, 256], strides = [1, 1]} : vector<5x256xf32> to vector<1x256xf32>
    %423 = vector.broadcast %422 : vector<1x256xf32> to vector<4x256xf32>
    %424 = arith.mulf %421, %423 : vector<4x256xf32>
    %425 = vector.extract_strided_slice %283 {offsets = [0, 18], sizes = [4, 1], strides = [1, 1]} : vector<4x25xf32> to vector<4x1xf32>
    %426 = vector.broadcast %425 : vector<4x1xf32> to vector<4x256xf32>
    %427 = arith.mulf %426, %424 : vector<4x256xf32>
    %428 = arith.addf %420, %427 : vector<4x256xf32>
    %c0_100 = arith.constant 0 : index
    %c146_101 = arith.constant 146 : index
    %429 = vector.load %arg14[%c0_100, %c146_101] : memref<4x512xf32, #tpu.memory_space<vmem>>, vector<4x256xf32>
    %430 = vector.extract_strided_slice %2 {offsets = [4, 0], sizes = [1, 256], strides = [1, 1]} : vector<5x256xf32> to vector<1x256xf32>
    %431 = vector.broadcast %430 : vector<1x256xf32> to vector<4x256xf32>
    %432 = arith.mulf %429, %431 : vector<4x256xf32>
    %433 = vector.extract_strided_slice %283 {offsets = [0, 19], sizes = [4, 1], strides = [1, 1]} : vector<4x25xf32> to vector<4x1xf32>
    %434 = vector.broadcast %433 : vector<4x1xf32> to vector<4x256xf32>
    %435 = arith.mulf %434, %432 : vector<4x256xf32>
    %436 = arith.addf %428, %435 : vector<4x256xf32>
    %c0_102 = arith.constant 0 : index
    %c158_103 = arith.constant 158 : index
    %437 = vector.load %arg14[%c0_102, %c158_103] : memref<4x512xf32, #tpu.memory_space<vmem>>, vector<4x256xf32>
    %438 = vector.extract_strided_slice %2 {offsets = [0, 0], sizes = [1, 256], strides = [1, 1]} : vector<5x256xf32> to vector<1x256xf32>
    %439 = vector.broadcast %438 : vector<1x256xf32> to vector<4x256xf32>
    %440 = arith.mulf %437, %439 : vector<4x256xf32>
    %441 = vector.extract_strided_slice %283 {offsets = [0, 20], sizes = [4, 1], strides = [1, 1]} : vector<4x25xf32> to vector<4x1xf32>
    %442 = vector.broadcast %441 : vector<4x1xf32> to vector<4x256xf32>
    %443 = arith.mulf %442, %440 : vector<4x256xf32>
    %444 = arith.addf %436, %443 : vector<4x256xf32>
    %c0_104 = arith.constant 0 : index
    %c159_105 = arith.constant 159 : index
    %445 = vector.load %arg14[%c0_104, %c159_105] : memref<4x512xf32, #tpu.memory_space<vmem>>, vector<4x256xf32>
    %446 = vector.extract_strided_slice %2 {offsets = [1, 0], sizes = [1, 256], strides = [1, 1]} : vector<5x256xf32> to vector<1x256xf32>
    %447 = vector.broadcast %446 : vector<1x256xf32> to vector<4x256xf32>
    %448 = arith.mulf %445, %447 : vector<4x256xf32>
    %449 = vector.extract_strided_slice %283 {offsets = [0, 21], sizes = [4, 1], strides = [1, 1]} : vector<4x25xf32> to vector<4x1xf32>
    %450 = vector.broadcast %449 : vector<4x1xf32> to vector<4x256xf32>
    %451 = arith.mulf %450, %448 : vector<4x256xf32>
    %452 = arith.addf %444, %451 : vector<4x256xf32>
    %c0_106 = arith.constant 0 : index
    %c160_107 = arith.constant 160 : index
    %453 = vector.load %arg14[%c0_106, %c160_107] : memref<4x512xf32, #tpu.memory_space<vmem>>, vector<4x256xf32>
    %454 = vector.extract_strided_slice %283 {offsets = [0, 22], sizes = [4, 1], strides = [1, 1]} : vector<4x25xf32> to vector<4x1xf32>
    %455 = vector.broadcast %454 : vector<4x1xf32> to vector<4x256xf32>
    %456 = arith.mulf %455, %453 : vector<4x256xf32>
    %457 = arith.addf %452, %456 : vector<4x256xf32>
    %c0_108 = arith.constant 0 : index
    %c161_109 = arith.constant 161 : index
    %458 = vector.load %arg14[%c0_108, %c161_109] : memref<4x512xf32, #tpu.memory_space<vmem>>, vector<4x256xf32>
    %459 = vector.extract_strided_slice %2 {offsets = [3, 0], sizes = [1, 256], strides = [1, 1]} : vector<5x256xf32> to vector<1x256xf32>
    %460 = vector.broadcast %459 : vector<1x256xf32> to vector<4x256xf32>
    %461 = arith.mulf %458, %460 : vector<4x256xf32>
    %462 = vector.extract_strided_slice %283 {offsets = [0, 23], sizes = [4, 1], strides = [1, 1]} : vector<4x25xf32> to vector<4x1xf32>
    %463 = vector.broadcast %462 : vector<4x1xf32> to vector<4x256xf32>
    %464 = arith.mulf %463, %461 : vector<4x256xf32>
    %465 = arith.addf %457, %464 : vector<4x256xf32>
    %c0_110 = arith.constant 0 : index
    %c162_111 = arith.constant 162 : index
    %466 = vector.load %arg14[%c0_110, %c162_111] : memref<4x512xf32, #tpu.memory_space<vmem>>, vector<4x256xf32>
    %467 = vector.extract_strided_slice %2 {offsets = [4, 0], sizes = [1, 256], strides = [1, 1]} : vector<5x256xf32> to vector<1x256xf32>
    %468 = vector.broadcast %467 : vector<1x256xf32> to vector<4x256xf32>
    %469 = arith.mulf %466, %468 : vector<4x256xf32>
    %470 = vector.extract_strided_slice %283 {offsets = [0, 24], sizes = [4, 1], strides = [1, 1]} : vector<4x25xf32> to vector<4x1xf32>
    %471 = vector.broadcast %470 : vector<4x1xf32> to vector<4x256xf32>
    %472 = arith.mulf %471, %469 : vector<4x256xf32>
    %473 = arith.addf %465, %472 : vector<4x256xf32>
    %474 = vector.broadcast %284 : vector<4x1xf32> to vector<4x256xf32>
    %475 = arith.addf %473, %474 : vector<4x256xf32>
    %476 = vector.extract_strided_slice %1 {offsets = [0, 0], sizes = [4, 256], strides = [1, 1]} : vector<8x256xf32> to vector<4x256xf32>
    %477 = arith.addf %282, %476 : vector<4x256xf32>
    %c0_112 = arith.constant 0 : index
    %c0_113 = arith.constant 0 : index
    %c0_114 = arith.constant 0 : index
    %478 = vector.load %arg12[%c0_112, %c0_113, %c0_114] : memref<1x8x256xf32, #tpu.memory_space<vmem>>, vector<1x4x256xf32>
    %479 = vector.shape_cast %478 : vector<1x4x256xf32> to vector<4x256xf32>
    %480 = vector.shape_cast %477 : vector<4x256xf32> to vector<1x4x256xf32>
    tpu.vector_store %arg12[%c0_112, %c0_113, %c0_114], %480 {strides = array<i32>} : memref<1x8x256xf32, #tpu.memory_space<vmem>>, vector<1x4x256xf32>,
    %481 = vector.extract_strided_slice %1 {offsets = [4, 0], sizes = [4, 256], strides = [1, 1]} : vector<8x256xf32> to vector<4x256xf32>
    %482 = arith.addf %475, %481 : vector<4x256xf32>
    %c0_115 = arith.constant 0 : index
    %c4 = arith.constant 4 : index
    %c0_116 = arith.constant 0 : index
    %483 = vector.load %arg12[%c0_115, %c4, %c0_116] : memref<1x8x256xf32, #tpu.memory_space<vmem>>, vector<1x4x256xf32>
    %484 = vector.shape_cast %483 : vector<1x4x256xf32> to vector<4x256xf32>
    %485 = vector.shape_cast %482 : vector<4x256xf32> to vector<1x4x256xf32>
    tpu.vector_store %arg12[%c0_115, %c4, %c0_116], %485 {strides = array<i32>} : memref<1x8x256xf32, #tpu.memory_space<vmem>>, vector<1x4x256xf32>,
    return
  }
  func.func @transform_0(%arg0: i32) -> (i32, i32, i32) {
    %c0_i32 = arith.constant 0 : i32
    %c0_i32_0 = arith.constant 0 : i32
    %c0_i32_1 = arith.constant 0 : i32
    return %arg0, %c0_i32, %c0_i32_0 : i32, i32, i32
  }
  func.func @transform_1(%arg0: i32) -> (i32, i32) {
    %c0_i32 = arith.constant 0 : i32
    %c0_i32_0 = arith.constant 0 : i32
    %c0_i32_1 = arith.constant 0 : i32
    return %c0_i32, %c0_i32_0 : i32, i32
  }
  func.func @transform_2(%arg0: i32) -> (i32, i32) {
    %c0_i32 = arith.constant 0 : i32
    %c0_i32_0 = arith.constant 0 : i32
    %c0_i32_1 = arith.constant 0 : i32
    return %c0_i32, %c0_i32_0 : i32, i32
  }
  func.func @transform_3(%arg0: i32) -> (i32, i32) {
    %c0_i32 = arith.constant 0 : i32
    %c0_i32_0 = arith.constant 0 : i32
    %c0_i32_1 = arith.constant 0 : i32
    return %c0_i32, %c0_i32_0 : i32, i32
  }
  func.func @transform_4(%arg0: i32) -> (i32, i32) {
    %c0_i32 = arith.constant 0 : i32
    %c0_i32_0 = arith.constant 0 : i32
    %c0_i32_1 = arith.constant 0 : i32
    return %c0_i32, %c0_i32_0 : i32, i32
  }
  func.func @transform_5(%arg0: i32) -> (i32, i32) {
    %c0_i32 = arith.constant 0 : i32
    %c0_i32_0 = arith.constant 0 : i32
    %c0_i32_1 = arith.constant 0 : i32
    return %c0_i32, %c0_i32_0 : i32, i32
  }
  func.func @transform_6(%arg0: i32) -> (i32, i32) {
    %c0_i32 = arith.constant 0 : i32
    %c0_i32_0 = arith.constant 0 : i32
    %c0_i32_1 = arith.constant 0 : i32
    return %c0_i32, %c0_i32_0 : i32, i32
  }
  func.func @transform_7(%arg0: i32) -> (i32, i32) {
    %c0_i32 = arith.constant 0 : i32
    %c0_i32_0 = arith.constant 0 : i32
    %c0_i32_1 = arith.constant 0 : i32
    return %c0_i32, %c0_i32_0 : i32, i32
  }
  func.func @transform_8(%arg0: i32) -> (i32, i32) {
    %c0_i32 = arith.constant 0 : i32
    %c0_i32_0 = arith.constant 0 : i32
    %c0_i32_1 = arith.constant 0 : i32
    return %c0_i32, %c0_i32_0 : i32, i32
  }
  func.func @transform_9(%arg0: i32) -> (i32, i32) {
    %c0_i32 = arith.constant 0 : i32
    %c0_i32_0 = arith.constant 0 : i32
    %c0_i32_1 = arith.constant 0 : i32
    return %c0_i32, %c0_i32_0 : i32, i32
  }
  func.func @transform_10(%arg0: i32) -> (i32, i32) {
    %c0_i32 = arith.constant 0 : i32
    %c0_i32_0 = arith.constant 0 : i32
    %c0_i32_1 = arith.constant 0 : i32
    return %c0_i32, %c0_i32_0 : i32, i32
  }
  func.func @transform_11(%arg0: i32) -> (i32, i32, i32) {
    %c0_i32 = arith.constant 0 : i32
    %c0_i32_0 = arith.constant 0 : i32
    %c0_i32_1 = arith.constant 0 : i32
    return %arg0, %c0_i32, %c0_i32_0 : i32, i32, i32
  }
}

</mosaic_0001>

<bundles_post_ra>
// kernel: tpu_custom_call.1
= control target key start
LH: loop header
LB: loop body
LE: loop exit
PB: predicated region body
PF: predicated region fallthrough
CT: control target
= control target key end

     0   :  { %s4449_s0 = inlined_call_operand.hbm [shape: f32[2,8,256], index: 0, kind: input, shape index: {}]   ;;  %s4450_s1 = inlined_call_operand.vmem [shape: f32[5,256], index: 1, kind: input, shape index: {}]   ;;  %s4451_s2 = inlined_call_operand.vmem [shape: f32[2,8], index: 2, kind: input, shape index: {}]   ;;  %s4452_s3 = inlined_call_operand.vmem [shape: f32[2,1], index: 3, kind: input, shape index: {}]   ;;  %s4453_s4 = inlined_call_operand.vmem [shape: f32[2,25], index: 4, kind: input, shape index: {}]   ;;  %s4454_s5 = inlined_call_operand.vmem [shape: f32[2,1], index: 5, kind: input, shape index: {}]   ;;  %s4455_s6 = inlined_call_operand.vmem [shape: f32[4,2], index: 6, kind: input, shape index: {}]   ;;  %s4456_s7 = inlined_call_operand.vmem [shape: f32[4,2], index: 7, kind: input, shape index: {}]   ;;  %s4457_s8 = inlined_call_operand.vmem [shape: f32[4,1], index: 8, kind: input, shape index: {}]   ;;  %s4458_s9 = inlined_call_operand.vmem [shape: f32[4,25], index: 9, kind: input, shape index: {}]   ;;  %s4459_s10 = inlined_call_operand.vmem [shape: f32[4,1], index: 10, kind: input, shape index: {}]   ;;  %s4460_s11 = inlined_call_operand.hbm [shape: f32[2,8,256], index: 11, kind: output, shape index: {}]  }
   0x1   :  { %4599 = sst [smem:[#allocation67_spill]] %s4449_s0 }
   0x2   :  { %4600 = sst [smem:[#allocation68_spill]] %s4450_s1 }
   0x3   :  { %4601 = sst [smem:[#allocation69_spill]] %s4451_s2 }
   0x4   :  { %4602 = sst [smem:[#allocation70_spill]] %s4452_s3 }
   0x5   :  { %4603 = sst [smem:[#allocation71_spill]] %s4453_s4 }
   0x6   :  { %4604 = sst [smem:[#allocation72_spill]] %s4454_s5 }
   0x7   :  { %4605 = sst [smem:[#allocation73_spill]] %s4455_s6 }
   0x8   :  { %16 = vsyncpa [#allocation5], 0 }
   0x9   :  { %18 = vsyncpa [#allocation5 + $0x1], 0 }
   0xa   :  { %19 = vsyncpa [#allocation6], 0 }
   0xb   :  { %21 = vsyncpa [#allocation6 + $0x1], 0  ;;  %s2989_s17 = smov 0   ;;  %s2991_s18 = smov 0  }
   0xc   :  { %s2993_s19 = smov 0   ;;  %s2995_s20 = smov 0  }
   0xd LB: > { %4606 = sst [smem:[#allocation10_spill]] %s2866_s18  ;;  %s3010_s21 = sadd.s32 4294967295, %s2874_s20   ;;  %s2874_s20 = sphi %s2995_s20, %s4826_s20   ;;  %s2870_s19 = sphi %s2993_s19, %s4829_s19   ;;  %s2866_s18 = sphi %s2991_s18, %s4828_s18   ;;  %s2862_s17 = sphi %s2989_s17, %s4827_s17  }
   0xe   : > { %4607 = sst [smem:[#allocation11_spill]] %s2870_s19  ;;  %s2594_s22 = sadd.s32 4294967294, %s2874_s20  }
   0xf   : > { %4608 = sst [smem:[#allocation12_spill]] %s2874_s20  ;;  %s3014_s23 = sadd.s32 1, %s2874_s20  }
  0x10   : > { %4609 = sst [smem:[#allocation13_spill]] %s3014_s23  ;;  %s34_s24 = sadd.s32 1, %s2870_s19 }
  0x11   : > { %s31_s25 = ssub.s32 %s2874_s20, %s3014_s23  ;;  %p41_p0 = scmp.ne.s32.totalorder %s2870_s19, %s2866_s18 }
  0x12   : > { %p32_p1 = scmp.eq.s32.totalorder %s31_s25, 0  ;;  %p42_p2 = scmp.eq.s32.totalorder %s2874_s20, 0 }
  0x13   : > { %p47_p3 = scmp.ne.s32.totalorder %s2866_s18, %s2862_s17  ;;  %p48_p4 = scmp.eq.s32.totalorder %s3010_s21, 0 }
  0x14   : > { %s3026_s26 = scalar_select %p32_p1, %s2870_s19, %s34_s24  }
  0x15   : > { %p3028_p5 = por %p42_p2, %p41_p0  ;;  %p3032_p6 = por %p48_p4, %p47_p3 }
  0x16   : > { %4610 = sst [smem:[#allocation14_spill]] %s3026_s26  ;;  %p281_p7 = scmp.eq.s32.totalorder %s3010_s21, 1 }
  0x17   : > { %p287_p8 = scmp.eq.s32.totalorder %s2594_s22, 1  ;;  %p2624_p10 = scmp.lt.s32.totalorder %s2874_s20, 2 }
  0x18   : > { %p3039_p11 = por %p281_p7, %p41_p0  ;;  %s337_s12 = sand.u32 1, %s2870_s19  }
  0x19   : > { %p3043_p12 = por %p287_p8, %p47_p3  ;;  %s2610_s13 = sshll.u32 %s2874_s20, 8 }
  0x1a   : > { %s4613_s29 = scalar_select %p3039_p11, 1, 0 }
  0x1b   : > { %s4614_s30 = scalar_select %p3043_p12, 1, 0 }
  0x1c   : > { %s2597_s14 = sshll.u32 %s337_s12, 4  ;;  %s4616_s0 = sld [smem:[#allocation67_spill]] }
  0x1d   : > { %4615 = sst [smem:[#allocation15_spill]] %s4614_s30  ;;  %s341_s22 = scalar_lea.vmem [#allocation4], %s2597_s14 }
  0x1e   : > { %s349_s25 = sshll.u32 %s341_s22, 4  ;;  %p3056_p13 = pnand %p2624_p10, %p3028_p5  ;;  %s3060_s25 = int_to_ptr.vmem [resolvable:$true] %s349_s25 }
  0x1f   : > { %s338_s15 = scalar_lea.sflag [#allocation5], %s337_s12 }
  0x20   : > { %p2780_p3 = pneg %p3056_p13 }
  0x22   : > { %s3052_s24 = scalar_lea.hbm %s4616_s0, %s2610_s13  ;;  %s2783_s16 = scalar_lea.hbm %s4616_s0, 512 }
  0x23   : > { %s2778_s13 = scalar_lea.hbm %s3052_s24, 256  ;;  %p2784_p5 = scmp.lt.u32.totalorder %s3052_s24, %s4616_s0 }
  0x24   : > { %p2779_p2 = scmp.ne.s32.totalorder %s3052_s24, %s2778_s13  ;;  %p2785_p8 = scmp.lt.u32.totalorder %s2783_s16, %s2778_s13 }
  0x25   : > { %p2787_p9 = scmp.lt.u32.totalorder %s2778_s13, %s3052_s24 }
  0x26   : > { %p2781_p4 = pnand %p2780_p3, %p2779_p2  ;;  %p2786_p10 = por %p2785_p8, %p2784_p5 }
  0x28   : > { %p2782_p7 = pneg %p2781_p4  ;;  %p2788_p0 = por %p2787_p9, %p2786_p10 }
  0x2a   : > { %p2789_p1 = pnand %p2788_p0, %p2782_p7 }
  0x2c   : > { %2792 = shalt.err (!%p2789_p1)
}
  0x2d   : > { %s2793_s12 = scalar_lea.vmem %s3060_s25, 256  ;;  %s2876_s27 = smov [#allocation4]  }
  0x2e   : > { %p2794_p2 = scmp.ne.s32.totalorder %s3060_s25, %s2793_s12  ;;  %s2798_s14 = sshll.u32 %s2876_s27, 4  ;;  %s2799_s14 = int_to_ptr.vmem [resolvable:$false] %s2798_s14 }
  0x2f   : > { %s2800_s19 = scalar_lea.vmem %s2799_s14, 512  ;;  %p2801_p11 = scmp.lt.s32.totalorder %s3060_s25, %s2799_s14 }
  0x30   : > { %p2796_p4 = pnand %p2794_p2, %p2780_p3  ;;  %p2802_p5 = scmp.lt.s32.totalorder %s2800_s19, %s2793_s12 }
  0x32   : > { %p2797_p12 = pneg %p2796_p4  ;;  %p2803_p8 = por %p2802_p5, %p2801_p11 }
  0x34   : > { %p2804_p9 = pnand %p2803_p8, %p2797_p12 }
  0x36   : > { %2807 = shalt.err (!%p2804_p9)
}
  0x37   : > { %2619 = dma.hbm_to_vmem [thread:$0]  (!%p3056_p13), %s3052_s24, 256, %s3060_s25, %s338_s15  }
  0x38   : > { %p4618_p0 = scmp.lt.s32.totalorder %s2874_s20, 3  ;;  %p4619_p1 = scmp.ge.s32.totalorder %s2874_s20, 1 }
  0x3a   : > { %p355_p3 = pnand %p4619_p1, %p4618_p0 }
  0x3c   : > { %358 = sbr.rel (%p355_p3) target bundleno = 2636 (0xa4c), region = 64 }
  0x43   : > { %s3094_s13 = sand.u32 1, %s2866_s18  }
  0x44   : > { %s4463_s16 = sshll.u32 %s3094_s13, 4  ;;  %s361_s22 = scalar_lea.sflag [#allocation5], %s3094_s13 }
  0x45   : > { %s3100_s26 = scalar_lea.vmem [#allocation4], %s4463_s16 }
  0x46   : > { %2853 = dma.done.wait (%p3032_p6), %s361_s22, 256  }
  0x47   : > { %2855 = vsyncadd (%p3032_p6), %s361_s22, 4294967040  ;;  %v4515_v0 = vmov 2   ;;  %v4519_v1 = vmov 1   ;;  %s4620_s2 = sld [smem:[#allocation69_spill]]  ;;  %v413_v3 = vlaneseq  ;;  %v4518_v4 = vmov 3   ;;  %s4622_s1 = sld [smem:[#allocation68_spill]] }
  0x48   : > { %2710 = vset.pattern.permute.xlu1 %v4515_v0  ;;  %2709 = vset.pattern.permute.xlu0 %v4519_v1  ;;  %v4506_v5 = vmov 5   ;;  %v2881_v8 = vmov 1983009808   ;;  %v4513_v10 = vmov 4   ;;  %v4524_v11 = vmov 0   ;;  %s4623_s3 = sld [smem:[#allocation70_spill]] }
  0x49   : > { %v3113_v6 = vshrl.u32 %v413_v3, 7  ;;  %v575_v9 = vunpack.c.l.s4 %v2881_v8  ;;  %v4505_v18 = vmov 6   ;;  %s4624_s4 = sld [smem:[#allocation71_spill]]  ;;  %v4504_v23 = vmov 8   ;;  %s4464_s25 = smov 94   ;;  %v403_v53 = vld [vmem:[%s3100_s26] sm:$0xff] }
  0x4a   : > { %v4507_v24 = vmov 7   ;;  %v4500_v28 = vmov 9   ;;  %v2888_v29 = vmov 0.0   ;;  %v4499_v32 = vmov 10   ;;  %s4466_s28 = smov 95   ;;  %s4501_s15 = smov 1  }
  0x4b   : > { %v3116_v7 = vsub.s32 0, %v3113_v6  ;;  %v576_v17 = vunpack.c.0.s8 %v575_v9  ;;  %v3143_v22 = vsub.s32 1, %v3113_v6  ;;  %549 = vst [vmem:[#allocation2] sm:$0xff] %v2888_v29  ;;  %1750 = vst [vmem:[#allocation3] sm:$0xff] %v2888_v29  ;;  %v3161_v31 = vsub.s32 3, %v3113_v6  ;;  %s4470_s12 = smov 97  }
  0x4c   : > { %1751 = vst [vmem:[#allocation3 + $0x8] sm:$0xff] %v2888_v29  ;;  %v3173_v36 = vsub.s32 4, %v3113_v6  ;;  %v4493_v40 = vmov 11   ;;  %v4469_v43 = vmov 14   ;;  %s4472_s27 = smov 98   ;;  %s4474_s14 = smov 110  }
  0x4d   : > { %v407_v2 = vld [vmem:[%s4620_s2] sm:$0x3]  ;;  %4621 = vst [vmem:[#allocation16_spill] sm:$0xff] %v3116_v7  ;;  %v406_v13 = vld [vmem:[%s4622_s1 + $0x8] sm:$0x1f]  ;;  %v3140_v21 = vsub.s32 %v576_v17, %v3113_v6  ;;  %4626 = vst [vmem:[#allocation18_spill] sm:$0xff] %v3143_v22  ;;  %v432_v55 = vrot.slane %v403_v53, %v3143_v22  ;;  %v416_v57 = vrot.slane %v403_v53, %v3116_v7 }
  0x4e   : > { %442 = vperm.xlu1 %2710, %v407_v2   ;;  %426 = vperm.xlu0 %2709, %v407_v2   ;;  %v405_v12 = vld [vmem:[%s4622_s1] sm:$0x1f]  ;;  %v570_v16 = vrot.slane %v406_v13, %v3116_v7  ;;  %v633_v27 = vrot.slane %v406_v13, %v3143_v22  ;;  %v732_v35 = vrot.slane %v406_v13, %v3161_v31  ;;  %s4476_s19 = smov 111   ;;  %s4478_s22 = smov 113   ;;  %v4503_v45 = vmov 12  }
  0x4f   : > { %v537_v14 = vld [vmem:[%s4623_s3] sm:$0x3]  ;;  %v566_v15 = vrot.slane %v405_v12, %v3116_v7  ;;  %v629_v26 = vrot.slane %v405_v12, %v3143_v22  ;;  %v728_v34 = vrot.slane %v405_v12, %v3161_v31  ;;  %v790_v38 = vrot.slane %v405_v12, %v3173_v36  ;;  %s4480_s24 = smov 114   ;;  %s4484_s16 = smov 126  }
  0x50   : > { %v3135_v19 = vld [vmem:[%s4624_s4] sm:$0x3]  ;;  %v794_v39 = vrot.slane %v406_v13, %v3173_v36  ;;  %v4490_v46 = vmov 13   ;;  %v4468_v47 = vmov 15   ;;  %v447_v50 = vsub.s32 2, %v3113_v6  ;;  %s4654_s0 = smov 33  }
  0x51   : > { %v3137_v20 = vcombine.low %v566_v15, %v570_v16  ;;  %v3158_v30 = vcombine.low %v629_v26, %v633_v27  ;;  %v3178_v37 = vcombine.low %v728_v34, %v732_v35  ;;  %v404_v54 = vld [vmem:[%s3100_s26 + $0x8] sm:$0xff]  ;;  %v464_v61 = vrot.slane %v403_v53, %v3161_v31  ;;  %s4660_s3 = smov 34   ;;  %s4664_s1 = smov 94  }
  0x52   : > { %2711 = vset.pattern.permute.xlu1 %v4518_v4  ;;  %2713 = vset.pattern.permute.xlu0 %v4506_v5  ;;  %v3190_v42 = vcombine.low %v790_v38, %v794_v39  ;;  %v436_v56 = vrot.slane %v404_v54, %v3143_v22  ;;  %v420_v58 = vrot.slane %v404_v54, %v3116_v7  ;;  %v495_v63 = vsub.s32 5, %v3113_v6  ;;  %s4665_s6 = sld [smem:[#allocation73_spill]]  ;;  %s4666_s5 = sld [smem:[#allocation72_spill]] }
  0x53   : > { %458 = vperm.xlu1 %2711, %v407_v2   ;;  %490 = vperm.xlu0 %2713, %v407_v2   ;;  %4625 = vst [vmem:[#allocation17_spill] sm:$0xff] %v3137_v20  ;;  %v3150_v25 = vrot.slane %v3137_v20, %v3140_v21  ;;  %4627 = vst [vmem:[#allocation19_spill] sm:$0xff] %v3158_v30  ;;  %v3168_v33 = vrot.slane %v3158_v30, %v3140_v21  ;;  %v511_v16 = vsub.s32 6, %v3113_v6  ;;  %vm4535_vm0 = vcmask 777216   ;;  %s4752_s30 = sshll.u32 %s3094_s13, 4  ;;  %s4757_s18 = smov 31  }
  0x54   : > { %4628 = vst [vmem:[#allocation20_spill] sm:$0xff] %v3178_v37  ;;  %v3188_v41 = vrot.slane %v3178_v37, %v3140_v21  ;;  %4629 = vst [vmem:[#allocation21_spill] sm:$0xff] %v3190_v42  ;;  %v3199_v44 = vrot.slane %v3190_v42, %v3140_v21  ;;  %v448_v59 = vrot.slane %v403_v53, %v447_v50  ;;  %v527_v35 = vsub.s32 7, %v3113_v6  ;;  %s3958_s2 = scalar_lea.vmem [#allocation7], %s4752_s30  ;;  %s4759_s20 = smov 30  }
  0x55   : > { %v452_v60 = vrot.slane %v404_v54, %v447_v50  ;;  %v468_v62 = vrot.slane %v404_v54, %v3161_v31  ;;  %v484_v15 = vrot.slane %v404_v54, %v3173_v36  ;;  %v496_v34 = vrot.slane %v403_v53, %v495_v63  ;;  %s4763_s23 = smov 17   ;;  %s4764_s30 = smov 16  }
  0x56   : > { %v500_v31 = vrot.slane %v404_v54, %v495_v63  ;;  %vm4545_vm1 = vcmask 793600   ;;  %vm4529_vm2 = vcmask 769024   ;;  %vm4555_vm3 = vcmask 801792   ;;  %p4821_p11 = scmp.ne.s32.totalorder %s4613_s29, 0 }
  0x57   : > { %2712 = vset.pattern.permute.xlu1 %v4513_v10  ;;  %2714 = vset.pattern.permute.xlu0 %v4524_v11  ;;  %vm4590_vm4 = vcmask 900096   ;;  %vm1140_vm5 = vcmask 7168   ;;  %vm896_vm6 = vcmask 908288   ;;  %vm977_vm7 = vcmask 924672  }
  0x58   : > { %474 = vperm.xlu1 %2712, %v407_v2   ;;  %410 = vperm.xlu0 %2714, %v407_v2   ;;  %vm1021_vm8 = vcmask 932864   ;;  %vm1065_vm9 = vcmask 1031168   ;;  %vm1109_vm10 = vcmask 1039360   ;;  %vm1096_vm11 = vcmask 15360  }
  0x59   : > { %vm1052_vm12 = vcmask 113664   ;;  %vm1008_vm13 = vcmask 121856   ;;  %v4514_v10 = vmov 18   ;;  %vm927_vm14 = vcmask 138240  }
  0x5a   : > { %vm4598_vm15 = vcmask 146432  }
  0x5c   : > { %2715 = vset.pattern.permute.xlu1 %v4505_v18  ;;  %540 = vperm.xlu0 %2714, %v537_v14   ;;  %v480_v14 = vrot.slane %v403_v53, %v3173_v36 }
  0x5d   : > { %506 = vperm.xlu1 %2715, %v407_v2  }
  0x60   : > { %2720 = vset.pattern.permute.xlu0 %v4504_v23 }
  0x61   : > { %2716 = vset.pattern.permute.xlu1 %v4507_v24  ;;  %982 = vperm.xlu0 %2720, %v3135_v19  }
  0x62   : > { %522 = vperm.xlu1 %2716, %v407_v2  }
  0x65   : > { %2721 = vset.pattern.permute.xlu0 %v4500_v28 }
  0x66   : > { %1026 = vperm.xlu0 %2721, %v3135_v19   ;;  %581 = vrot.lane.b32.xlu1 %v3150_v25, %s4464_s25  ;;  %s4486_s25 = smov 127  }
  0x67   : > { %2717 = vset.pattern.permute.xlu1 %v4524_v11 }
  0x6a   : > { %2722 = vset.pattern.permute.xlu0 %v4499_v32  ;;  %590 = vperm.xlu1 %2717, %v3135_v19  }
  0x6b   : > { %1070 = vperm.xlu0 %2722, %v3135_v19  }
  0x6e   : > { %644 = vrot.lane.b32.xlu1 %v3168_v33, %s4466_s28  ;;  %s4508_s28 = smov 2  }
  0x6f   : > { %2723 = vset.pattern.permute.xlu0 %v4493_v40  ;;  %2718 = vset.pattern.permute.xlu1 %v4515_v0 }
  0x70   : > { %1114 = vperm.xlu0 %2723, %v3135_v19  }
  0x72   : > { %689 = vperm.xlu1 %2718, %v3135_v19  }
  0x74   : > { %1170 = vrot.lane.b32.xlu0 %v3188_v41, %s4501_s15 }
  0x75   : > { %2726 = vset.pattern.permute.xlu0 %v4469_v43  ;;  %v528_v43 = vrot.slane %v403_v53, %v527_v35 }
  0x76   : > { %743 = vrot.lane.b32.xlu1 %v3188_v41, %s4470_s12  ;;  %s4482_s12 = smov 32  }
  0x77   : > { %2719 = vset.pattern.permute.xlu1 %v4507_v24 }
  0x78   : > { %1219 = vperm.xlu0 %2726, %v3135_v19  }
  0x7a   : > { %805 = vrot.lane.b32.xlu1 %v3199_v44, %s4472_s27  ;;  %s4496_s27 = smov 33  }
  0x7c   : > { %2727 = vset.pattern.permute.xlu0 %v4468_v47 }
  0x7e   : > { %849 = vrot.lane.b32.xlu1 %v3150_v25, %s4474_s14  ;;  %s4488_s14 = smov 16  }
  0x82   : > { %893 = vrot.lane.b32.xlu1 %v3168_v33, %s4476_s19  ;;  %s4494_s19 = smov 34  }
  0x86   : > { %938 = vperm.xlu1 %2719, %v3135_v19  }
  0x8a   : > { %974 = vrot.lane.b32.xlu1 %v3188_v41, %s4478_s22  ;;  %s4543_s22 = smov 31  }
  0x8b   : > { %2724 = vset.pattern.permute.xlu1 %v4503_v45 }
  0x8e   : > { %1018 = vrot.lane.b32.xlu1 %v3199_v44, %s4480_s24  ;;  %s4536_s24 = smov 30  }
  0x92   : > { %1062 = vrot.lane.b32.xlu1 %v3150_v25, %s4484_s16  ;;  %s4530_s16 = smov 17  }
  0x96   : > { %1106 = vrot.lane.b32.xlu1 %v3168_v33, %s4486_s25 }
  0x9a   : > { %1151 = vperm.xlu1 %2724, %v3135_v19  }
  0x9e   : > { %2725 = vset.pattern.permute.xlu1 %v4490_v46 }
  0x9f   : > { %1177 = vperm.xlu1 %2725, %v3135_v19  }
  0xa3   : > { %1212 = vrot.lane.b32.xlu1 %v3199_v44, %s4508_s28 }
  0xcd   : > { %v443_v48 = vpop.permute.xlu1 %442  ;;  %v427_v49 = vpop.permute.xlu0 %426 }
  0xce   : > { %v437_v8 = vmul.f32 %v432_v55, %v427_v49  ;;  %v438_v9 = vmul.f32 %v436_v56, %v427_v49  ;;  %v453_v17 = vmul.f32 %v448_v59, %v443_v48  ;;  %v454_v26 = vmul.f32 %v452_v60, %v443_v48 }
  0xcf   : > { %v512_v56 = vrot.slane %v403_v53, %v511_v16  ;;  %v532_v59 = vrot.slane %v404_v54, %v527_v35 }
  0xd2   : > { %v459_v51 = vpop.permute.xlu1 %458  ;;  %v491_v52 = vpop.permute.xlu0 %490 }
  0xd3   : > { %v469_v38 = vmul.f32 %v464_v61, %v459_v51  ;;  %v470_v39 = vmul.f32 %v468_v62, %v459_v51  ;;  %v501_v48 = vmul.f32 %v496_v34, %v491_v52  ;;  %v502_v60 = vmul.f32 %v500_v31, %v491_v52 }
  0xd7   : > { %v475_v2 = vpop.permute.xlu1 %474  ;;  %v411_v3 = vpop.permute.xlu0 %410 }
  0xd8   : > { %v421_v12 = vmul.f32 %v416_v57, %v411_v3  ;;  %v422_v13 = vmul.f32 %v420_v58, %v411_v3  ;;  %v516_v57 = vrot.slane %v404_v54, %v511_v16  ;;  %v485_v58 = vmul.f32 %v480_v14, %v475_v2 }
  0xd9   : > { %v486_v3 = vmul.f32 %v484_v15, %v475_v2 }
  0xda   : > { %v439_v27 = vadd.f32 %v437_v8, %v421_v12  ;;  %v440_v29 = vadd.f32 %v438_v9, %v422_v13 }
  0xdb   : > { %v541_v63 = vpop.permute.xlu0 %540 }
  0xdc   : > { %v455_v50 = vadd.f32 %v453_v17, %v439_v27  ;;  %v456_v49 = vadd.f32 %v454_v26, %v440_v29  ;;  %v507_v55 = vpop.permute.xlu1 %506 }
  0xdd   : > { %v517_v51 = vmul.f32 %v512_v56, %v507_v55  ;;  %v518_v62 = vmul.f32 %v516_v57, %v507_v55 }
  0xde   : > { %v471_v36 = vadd.f32 %v469_v38, %v455_v50  ;;  %v472_v47 = vadd.f32 %v470_v39, %v456_v49 }
  0xe0   : > { %v487_v8 = vadd.f32 %v485_v58, %v471_v36  ;;  %v488_v9 = vadd.f32 %v486_v3, %v472_v47  ;;  %v3239_v14 = vpop.permute.xlu0 %982 }
  0xe1   : > { %v523_v12 = vpop.permute.xlu1 %522 }
  0xe2   : > { %v503_v6 = vadd.f32 %v501_v48, %v487_v8  ;;  %v504_v61 = vadd.f32 %v502_v60, %v488_v9  ;;  %v533_v26 = vmul.f32 %v528_v43, %v523_v12  ;;  %v534_v16 = vmul.f32 %v532_v59, %v523_v12 }
  0xe4   : > { %v519_v13 = vadd.f32 %v517_v51, %v503_v6  ;;  %v520_v17 = vadd.f32 %v518_v62, %v504_v61 }
  0xe5   : > { %v582_v2 = vpop.permute.xlu1 %581  ;;  %v3247_v34 = vpop.permute.xlu0 %1026 }
  0xe6   : > { %v535_v15 = vadd.f32 %v533_v26, %v519_v13  ;;  %v536_v53 = vadd.f32 %v534_v16, %v520_v17  ;;  %v583_v56 = vrot.slane %v582_v2, 6 }
  0xe8   : > { %v543_v54 = vadd.f32 %v541_v63, %v535_v15  ;;  %v544_v27 = vadd.f32 %v541_v63, %v536_v53  ;;  %v585_v12 = vsel %vm4529_vm2, %v583_v56, %v582_v2  ;;  %vm4597_vm2 = vcmask 244736  }
  0xe9   : > { %v3241_v52 = vpop.permute.xlu1 %590 }
  0xea   : > { %v3243_v47 = vmax.f32 %v543_v54, 0.0  ;;  %v3245_v29 = vmax.f32 %v544_v27, 0.0  ;;  %v3251_v35 = vpop.permute.xlu0 %1070 }
  0xec   : > { %4630 = vst [vmem:[#allocation22_spill] sm:$0xff] %v3243_v47  ;;  %4631 = vst [vmem:[#allocation23_spill] sm:$0xff] %v3245_v29  ;;  %v552_v31 = vcombine.low %v3243_v47, %v3245_v29 }
  0xed   : > { %v645_v43 = vpop.permute.xlu1 %644 }
  0xee   : > { %2603 = vst.sshfl [vmem:[#allocation2 + $0x2] sm:$0x33 pattern:$0x76325410] %v552_v31  ;;  %v646_v38 = vrot.slane %v645_v43, 6 }
  0xef   : > { %v3258_v36 = vpop.permute.xlu0 %1114 }
  0xf0   : > { %v648_v49 = vsel %vm4535_vm0, %v646_v38, %v645_v43  ;;  %vm4596_vm0 = vcmask 252928  }
  0xf1   : > { %v3253_v39 = vpop.permute.xlu1 %689 }
  0xf3   : > { %v1171_v26 = vpop.permute.xlu0 %1170 }
  0xf4   : > { %v1172_v31 = vrot.slane %v1171_v26, 6 }
  0xf5   : > { %v625_v50 = vld [vmem:[#allocation2] sm:$0x3f]  ;;  %v744_v55 = vpop.permute.xlu1 %743 }
  0xf6   : > { %v3256_v57 = vmul.f32 %v648_v49, %v625_v50  ;;  %v745_v58 = vrot.slane %v744_v55, 6  ;;  %v687_v3 = vld [vmem:[#allocation2] sm:$0x3f] }
  0xf7   : > { %v700_v59 = vrot.slane %v687_v3, %v3140_v21  ;;  %v562_v48 = vld [vmem:[#allocation2] sm:$0x3f]  ;;  %v693_v27 = vcombine.high %v687_v3, %v687_v3 }
  0xf8   : > { %v3263_v60 = vrot.slane %v3256_v57, %v3140_v21  ;;  %v936_v8 = vld [vmem:[#allocation2] sm:$0x3f]  ;;  %v747_v9 = vsel %vm4545_vm1, %v745_v58, %v744_v55  ;;  %v3270_v61 = vmul.f32 %v585_v12, %v562_v48  ;;  %v1173_v48 = vsel %vm1140_vm5, %v1172_v31, %v1171_v26 }
  0xf9   : > { %709 = vrot.lane.b32.xlu0 %v700_v59, %s4482_s12  ;;  %v806_v63 = vpop.permute.xlu1 %805  ;;  %v724_v51 = vld [vmem:[#allocation2] sm:$0x3f]  ;;  %v3273_v62 = vrot.slane %v936_v8, %v3140_v21  ;;  %v708_v17 = vcombine.high %v700_v59, %v700_v59  ;;  %v707_v58 = vrot.slane %v693_v27, %v3140_v21  ;;  %v942_v3 = vcombine.high %v936_v8, %v936_v8 }
  0xfa   : > { %v807_v6 = vrot.slane %v806_v63, 6  ;;  %672 = vrot.lane.b32.xlu1 %v3263_v60, %s4496_s27  ;;  %v3275_v13 = vmul.f32 %v747_v9, %v724_v51  ;;  %v786_v53 = vld [vmem:[#allocation2] sm:$0x3f]  ;;  %v3283_v54 = vrot.slane %v3270_v61, %v3140_v21  ;;  %v594_v27 = vcombine.high %v3270_v61, %v3270_v61 }
  0xfb   : > { %v848_v56 = vld [vmem:[#allocation2] sm:$0x3f]  ;;  %v656_v61 = vcombine.high %v3256_v57, %v3256_v57  ;;  %vm4595_vm1 = vcmask 269312  }
  0xfc   : > { %v809_v16 = vsel %vm4555_vm3, %v807_v6, %v806_v63  ;;  %v3289_v38 = vrot.slane %v3275_v13, %v3140_v21  ;;  %v1169_v59 = vld [vmem:[#allocation2 + $0x2] sm:$0x3f]  ;;  %vm4593_vm3 = vcmask 277504  }
  0xfd   : > { %958 = vrot.lane.b32.xlu0 %v3273_v62, %s4488_s14  ;;  %v850_v2 = vpop.permute.xlu1 %849  ;;  %v3285_v43 = vmul.f32 %v809_v16, %v786_v53  ;;  %v3310_v8 = vmul.f32 %v1173_v48, %v1169_v59  ;;  %v892_v51 = vld [vmem:[#allocation2] sm:$0x3f]  ;;  %v957_v59 = vcombine.high %v3273_v62, %v3273_v62 }
  0xfe   : > { %v851_v15 = vrot.slane %v850_v2, 6  ;;  %711 = vrot.lane.b32.xlu1 %v708_v17, %s4482_s12  ;;  %v956_v17 = vrot.slane %v942_v3, %v3140_v21  ;;  %v1337_v23 = vld [vmem:[#allocation2 + $0x2] sm:$0x3f] }
  0xff   : > { %v3302_v63 = vrot.slane %v3285_v43, %v3140_v21  ;;  %v3324_v53 = vrot.slane %v3310_v8, %v3140_v21  ;;  %v1350_v5 = vrot.slane %v1337_v23, %v3140_v21  ;;  %v1343_v24 = vcombine.high %v1337_v23, %v1337_v23  ;;  %v1295_v23 = vld [vmem:[#allocation2 + $0x2] sm:$0x3f] }
 0x100   : > { %v853_v50 = vsel %vm4590_vm4, %v851_v15, %v850_v2  ;;  %v1542_v47 = vld [vmem:[#allocation2 + $0x2] sm:$0x3f]  ;;  %vm4592_vm4 = vcmask 261120  }
 0x101   : > { %610 = vrot.lane.b32.xlu0 %v3283_v54, %s4494_s19  ;;  %v894_v49 = vpop.permute.xlu1 %893  ;;  %v3298_v9 = vmul.f32 %v853_v50, %v848_v56  ;;  %v973_v56 = vld [vmem:[#allocation2] sm:$0x3f]  ;;  %v1555_v7 = vrot.slane %v1542_v47, %v3140_v21 }
 0x102   : > { %v895_v55 = vrot.slane %v894_v49, 6  ;;  %771 = vrot.lane.b32.xlu1 %v3289_v38, %s4543_s22 }
 0x103   : > { %v3317_v16 = vrot.slane %v3298_v9, %v3140_v21 }
 0x104   : > { %v897_v12 = vsel %vm896_vm6, %v895_v55, %v894_v49 }
 0x105   : > { %713 = vrot.lane.b32.xlu0 %v707_v58, %s4482_s12  ;;  %v3306_v6 = vpop.permute.xlu1 %938  ;;  %v3313_v26 = vmul.f32 %v897_v12, %v892_v51  ;;  %s4491_s12 = smov 18   ;;  %v608_v58 = vrot.slane %v594_v27, %v3140_v21 }
 0x106   : > { %833 = vrot.lane.b32.xlu1 %v3302_v63, %s4536_s24 }
 0x107   : > { %v3330_v31 = vrot.slane %v3313_v26, %v3140_v21 }
 0x109   : > { %962 = vrot.lane.b32.xlu0 %v956_v17, %s4488_s14  ;;  %v975_v2 = vpop.permute.xlu1 %974  ;;  %v1017_v17 = vld [vmem:[#allocation2] sm:$0x3f] }
 0x10a   : > { %v976_v15 = vrot.slane %v975_v2, 6  ;;  %877 = vrot.lane.b32.xlu1 %v3317_v16, %s4491_s12 }
 0x10c   : > { %v978_v50 = vsel %vm977_vm7, %v976_v15, %v975_v2  ;;  %v670_v2 = vrot.slane %v656_v61, %v3140_v21  ;;  %v755_v15 = vcombine.high %v3275_v13, %v3275_v13  ;;  %v817_v13 = vcombine.high %v3285_v43, %v3285_v43 }
 0x10d   : > { %1197 = vrot.lane.b32.xlu0 %v3324_v53, %s4486_s25  ;;  %v1019_v49 = vpop.permute.xlu1 %1018  ;;  %v980_v3 = vmul.f32 %v978_v50, %v973_v56  ;;  %s4522_s25 = smov 15   ;;  %v861_v43 = vcombine.high %v3298_v9, %v3298_v9 }
 0x10e   : > { %v1020_v55 = vrot.slane %v1019_v49, 6  ;;  %921 = vrot.lane.b32.xlu1 %v3330_v31, %s4530_s16  ;;  %v769_v56 = vrot.slane %v755_v15, %v3140_v21 }
 0x10f   : > { %v3349_v27 = vrot.slane %v980_v3, %v3140_v21 }
 0x110   : > { %v1022_v48 = vsel %vm1021_vm8, %v1020_v55, %v1019_v49  ;;  %v1061_v55 = vld [vmem:[#allocation2] sm:$0x3f] }
 0x111   : > { %614 = vrot.lane.b32.xlu0 %v608_v58, %s4494_s19  ;;  %v1063_v12 = vpop.permute.xlu1 %1062  ;;  %v1024_v57 = vmul.f32 %v1022_v48, %v1017_v17 }
 0x112   : > { %v1064_v51 = vrot.slane %v1063_v12, 6  ;;  %960 = vrot.lane.b32.xlu1 %v957_v59, %s4488_s14  ;;  %s4511_s14 = smov 14  }
 0x113   : > { %v3359_v61 = vrot.slane %v1024_v57, %v3140_v21 }
 0x114   : > { %v1066_v62 = vsel %vm1065_vm9, %v1064_v51, %v1063_v12  ;;  %v1105_v12 = vld [vmem:[#allocation2] sm:$0x3f]  ;;  %v831_v51 = vrot.slane %v817_v13, %v3140_v21  ;;  %v986_v13 = vcombine.high %v980_v3, %v980_v3  ;;  %v609_v3 = vcombine.high %v3283_v54, %v3283_v54 }
 0x115   : > { %676 = vrot.lane.b32.xlu0 %v670_v2, %s4496_s27  ;;  %v1107_v50 = vpop.permute.xlu1 %1106  ;;  %v1068_v58 = vmul.f32 %v1066_v62, %v1061_v55  ;;  %v875_v62 = vrot.slane %v861_v43, %v3140_v21  ;;  %v1030_v43 = vcombine.high %v1024_v57, %v1024_v57  ;;  %v671_v57 = vcombine.high %v3263_v60, %v3263_v60 }
 0x116   : > { %v1108_v49 = vrot.slane %v1107_v50, 6  ;;  %1002 = vrot.lane.b32.xlu1 %v3349_v27, %s4522_s25  ;;  %v770_v54 = vcombine.high %v3289_v38, %v3289_v38  ;;  %v832_v60 = vcombine.high %v3302_v63, %v3302_v63  ;;  %v1001_v63 = vcombine.high %v3349_v27, %v3349_v27 }
 0x117   : > { %v1081_v2 = vrot.slane %v1068_v58, %v3140_v21  ;;  %v1074_v40 = vcombine.high %v1068_v58, %v1068_v58  ;;  %v1181_v58 = vcombine.high %v3310_v8, %v3310_v8  ;;  %v876_v8 = vcombine.high %v3317_v16, %v3317_v16 }
 0x118   : > { %v1110_v59 = vsel %vm1109_vm10, %v1108_v49, %v1107_v50  ;;  %v905_v50 = vcombine.high %v3313_v26, %v3313_v26  ;;  %v1000_v26 = vrot.slane %v986_v13, %v3140_v21  ;;  %v1045_v16 = vcombine.high %v3359_v61, %v3359_v61 }
 0x119   : > { %775 = vrot.lane.b32.xlu0 %v769_v56, %s4543_s22  ;;  %v3363_v48 = vpop.permute.xlu1 %1151  ;;  %v1112_v17 = vmul.f32 %v1110_v59, %v1105_v12  ;;  %v1211_v59 = vld [vmem:[#allocation2 + $0x2] sm:$0x3f]  ;;  %v4498_v13 = vmov 16   ;;  %v1196_v27 = vcombine.high %v3324_v53, %v3324_v53 }
 0x11a   : > { %1046 = vrot.lane.b32.xlu1 %v3359_v61, %s4511_s14  ;;  %v919_v56 = vrot.slane %v905_v50, %v3140_v21  ;;  %v1088_v50 = vrot.slane %v1074_v40, %v3140_v21  ;;  %v1195_v40 = vrot.slane %v1181_v58, %v3140_v21 }
 0x11b   : > { %v1125_v49 = vrot.slane %v1112_v17, %v3140_v21 }
 0x11d   : > { %837 = vrot.lane.b32.xlu0 %v831_v51, %s4536_s24 }
 0x11e   : > { %v3372_v15 = vpop.permute.xlu1 %1177  ;;  %1090 = vrot.lane.b32.xlu1 %v1081_v2, %s4508_s28 }
 0x121   : > { %881 = vrot.lane.b32.xlu0 %v875_v62, %s4491_s12  ;;  %s4632_s12 = smov 126   ;;  %v1044_v62 = vrot.slane %v1030_v43, %v3140_v21 }
 0x122   : > { %v1213_v9 = vpop.permute.xlu1 %1212  ;;  %1134 = vrot.lane.b32.xlu1 %v1125_v49, %s4501_s15 }
 0x123   : > { %v1214_v55 = vrot.slane %v1213_v9, 6 }
 0x125   : > { %v1215_v12 = vsel %vm1096_vm11, %v1214_v55, %v1213_v9  ;;  %925 = vrot.lane.b32.xlu0 %v919_v56, %s4530_s16  ;;  %v1118_v9 = vcombine.high %v1112_v17, %v1112_v17  ;;  %v920_v56 = vcombine.high %v3330_v31, %v3330_v31  ;;  %v1133_v31 = vcombine.high %v1125_v49, %v1125_v49 }
 0x126   : > { %v1217_v51 = vmul.f32 %v1215_v12, %v1211_v59  ;;  %v1089_v59 = vcombine.high %v1081_v2, %v1081_v2 }
 0x127   : > { %v1132_v55 = vrot.slane %v1118_v9, %v3140_v21 }
 0x128   : > { %v1230_v46 = vrot.slane %v1217_v51, %v3140_v21  ;;  %v1223_v17 = vcombine.high %v1217_v51, %v1217_v51 }
 0x129   : > { %1006 = vrot.lane.b32.xlu0 %v1000_v26, %s4522_s25 }
 0x12a   : > { %1239 = vrot.lane.b32.xlu1 %v1230_v46, %s4632_s12  ;;  %v1237_v38 = vrot.slane %v1223_v17, %v3140_v21  ;;  %v1238_v12 = vcombine.high %v1230_v46, %v1230_v46 }
 0x12d   : > { %1050 = vrot.lane.b32.xlu0 %v1044_v62, %s4511_s14 }
 0x12e   : > { %612 = vrot.lane.b32.xlu1 %v609_v3, %s4494_s19  ;;  %s4633_s19 = smov 127  }
 0x131   : > { %1094 = vrot.lane.b32.xlu0 %v1088_v50, %s4508_s28 }
 0x132   : > { %674 = vrot.lane.b32.xlu1 %v671_v57, %s4496_s27  ;;  %s4634_s27 = smov 18  }
 0x135   : > { %1138 = vrot.lane.b32.xlu0 %v1132_v55, %s4501_s15 }
 0x136   : > { %773 = vrot.lane.b32.xlu1 %v770_v54, %s4543_s22 }
 0x139   : > { %1201 = vrot.lane.b32.xlu0 %v1195_v40, %s4633_s19 }
 0x13a   : > { %835 = vrot.lane.b32.xlu1 %v832_v60, %s4536_s24 }
 0x13d   : > { %1261 = vperm.xlu0 %2727, %v3135_v19  }
 0x13e   : > { %879 = vrot.lane.b32.xlu1 %v876_v8, %s4634_s27 }
 0x141   : > { %1243 = vrot.lane.b32.xlu0 %v1237_v38, %s4632_s12 }
 0x142   : > { %923 = vrot.lane.b32.xlu1 %v920_v56, %s4530_s16  ;;  %2728 = vset.pattern.permute.xlu0 %v4498_v13 }
 0x145   : > { %1303 = vperm.xlu0 %2728, %v3135_v19  }
 0x146   : > { %1004 = vrot.lane.b32.xlu1 %v1001_v63, %s4522_s25 }
 0x149   : > { %2730 = vset.pattern.permute.xlu0 %v4514_v10 }
 0x14a   : > { %1048 = vrot.lane.b32.xlu1 %v1045_v16, %s4511_s14 }
 0x14e   : > { %1092 = vrot.lane.b32.xlu1 %v1089_v59, %s4508_s28  ;;  %s4516_s28 = smov 112  }
 0x152   : > { %1136 = vrot.lane.b32.xlu1 %v1133_v31, %s4501_s15  ;;  %s4635_s15 = smov 114  }
 0x156   : > { %1199 = vrot.lane.b32.xlu1 %v1196_v27, %s4633_s19  ;;  %v1253_v27 = vld [vmem:[#allocation2 + $0x2] sm:$0x3f] }
 0x15a   : > { %1241 = vrot.lane.b32.xlu1 %v1238_v12, %s4632_s12 }
 0x15e   : > { %1254 = vrot.lane.b32.xlu1 %v3150_v25, %s4511_s14  ;;  %s4638_s14 = smov 113  }
 0x16c   : > { %v3435_v61 = vpop.permute.xlu1 %672 }
 0x170   : > { %v3437_v2 = vpop.permute.xlu1 %711 }
 0x174   : > { %v3439_v51 = vpop.permute.xlu1 %771 }
 0x178   : > { %v3441_v49 = vpop.permute.xlu1 %833 }
 0x17c   : > { %v3443_v26 = vpop.permute.xlu1 %877 }
 0x180   : > { %v3445_v43 = vpop.permute.xlu1 %921 }
 0x184   : > { %v3447_v53 = vpop.permute.xlu1 %960 }
 0x188   : > { %v3449_v46 = vpop.permute.xlu1 %1002 }
 0x18c   : > { %v3451_v62 = vpop.permute.xlu1 %1046 }
 0x190   : > { %v3453_v3 = vpop.permute.xlu1 %1090 }
 0x194   : > { %v3455_v50 = vpop.permute.xlu1 %1134 }
 0x19c   : > { %v3457_v9 = vpop.permute.xlu1 %1239 }
 0x1a0   : > { %v3459_v57 = vpop.permute.xlu1 %612 }
 0x1a4   : > { %v3461_v55 = vpop.permute.xlu1 %674 }
 0x1a8   : > { %v3463_v58 = vpop.permute.xlu1 %773 }
 0x1ac   : > { %v3465_v54 = vpop.permute.xlu1 %835 }
 0x1b0   : > { %v3467_v40 = vpop.permute.xlu1 %879 }
 0x1b4   : > { %v3469_v60 = vpop.permute.xlu1 %923 }
 0x1b8   : > { %v3471_v17 = vpop.permute.xlu1 %1004 }
 0x1bc   : > { %v3473_v8 = vpop.permute.xlu1 %1048 }
 0x1c0   : > { %v3475_v38 = vpop.permute.xlu1 %1092 }
 0x1c4   : > { %v3477_v56 = vpop.permute.xlu1 %1136 }
 0x1c8   : > { %v3479_v63 = vpop.permute.xlu1 %1199 }
 0x1cc   : > { %v3481_v16 = vpop.permute.xlu1 %1241 }
 0x1d0   : > { %v1255_v59 = vpop.permute.xlu1 %1254 }
 0x1d1   : > { %v1256_v31 = vrot.slane %v1255_v59, 6 }
 0x1d3   : > { %v1257_v12 = vsel %vm1052_vm12, %v1256_v31, %v1255_v59  ;;  %v4510_v59 = vmov 17  }
 0x1d4   : > { %v1259_v13 = vmul.f32 %v1257_v12, %v1253_v27  ;;  %2729 = vset.pattern.permute.xlu1 %v4510_v59 }
 0x1d6   : > { %v1272_v32 = vrot.slane %v1259_v13, %v3140_v21  ;;  %v1265_v28 = vcombine.high %v1259_v13, %v1259_v13 }
 0x1d8   : > { %1281 = vrot.lane.b32.xlu1 %v1272_v32, %s4635_s15  ;;  %v1279_v45 = vrot.slane %v1265_v28, %v3140_v21  ;;  %v1280_v18 = vcombine.high %v1272_v32, %v1272_v32  ;;  %v1357_v28 = vrot.slane %v1343_v24, %v3140_v21 }
 0x1da   : > { %1285 = vrot.lane.b32.xlu0 %v1279_v45, %s4635_s15 }
 0x1dc   : > { %1283 = vrot.lane.b32.xlu1 %v1280_v18, %s4635_s15 }
 0x1de   : > { %1359 = vrot.lane.b32.xlu0 %v1350_v5, %s4516_s28 }
 0x1e0   : > { %1296 = vrot.lane.b32.xlu1 %v3168_v33, %s4522_s25  ;;  %s4646_s25 = smov 110  }
 0x1e2   : > { %1363 = vrot.lane.b32.xlu0 %v1357_v28, %s4516_s28 }
 0x24a   : > { %v3496_v45 = vpop.permute.xlu1 %1281 }
 0x24b   : > { %4636 = vst [vmem:[#allocation24_spill] sm:$0xff] %v3496_v45 }
 0x24e   : > { %v3498_v32 = vpop.permute.xlu1 %1283 }
 0x24f   : > { %4637 = vst [vmem:[#allocation25_spill] sm:$0xff] %v3498_v32  ;;  %v1672_v32 = vld [vmem:[%s4665_s6] sm:$0xf]  ;;  %s4776_s6 = smov 1  }
 0x252   : > { %v1297_v18 = vpop.permute.xlu1 %1296 }
 0x253   : > { %v1298_v13 = vrot.slane %v1297_v18, 6 }
 0x255   : > { %v1299_v31 = vsel %vm1008_vm13, %v1298_v13, %v1297_v18  ;;  %v1358_v18 = vcombine.high %v1350_v5, %v1350_v5  ;;  %v1374_v5 = vld [vmem:[#allocation2 + $0x2] sm:$0x3f] }
 0x256   : > { %v1301_v27 = vmul.f32 %v1299_v31, %v1295_v23  ;;  %v4521_v31 = vmov 19  }
 0x258   : > { %v1314_v12 = vrot.slane %v1301_v27, %v3140_v21  ;;  %v1307_v59 = vcombine.high %v1301_v27, %v1301_v27 }
 0x25a   : > { %1323 = vrot.lane.b32.xlu1 %v1314_v12, %s4638_s14  ;;  %v1321_v24 = vrot.slane %v1307_v59, %v3140_v21  ;;  %v1322_v28 = vcombine.high %v1314_v12, %v1314_v12 }
 0x25c   : > { %1327 = vrot.lane.b32.xlu0 %v1321_v24, %s4638_s14 }
 0x25e   : > { %1325 = vrot.lane.b32.xlu1 %v1322_v28, %s4638_s14 }
 0x260   : > { %1382 = vperm.xlu0 %2730, %v3135_v19  }
 0x262   : > { %1339 = vperm.xlu1 %2729, %v3135_v19  }
 0x264   : > { %2731 = vset.pattern.permute.xlu0 %v4521_v31 }
 0x266   : > { %1361 = vrot.lane.b32.xlu1 %v1358_v18, %s4516_s28  ;;  %s4643_s28 = smov 111  }
 0x26a   : > { %1375 = vrot.lane.b32.xlu1 %v3188_v41, %s4530_s16  ;;  %s4649_s16 = smov 98  }
 0x2cc   : > { %v3512_v13 = vpop.permute.xlu1 %1323 }
 0x2cd   : > { %4639 = vst [vmem:[#allocation26_spill] sm:$0xff] %v3512_v13 }
 0x2d0   : > { %v3514_v59 = vpop.permute.xlu1 %1325 }
 0x2d1   : > { %4640 = vst [vmem:[#allocation27_spill] sm:$0xff] %v3514_v59 }
 0x2e1   : > { %v3516_v23 = vpop.permute.xlu1 %1339 }
 0x2e2   : > { %4641 = vst [vmem:[#allocation28_spill] sm:$0xff] %v3516_v23 }
 0x2e5   : > { %v3519_v27 = vpop.permute.xlu1 %1361 }
 0x2e6   : > { %4642 = vst [vmem:[#allocation29_spill] sm:$0xff] %v3519_v27 }
 0x2e9   : > { %v1376_v12 = vpop.permute.xlu1 %1375 }
 0x2ea   : > { %v1377_v24 = vrot.slane %v1376_v12, 6 }
 0x2ec   : > { %v1378_v28 = vsel %vm927_vm14, %v1377_v24, %v1376_v12  ;;  %v4528_v12 = vmov 20  }
 0x2ed   : > { %v1380_v18 = vmul.f32 %v1378_v28, %v1374_v5 }
 0x2ef   : > { %v1393_v10 = vrot.slane %v1380_v18, %v3140_v21  ;;  %v1386_v0 = vcombine.high %v1380_v18, %v1380_v18 }
 0x2f1   : > { %1402 = vrot.lane.b32.xlu1 %v1393_v10, %s4643_s28  ;;  %v1400_v4 = vrot.slane %v1386_v0, %v3140_v21  ;;  %v1401_v1 = vcombine.high %v1393_v10, %v1393_v10  ;;  %v1416_v0 = vld [vmem:[#allocation2 + $0x2] sm:$0x3f] }
 0x2f3   : > { %1406 = vrot.lane.b32.xlu0 %v1400_v4, %s4643_s28 }
 0x2f5   : > { %1404 = vrot.lane.b32.xlu1 %v1401_v1, %s4643_s28 }
 0x2f7   : > { %1424 = vperm.xlu0 %2731, %v3135_v19  }
 0x2f9   : > { %1417 = vrot.lane.b32.xlu1 %v3199_v44, %s4634_s27 }
 0x2fb   : > { %2732 = vset.pattern.permute.xlu0 %v4528_v12 }
 0x363   : > { %v3530_v31 = vpop.permute.xlu1 %1402 }
 0x364   : > { %4644 = vst [vmem:[#allocation30_spill] sm:$0xff] %v3530_v31 }
 0x367   : > { %v3533_v24 = vpop.permute.xlu1 %1404 }
 0x368   : > { %4645 = vst [vmem:[#allocation31_spill] sm:$0xff] %v3533_v24  ;;  %v1621_v24 = vld [vmem:[#allocation2 + $0x2] sm:$0x3f] }
 0x36b   : > { %v1418_v5 = vpop.permute.xlu1 %1417 }
 0x36c   : > { %v1419_v28 = vrot.slane %v1418_v5, 6 }
 0x36e   : > { %v1420_v4 = vsel %vm4598_vm15, %v1419_v28, %v1418_v5  ;;  %v4534_v5 = vmov 21  }
 0x36f   : > { %v1422_v10 = vmul.f32 %v1420_v4, %v1416_v0 }
 0x371   : > { %v1435_v1 = vrot.slane %v1422_v10, %v3140_v21  ;;  %v1428_v18 = vcombine.high %v1422_v10, %v1422_v10  ;;  %v1458_v10 = vld [vmem:[#allocation2 + $0x2] sm:$0x3f] }
 0x373   : > { %1444 = vrot.lane.b32.xlu1 %v1435_v1, %s4646_s25  ;;  %v1442_v11 = vrot.slane %v1428_v18, %v3140_v21  ;;  %v1443_v22 = vcombine.high %v1435_v1, %v1435_v1 }
 0x375   : > { %1448 = vrot.lane.b32.xlu0 %v1442_v11, %s4646_s25 }
 0x377   : > { %1446 = vrot.lane.b32.xlu1 %v1443_v22, %s4646_s25 }
 0x379   : > { %1466 = vperm.xlu0 %2732, %v3135_v19  }
 0x37b   : > { %1459 = vrot.lane.b32.xlu1 %v3150_v25, %s4536_s24  ;;  %s4652_s24 = smov 97  }
 0x37d   : > { %2733 = vset.pattern.permute.xlu0 %v4534_v5  ;;  %v4540_v5 = vmov 22  }
 0x37e   : > { %2734 = vset.pattern.permute.xlu1 %v4540_v5 }
 0x3e5   : > { %v3544_v12 = vpop.permute.xlu1 %1444 }
 0x3e6   : > { %4647 = vst [vmem:[#allocation32_spill] sm:$0xff] %v3544_v12 }
 0x3e9   : > { %v3547_v28 = vpop.permute.xlu1 %1446 }
 0x3ea   : > { %4648 = vst [vmem:[#allocation33_spill] sm:$0xff] %v3547_v28 }
 0x3ed   : > { %v1460_v0 = vpop.permute.xlu1 %1459 }
 0x3ee   : > { %v1461_v4 = vrot.slane %v1460_v0, 6 }
 0x3f0   : > { %v1462_v11 = vsel %vm4597_vm2, %v1461_v4, %v1460_v0 }
 0x3f1   : > { %v1464_v1 = vmul.f32 %v1462_v11, %v1458_v10 }
 0x3f3   : > { %v1477_v22 = vrot.slane %v1464_v1, %v3140_v21  ;;  %v1470_v18 = vcombine.high %v1464_v1, %v1464_v1  ;;  %v1500_v1 = vld [vmem:[#allocation2 + $0x2] sm:$0x3f] }
 0x3f5   : > { %1486 = vrot.lane.b32.xlu1 %v1477_v22, %s4649_s16  ;;  %v1484_v25 = vrot.slane %v1470_v18, %v3140_v21  ;;  %v1485_v29 = vcombine.high %v1477_v22, %v1477_v22 }
 0x3f7   : > { %1490 = vrot.lane.b32.xlu0 %v1484_v25, %s4649_s16 }
 0x3f9   : > { %1488 = vrot.lane.b32.xlu1 %v1485_v29, %s4649_s16 }
 0x3fb   : > { %1508 = vperm.xlu0 %2733, %v3135_v19  }
 0x3fd   : > { %1501 = vrot.lane.b32.xlu1 %v3168_v33, %s4543_s22  ;;  %s4546_s22 = smov 96  }
 0x467   : > { %v3559_v0 = vpop.permute.xlu1 %1486 }
 0x468   : > { %4650 = vst [vmem:[#allocation34_spill] sm:$0xff] %v3559_v0  ;;  %v1548_v0 = vcombine.high %v1542_v47, %v1542_v47 }
 0x46b   : > { %v3561_v4 = vpop.permute.xlu1 %1488 }
 0x46c   : > { %4651 = vst [vmem:[#allocation35_spill] sm:$0xff] %v3561_v4 }
 0x46f   : > { %v1502_v10 = vpop.permute.xlu1 %1501 }
 0x470   : > { %v1503_v11 = vrot.slane %v1502_v10, 6 }
 0x472   : > { %v1504_v22 = vsel %vm4596_vm0, %v1503_v11, %v1502_v10  ;;  %v1562_v10 = vrot.slane %v1548_v0, %v3140_v21  ;;  %v4548_v11 = vmov 23  }
 0x473   : > { %v1506_v18 = vmul.f32 %v1504_v22, %v1500_v1  ;;  %2735 = vset.pattern.permute.xlu0 %v4548_v11  ;;  %v1563_v1 = vcombine.high %v1555_v7, %v1555_v7  ;;  %v4653_v22 = vmov 0  }
 0x475   : > { %v1519_v29 = vrot.slane %v1506_v18, %v3140_v21  ;;  %v1512_v25 = vcombine.high %v1506_v18, %v1506_v18  ;;  %v4550_v18 = vmov 24  }
 0x477   : > { %1528 = vrot.lane.b32.xlu1 %v1519_v29, %s4652_s24  ;;  %v1526_v33 = vrot.slane %v1512_v25, %v3140_v21  ;;  %v1527_v5 = vcombine.high %v1519_v29, %v1519_v29 }
 0x479   : > { %1532 = vrot.lane.b32.xlu0 %v1526_v33, %s4652_s24  ;;  %v1579_v33 = vld [vmem:[#allocation2 + $0x2] sm:$0x3f] }
 0x47b   : > { %1530 = vrot.lane.b32.xlu1 %v1527_v5, %s4652_s24 }
 0x47d   : > { %1564 = vrot.lane.b32.xlu0 %v1555_v7, %s4546_s22 }
 0x47f   : > { %1544 = vperm.xlu1 %2734, %v3135_v19  }
 0x481   : > { %1568 = vrot.lane.b32.xlu0 %v1562_v10, %s4546_s22 }
 0x483   : > { %1566 = vrot.lane.b32.xlu1 %v1563_v1, %s4546_s22  ;;  %s4659_s22 = smov 95  }
 0x484   : > { %2737 = vset.pattern.permute.xlu1 %v4653_v22 }
 0x485   : > { %1587 = vperm.xlu0 %2735, %v3135_v19  }
 0x487   : > { %1580 = vrot.lane.b32.xlu1 %v3188_v41, %s4654_s0 }
 0x489   : > { %2736 = vset.pattern.permute.xlu0 %v4550_v18  ;;  %v3598_v18 = vld [vmem:[%s4624_s4] sm:$0x3]  ;;  %s4754_s4 = smov 32  }
 0x4e9   : > { %v3580_v47 = vpop.permute.xlu1 %1528 }
 0x4ea   : > { %4655 = vst [vmem:[#allocation36_spill] sm:$0xff] %v3580_v47 }
 0x4ed   : > { %v3582_v5 = vpop.permute.xlu1 %1530 }
 0x4ee   : > { %4656 = vst [vmem:[#allocation37_spill] sm:$0xff] %v3582_v5 }
 0x4fe   : > { %v3584_v0 = vpop.permute.xlu1 %1544 }
 0x4ff   : > { %4657 = vst [vmem:[#allocation38_spill] sm:$0xff] %v3584_v0 }
 0x502   : > { %v3587_v7 = vpop.permute.xlu1 %1566 }
 0x503   : > { %4658 = vst [vmem:[#allocation39_spill] sm:$0xff] %v3587_v7 }
 0x506   : > { %v1581_v29 = vpop.permute.xlu1 %1580 }
 0x507   : > { %v1582_v25 = vrot.slane %v1581_v29, 6 }
 0x509   : > { %v1583_v19 = vsel %vm4595_vm1, %v1582_v25, %v1581_v29  ;;  %v3604_v29 = vpop.permute.xlu0 %1219 }
 0x50a   : > { %v1585_v10 = vmul.f32 %v1583_v19, %v1579_v33  ;;  %4661 = vst [vmem:[#allocation40_spill] sm:$0xff] %v3604_v29 }
 0x50c   : > { %v1598_v41 = vrot.slane %v1585_v10, %v3140_v21  ;;  %v1591_v1 = vcombine.high %v1585_v10, %v1585_v10 }
 0x50d   : > { %v3606_v25 = vpop.permute.xlu0 %709 }
 0x50e   : > { %1607 = vrot.lane.b32.xlu1 %v1598_v41, %s4659_s22  ;;  %v1605_v11 = vrot.slane %v1591_v1, %v3140_v21  ;;  %v1606_v0 = vcombine.high %v1598_v41, %v1598_v41 }
 0x510   : > { %1611 = vrot.lane.b32.xlu0 %v1605_v11, %s4659_s22 }
 0x511   : > { %v3608_v11 = vpop.permute.xlu0 %958 }
 0x512   : > { %1609 = vrot.lane.b32.xlu1 %v1606_v0, %s4659_s22 }
 0x514   : > { %1629 = vperm.xlu0 %2736, %v3598_v18  }
 0x515   : > { %v3610_v33 = vpop.permute.xlu0 %610 }
 0x516   : > { %1622 = vrot.lane.b32.xlu1 %v3199_v44, %s4660_s3 }
 0x518   : > { %2738 = vset.pattern.permute.xlu0 %v4653_v22 }
 0x519   : > { %v3612_v0 = vpop.permute.xlu0 %713 }
 0x51d   : > { %v3614_v19 = vpop.permute.xlu0 %962 }
 0x521   : > { %v3616_v10 = vpop.permute.xlu0 %1197 }
 0x525   : > { %v3618_v41 = vpop.permute.xlu0 %614 }
 0x529   : > { %v3620_v1 = vpop.permute.xlu0 %676 }
 0x52d   : > { %v3622_v44 = vpop.permute.xlu0 %775 }
 0x531   : > { %v3624_v7 = vpop.permute.xlu0 %837 }
 0x535   : > { %v3628_v5 = vpop.permute.xlu0 %881 }
 0x539   : > { %v3632_v12 = vpop.permute.xlu0 %925 }
 0x53d   : > { %v3635_v13 = vpop.permute.xlu0 %1006 }
 0x541   : > { %v3641_v45 = vpop.permute.xlu0 %1050 }
 0x580   : > { %v3626_v47 = vpop.permute.xlu1 %1607 }
 0x581   : > { %4662 = vst [vmem:[#allocation41_spill] sm:$0xff] %v3626_v47 }
 0x584   : > { %v3630_v4 = vpop.permute.xlu1 %1609 }
 0x585   : > { %4663 = vst [vmem:[#allocation42_spill] sm:$0xff] %v3630_v4 }
 0x588   : > { %v1623_v28 = vpop.permute.xlu1 %1622 }
 0x589   : > { %v1624_v31 = vrot.slane %v1623_v28, 6 }
 0x58b   : > { %v1625_v23 = vsel %vm4593_vm3, %v1624_v31, %v1623_v28  ;;  %v3650_v31 = vpop.permute.xlu0 %1094  ;;  %v1740_v28 = vld [vmem:[%s4457_s8] sm:$0xf] }
 0x58c   : > { %v1627_v27 = vmul.f32 %v1625_v23, %v1621_v24  ;;  %v548_v23 = vld [vmem:[%s4666_s5] sm:$0x3]  ;;  %s4774_s5 = smov 2  }
 0x58d   : > { %v3663_v24 = vld [vmem:[%s4458_s9] sm:$0xf] }
 0x58e   : > { %v1640_v59 = vrot.slane %v1627_v27, %v3140_v21  ;;  %v1633_v29 = vcombine.high %v1627_v27, %v1627_v27  ;;  %4668 = vst [vmem:[#allocation43_spill] sm:$0xff] %v3663_v24 }
 0x58f   : > { %v3657_v27 = vpop.permute.xlu0 %1138 }
 0x590   : > { %1649 = vrot.lane.b32.xlu1 %v1640_v59, %s4664_s1  ;;  %v1647_v47 = vrot.slane %v1633_v29, %v3140_v21  ;;  %v1648_v4 = vcombine.high %v1640_v59, %v1640_v59  ;;  %v1673_v21 = vld [vmem:[%s4456_s7] sm:$0xf]  ;;  %v4667_v59 = vmov 1  }
 0x592   : > { %1653 = vrot.lane.b32.xlu0 %v1647_v47, %s4664_s1  ;;  %v4669_v47 = vmov 3  }
 0x594   : > { %1651 = vrot.lane.b32.xlu1 %v1648_v4, %s4664_s1  ;;  %v3669_v4 = vpop.permute.xlu0 %1201 }
 0x596   : > { %1676 = vperm.xlu0 %2738, %v1672_v32  }
 0x598   : > { %1665 = vperm.xlu1 %2737, %v548_v23   ;;  %v3674_v29 = vpop.permute.xlu0 %1261 }
 0x599   : > { %4670 = vst [vmem:[#allocation44_spill] sm:$0xff] %v3674_v29 }
 0x59a   : > { %2739 = vset.pattern.permute.xlu0 %v4667_v59 }
 0x59b   : > { %652 = vperm.xlu0 %2739, %v3598_v18  }
 0x59c   : > { %1693 = vperm.xlu1 %2737, %v1673_v21   ;;  %v3682_v23 = vpop.permute.xlu0 %1243 }
 0x59f   : > { %1725 = vperm.xlu0 %2739, %v1673_v21   ;;  %v4672_v21 = vmov 4  }
 0x5a0   : > { %2740 = vset.pattern.permute.xlu1 %v4667_v59  ;;  %v3687_v59 = vpop.permute.xlu0 %1303 }
 0x5a1   : > { %1709 = vperm.xlu1 %2740, %v1672_v32   ;;  %v4671_v32 = vmov 2   ;;  %4673 = vst [vmem:[#allocation45_spill] sm:$0xff] %v3687_v59 }
 0x5a3   : > { %1800 = vperm.xlu0 %2739, %v3663_v24  }
 0x5a5   : > { %2741 = vset.pattern.permute.xlu1 %v4653_v22  ;;  %v4677_v22 = vmov 6  }
 0x5a6   : > { %1743 = vperm.xlu1 %2741, %v1740_v28   ;;  %v4674_v28 = vmov 7  }
 0x5a7   : > { %2742 = vset.pattern.permute.xlu0 %v4669_v47  ;;  %v3693_v47 = vpop.permute.xlu0 %1285 }
 0x5a8   : > { %751 = vperm.xlu0 %2742, %v3598_v18  }
 0x5aa   : > { %1759 = vrot.lane.b32.xlu1 %v3137_v20, %s4664_s1 }
 0x5ab   : > { %2743 = vset.pattern.permute.xlu1 %v4671_v32  ;;  %v4675_v32 = vmov 5  }
 0x5ac   : > { %1854 = vperm.xlu0 %2742, %v3663_v24  }
 0x5ae   : > { %1791 = vrot.lane.b32.xlu1 %v3158_v30, %s4659_s22 }
 0x5b0   : > { %2744 = vset.pattern.permute.xlu0 %v4672_v21  ;;  %v3702_v21 = vpop.permute.xlu0 %1359 }
 0x5b1   : > { %813 = vperm.xlu0 %2744, %v3598_v18   ;;  %4676 = vst [vmem:[#allocation46_spill] sm:$0xff] %v3702_v21 }
 0x5b2   : > { %1823 = vperm.xlu1 %2743, %v3663_v24  }
 0x5b5   : > { %1885 = vperm.xlu0 %2744, %v3663_v24  }
 0x5b6   : > { %1845 = vrot.lane.b32.xlu1 %v3178_v37, %s4652_s24 }
 0x5b7   : > { %2747 = vset.pattern.permute.xlu1 %v4674_v28  ;;  %v3706_v28 = vpop.permute.xlu0 %1363 }
 0x5b8   : > { %4678 = vst [vmem:[#allocation47_spill] sm:$0xff] %v3706_v28 }
 0x5b9   : > { %2745 = vset.pattern.permute.xlu0 %v4675_v32 }
 0x5ba   : > { %857 = vperm.xlu0 %2745, %v3598_v18   ;;  %1876 = vrot.lane.b32.xlu1 %v3190_v42, %s4649_s16 }
 0x5bb   : > { %v3708_v37 = vpop.permute.xlu0 %1327 }
 0x5bc   : > { %4679 = vst [vmem:[#allocation48_spill] sm:$0xff] %v3708_v37 }
 0x5be   : > { %1916 = vperm.xlu0 %2745, %v3663_v24   ;;  %1907 = vrot.lane.b32.xlu1 %v3137_v20, %s4646_s25 }
 0x5bf   : > { %v3710_v32 = vpop.permute.xlu0 %1382 }
 0x5c0   : > { %4680 = vst [vmem:[#allocation49_spill] sm:$0xff] %v3710_v32 }
 0x5c2   : > { %2746 = vset.pattern.permute.xlu0 %v4677_v22 }
 0x5c3   : > { %901 = vperm.xlu0 %2746, %v3598_v18   ;;  %v3712_v30 = vpop.permute.xlu0 %1406 }
 0x5c4   : > { %4681 = vst [vmem:[#allocation50_spill] sm:$0xff] %v3712_v30 }
 0x5c7   : > { %v3714_v42 = vpop.permute.xlu0 %1424 }
 0x5c8   : > { %4682 = vst [vmem:[#allocation51_spill] sm:$0xff] %v3714_v42 }
 0x5cb   : > { %v3716_v24 = vpop.permute.xlu0 %1448 }
 0x5cc   : > { %4683 = vst [vmem:[#allocation52_spill] sm:$0xff] %v3716_v24 }
 0x5cf   : > { %v3718_v59 = vpop.permute.xlu0 %1466 }
 0x5d0   : > { %4684 = vst [vmem:[#allocation53_spill] sm:$0xff] %v3718_v59 }
 0x5d3   : > { %v3720_v20 = vpop.permute.xlu0 %1490 }
 0x5d4   : > { %4685 = vst [vmem:[#allocation54_spill] sm:$0xff] %v3720_v20 }
 0x5d7   : > { %v3722_v21 = vpop.permute.xlu0 %1508 }
 0x5d8   : > { %4686 = vst [vmem:[#allocation55_spill] sm:$0xff] %v3722_v21 }
 0x5db   : > { %v3724_v22 = vpop.permute.xlu0 %1532 }
 0x5dc   : > { %4687 = vst [vmem:[#allocation56_spill] sm:$0xff] %v3724_v22 }
 0x5df   : > { %v3726_v18 = vpop.permute.xlu0 %1564 }
 0x5e0   : > { %4688 = vst [vmem:[#allocation57_spill] sm:$0xff] %v3726_v18 }
 0x5e3   : > { %v3728_v28 = vpop.permute.xlu0 %1568 }
 0x5e4   : > { %4689 = vst [vmem:[#allocation58_spill] sm:$0xff] %v3728_v28 }
 0x5e7   : > { %v3730_v37 = vpop.permute.xlu0 %1587 }
 0x5e8   : > { %4690 = vst [vmem:[#allocation59_spill] sm:$0xff] %v3730_v37  ;;  %v617_v37 = vsel %vm4593_vm3, %v3610_v33, %v3459_v57 }
 0x5eb   : > { %v3732_v32 = vpop.permute.xlu0 %1611 }
 0x5ec   : > { %4691 = vst [vmem:[#allocation60_spill] sm:$0xff] %v3732_v32  ;;  %v621_v32 = vmul.f32 %v617_v37, %v3241_v52  ;;  %v779_v37 = vsel %vm4596_vm0, %v3463_v58, %v3622_v44 }
 0x5ef   : > { %v3734_v30 = vpop.permute.xlu0 %1629 }
 0x5f0   : > { %4692 = vst [vmem:[#allocation61_spill] sm:$0xff] %v3734_v30  ;;  %v618_v30 = vsel %vm4593_vm3, %v3459_v57, %v3618_v41  ;;  %v716_v57 = vsel %vm4592_vm4, %v3606_v25, %v3437_v2  ;;  %vm4594_vm3 = vcmask 916480  }
 0x5f1   : > { %v622_v33 = vmul.f32 %v618_v30, %v3241_v52  ;;  %v720_v30 = vmul.f32 %v716_v57, %v3253_v39 }
 0x604   : > { %v3736_v42 = vpop.permute.xlu0 %1653 }
 0x605   : > { %4693 = vst [vmem:[#allocation62_spill] sm:$0xff] %v3736_v42 }
 0x615   : > { %v3738_v24 = vpop.permute.xlu0 %1676 }
 0x616   : > { %4694 = vst [vmem:[#allocation63_spill] sm:$0xff] %v3738_v24  ;;  %v679_v24 = vsel %vm4595_vm1, %v3435_v61, %v3461_v55  ;;  %v717_v61 = vsel %vm4592_vm4, %v3437_v2, %v3612_v0  ;;  %v840_v2 = vsel %vm4597_vm2, %v3441_v49, %v3465_v54  ;;  %vm964_vm4 = vcmask 130048  }
 0x617   : > { %v721_v52 = vmul.f32 %v717_v61, %v3253_v39  ;;  %v884_v39 = vsel %vm4598_vm15, %v3443_v26, %v3467_v40  ;;  %v928_v26 = vsel %vm927_vm14, %v3445_v43, %v3469_v60 }
 0x61a   : > { %v653_v59 = vpop.permute.xlu0 %652 }
 0x61e   : > { %v3740_v20 = vpop.permute.xlu0 %1725 }
 0x61f   : > { %4695 = vst [vmem:[#allocation64_spill] sm:$0xff] %v3740_v20 }
 0x622   : > { %v3742_v21 = vpop.permute.xlu0 %1800 }
 0x623   : > { %4696 = vst [vmem:[#allocation65_spill] sm:$0xff] %v3742_v21  ;;  %v680_v21 = vsel %vm4595_vm1, %v3461_v55, %v3620_v1  ;;  %v778_v1 = vsel %vm4596_vm0, %v3439_v51, %v3463_v58  ;;  %v885_v58 = vsel %vm4598_vm15, %v3467_v40, %v3628_v5  ;;  %v929_v40 = vsel %vm927_vm14, %v3469_v60, %v3632_v12 }
 0x624   : > { %v684_v42 = vmul.f32 %v680_v21, %v653_v59  ;;  %v1053_v60 = vsel %vm1052_vm12, %v3451_v62, %v3473_v8  ;;  %v1098_v62 = vsel %vm1096_vm11, %v3475_v38, %v3650_v31  ;;  %vm4722_vm0 = vcmask 801792  }
 0x626   : > { %v686_v28 = vadd.f32 %v684_v42, %v622_v33  ;;  %v841_v42 = vsel %vm4597_vm2, %v3465_v54, %v3624_v7  ;;  %v965_v54 = vsel %vm964_vm4, %v3608_v11, %v3447_v53  ;;  %vm4727_vm2 = vcmask 793600  }
 0x627   : > { %v752_v22 = vpop.permute.xlu0 %751  ;;  %v969_v11 = vmul.f32 %v965_v54, %v3306_v6  ;;  %vm4729_vm15 = vmmov %vm4727_vm2 }
 0x628   : > { %v782_v25 = vmul.f32 %v778_v1, %v752_v22  ;;  %v723_v51 = vadd.f32 %v721_v52, %v686_v28  ;;  %v1054_v1 = vsel %vm1052_vm12, %v3473_v8, %v3641_v45  ;;  %v1141_v8 = vsel %vm1140_vm5, %v3455_v50, %v3477_v56 }
 0x629   : > { %v1145_v31 = vmul.f32 %v1141_v8, %v3258_v36  ;;  %v1203_v50 = vsel %vm1109_vm10, %v3616_v10, %v3479_v63  ;;  %v1246_v10 = vsel %vm1065_vm9, %v3481_v16, %v3682_v23  ;;  %v4701_v23 = vld [vmem:[#allocation44_spill] sm:$0xff] }
 0x62b   : > { %v3744_v29 = vpop.permute.xlu0 %1854 }
 0x62c   : > { %4697 = vst [vmem:[#allocation66_spill] sm:$0xff] %v3744_v29  ;;  %v683_v29 = vmul.f32 %v679_v24, %v653_v59  ;;  %v783_v24 = vmul.f32 %v779_v37, %v752_v22 }
 0x62e   : > { %v685_v41 = vadd.f32 %v683_v29, %v621_v32  ;;  %v785_v44 = vadd.f32 %v783_v24, %v723_v51  ;;  %v1142_v24 = vsel %vm1140_vm5, %v3477_v56, %v3657_v27  ;;  %v1204_v56 = vsel %vm1109_vm10, %v3479_v63, %v3669_v4  ;;  %v4699_v63 = vld [vmem:[#allocation24_spill] sm:$0xff] }
 0x630   : > { %v814_v18 = vpop.permute.xlu0 %813  ;;  %v722_v0 = vadd.f32 %v720_v30, %v685_v41 }
 0x631   : > { %v844_v29 = vmul.f32 %v840_v2, %v814_v18  ;;  %v845_v59 = vmul.f32 %v841_v42, %v814_v18  ;;  %v966_v18 = vsel %vm964_vm4, %v3447_v53, %v3614_v19  ;;  %v1010_v53 = vsel %vm1008_vm13, %v3471_v17, %v3635_v13  ;;  %v2604_v13 = vld.sshfl [vmem:[#allocation2 + $0x2] sm:$0x33 pattern:$0x76325410] }
 0x632   : > { %v784_v49 = vadd.f32 %v782_v25, %v722_v0  ;;  %v970_v43 = vmul.f32 %v966_v18, %v3306_v6  ;;  %v1097_v6 = vsel %vm1096_vm11, %v3453_v3, %v3475_v38  ;;  %v1058_v25 = vmul.f32 %v1054_v1, %v3247_v34 }
 0x633   : > { %v847_v28 = vadd.f32 %v845_v59, %v785_v44  ;;  %v1101_v2 = vmul.f32 %v1097_v6, %v3251_v35  ;;  %v1102_v3 = vmul.f32 %v1098_v62, %v3251_v35  ;;  %v1162_v38 = vcombine.high %v2604_v13, %v2604_v13  ;;  %v4698_v44 = vld [vmem:[#allocation25_spill] sm:$0xff]  ;;  %v4710_v6 = vld [vmem:[#allocation31_spill] sm:$0xff]  ;;  %v4711_v62 = vld [vmem:[#allocation30_spill] sm:$0xff] }
 0x634   : > { %v3758_v20 = vpop.permute.xlu0 %1885  ;;  %v846_v7 = vadd.f32 %v844_v29, %v784_v49  ;;  %v1165_v27 = vmul.f32 %v2604_v13, %v3363_v48  ;;  %v1208_v49 = vmul.f32 %v1204_v56, %v3372_v15  ;;  %v1287_v4 = vsel %vm1021_vm8, %v4699_v63, %v4698_v44 }
 0x635   : > { %v1166_v35 = vmul.f32 %v1162_v38, %v3363_v48  ;;  %v1288_v54 = vsel %vm1021_vm8, %v4698_v44, %v3693_v47  ;;  %v4705_v47 = vld [vmem:[#allocation29_spill] sm:$0xff]  ;;  %v1408_v13 = vsel %vm896_vm6, %v4711_v62, %v4710_v6  ;;  %v4742_v62 = vld [vmem:[#allocation62_spill] sm:$0xff] }
 0x639   : > { %v858_v55 = vpop.permute.xlu0 %857 }
 0x63a   : > { %v888_v32 = vmul.f32 %v884_v39, %v858_v55  ;;  %v889_v22 = vmul.f32 %v885_v58, %v858_v55  ;;  %v1009_v55 = vsel %vm1008_vm13, %v3449_v46, %v3471_v17  ;;  %v1014_v46 = vmul.f32 %v1010_v53, %v3239_v14 }
 0x63b   : > { %v1013_v37 = vmul.f32 %v1009_v55, %v3239_v14  ;;  %v1057_v17 = vmul.f32 %v1053_v60, %v3247_v34  ;;  %v1146_v34 = vmul.f32 %v1142_v24, %v3258_v36  ;;  %v1207_v58 = vmul.f32 %v1203_v50, %v3372_v15  ;;  %v4714_v24 = vld [vmem:[#allocation32_spill] sm:$0xff] }
 0x63c   : > { %v890_v33 = vadd.f32 %v888_v32, %v846_v7  ;;  %v891_v57 = vadd.f32 %v889_v22, %v847_v28  ;;  %v1245_v36 = vsel %vm1065_vm9, %v3457_v9, %v3481_v16  ;;  %v1650_v32 = vpop.permute.xlu1 %1649  ;;  %v4700_v7 = vld [vmem:[#allocation40_spill] sm:$0xff]  ;;  %v1291_v15 = vmul.f32 %v1287_v4, %v4701_v23  ;;  %v4725_v4 = vld [vmem:[#allocation37_spill] sm:$0xff] }
 0x63d   : > { %v3782_v21 = vpop.permute.xlu0 %1916  ;;  %v1249_v9 = vmul.f32 %v1245_v36, %v4700_v7  ;;  %v1250_v28 = vmul.f32 %v1246_v10, %v4700_v7  ;;  %v4723_v36 = vld [vmem:[#allocation54_spill] sm:$0xff] }
 0x642   : > { %v902_v5 = vpop.permute.xlu0 %901 }
 0x643   : > { %v932_v61 = vmul.f32 %v928_v26, %v902_v5  ;;  %v933_v41 = vmul.f32 %v929_v40, %v902_v5  ;;  %v4702_v26 = vld [vmem:[#allocation27_spill] sm:$0xff]  ;;  %v4703_v40 = vld [vmem:[#allocation26_spill] sm:$0xff] }
 0x644   : > { %v1329_v5 = vsel %vm977_vm7, %v4703_v40, %v4702_v26 }
 0x645   : > { %v934_v12 = vadd.f32 %v932_v61, %v890_v33  ;;  %v935_v19 = vadd.f32 %v933_v41, %v891_v57  ;;  %v4704_v33 = vld [vmem:[#allocation48_spill] sm:$0xff]  ;;  %v1292_v61 = vmul.f32 %v1288_v54, %v4701_v23  ;;  %v4706_v41 = vld [vmem:[#allocation46_spill] sm:$0xff] }
 0x646   : > { %v1330_v57 = vsel %vm977_vm7, %v4702_v26, %v4704_v33  ;;  %v4728_v54 = vld [vmem:[#allocation56_spill] sm:$0xff]  ;;  %v4732_v26 = vld [vmem:[#allocation57_spill] sm:$0xff] }
 0x647   : > { %v971_v30 = vadd.f32 %v969_v11, %v934_v12  ;;  %v972_v52 = vadd.f32 %v970_v43, %v935_v19  ;;  %v1366_v11 = vsel %vm4594_vm3, %v4706_v41, %v4705_v47  ;;  %v4707_v43 = vld [vmem:[#allocation47_spill] sm:$0xff]  ;;  %v4708_v12 = vld [vmem:[#allocation45_spill] sm:$0xff]  ;;  %v1535_v7 = vsel %vm4729_vm15, %v4725_v4, %v4728_v54 }
 0x648   : > { %v1367_v60 = vsel %vm4594_vm3, %v4705_v47, %v4707_v43  ;;  %v1333_v19 = vmul.f32 %v1329_v5, %v4708_v12  ;;  %v1334_v1 = vmul.f32 %v1330_v57, %v4708_v12  ;;  %vm4715_vm3 = vcmask 900096   ;;  %v4733_v5 = vld [vmem:[#allocation58_spill] sm:$0xff]  ;;  %v4734_v57 = vld [vmem:[#allocation55_spill] sm:$0xff]  ;;  %v4736_v43 = vld [vmem:[#allocation41_spill] sm:$0xff] }
 0x649   : > { %v1015_v14 = vadd.f32 %v1013_v37, %v971_v30  ;;  %v1016_v45 = vadd.f32 %v1014_v46, %v972_v52  ;;  %v1652_v37 = vpop.permute.xlu1 %1651  ;;  %v4709_v52 = vld [vmem:[#allocation28_spill] sm:$0xff]  ;;  %vm4717_vm1 = vmmov %vm4715_vm3  ;;  %v1539_v47 = vmul.f32 %v1535_v7, %v4734_v57  ;;  %vm4741_vm15 = vcmask 769024  }
 0x64a   : > { %v4738_v12 = vld [vmem:[#allocation60_spill] sm:$0xff] }
 0x64b   : > { %v1059_v42 = vadd.f32 %v1057_v17, %v1015_v14  ;;  %v1060_v0 = vadd.f32 %v1058_v25, %v1016_v45  ;;  %v1370_v17 = vmul.f32 %v1366_v11, %v4709_v52  ;;  %v4712_v25 = vld [vmem:[#allocation50_spill] sm:$0xff]  ;;  %v1371_v14 = vmul.f32 %v1367_v60, %v4709_v52  ;;  %v4713_v45 = vld [vmem:[#allocation33_spill] sm:$0xff] }
 0x64c   : > { %v1409_v8 = vsel %vm896_vm6, %v4710_v6, %v4712_v25  ;;  %v1655_v6 = vsel %vm4741_vm15, %v1650_v32, %v1652_v37  ;;  %v4744_v25 = vld [vmem:[#allocation59_spill] sm:$0xff] }
 0x64d   : > { %v1103_v51 = vadd.f32 %v1101_v2, %v1059_v42  ;;  %v1104_v29 = vadd.f32 %v1102_v3, %v1060_v0  ;;  %v1450_v2 = vsel %vm4715_vm3, %v4714_v24, %v4713_v45  ;;  %v4716_v0 = vld [vmem:[#allocation52_spill] sm:$0xff]  ;;  %vm4724_vm3 = vmmov %vm4722_vm0 }
 0x64e   : > { %v1451_v38 = vsel %vm4717_vm1, %v4713_v45, %v4716_v0  ;;  %vm1570_vm1 = vcmask 785408  }
 0x64f   : > { %v1147_v59 = vadd.f32 %v1145_v31, %v1103_v51  ;;  %v1148_v39 = vadd.f32 %v1146_v34, %v1104_v29  ;;  %v4718_v31 = vld [vmem:[#allocation49_spill] sm:$0xff]  ;;  %v1666_v51 = vpop.permute.xlu1 %1665 }
 0x650   : > { %v1412_v34 = vmul.f32 %v1408_v13, %v4718_v31  ;;  %v1413_v50 = vmul.f32 %v1409_v8, %v4718_v31 }
 0x651   : > { %v1167_v48 = vadd.f32 %v1165_v27, %v1147_v59  ;;  %v1168_v22 = vadd.f32 %v1166_v35, %v1148_v39  ;;  %v4719_v27 = vld [vmem:[#allocation51_spill] sm:$0xff]  ;;  %v4721_v39 = vld [vmem:[#allocation34_spill] sm:$0xff] }
 0x652   : > { %v1454_v35 = vmul.f32 %v1450_v2, %v4719_v27  ;;  %v4720_v59 = vld [vmem:[#allocation35_spill] sm:$0xff]  ;;  %v4745_v2 = vld [vmem:[#allocation61_spill] sm:$0xff] }
 0x653   : > { %v1209_v18 = vadd.f32 %v1207_v58, %v1167_v48  ;;  %v1210_v16 = vadd.f32 %v1208_v49, %v1168_v22  ;;  %v1492_v58 = vsel %vm4722_vm0, %v4721_v39, %v4720_v59  ;;  %v1493_v10 = vsel %vm4724_vm3, %v4720_v59, %v4723_v36  ;;  %v4726_v48 = vld [vmem:[#allocation36_spill] sm:$0xff]  ;;  %v1694_v41 = vpop.permute.xlu1 %1693  ;;  %vm4743_vm3 = vmmov %vm4741_vm15  ;;  %v4747_v59 = vld [vmem:[#allocation22_spill] sm:$0xff] }
 0x654   : > { %v1455_v49 = vmul.f32 %v1451_v38, %v4719_v27  ;;  %v1534_v22 = vsel %vm4727_vm2, %v4726_v48, %v4725_v4  ;;  %vm4737_vm0 = vcmask 777216   ;;  %v1656_v13 = vsel %vm4743_vm3, %v1652_v37, %v4742_v62  ;;  %v4750_v48 = vld [vmem:[#allocation18_spill] sm:$0xff] }
 0x655   : > { %v1251_v55 = vadd.f32 %v1249_v9, %v1209_v18  ;;  %v1252_v53 = vadd.f32 %v1250_v28, %v1210_v16  ;;  %v4730_v9 = vld [vmem:[#allocation53_spill] sm:$0xff]  ;;  %vm4739_vm2 = vmmov %vm4737_vm0  ;;  %vm4755_vm15 = vcmask 793600  }
 0x656   : > { %v1496_v28 = vmul.f32 %v1492_v58, %v4730_v9  ;;  %v1497_v18 = vmul.f32 %v1493_v10, %v4730_v9  ;;  %v4748_v58 = vld [vmem:[#allocation23_spill] sm:$0xff] }
 0x657   : > { %v1293_v46 = vadd.f32 %v1291_v15, %v1251_v55  ;;  %v1294_v30 = vadd.f32 %v1292_v61, %v1252_v53  ;;  %v4731_v15 = vld [vmem:[#allocation39_spill] sm:$0xff]  ;;  %v1538_v61 = vmul.f32 %v1534_v22, %v4734_v57  ;;  %v4735_v53 = vld [vmem:[#allocation42_spill] sm:$0xff]  ;;  %v1710_v0 = vpop.permute.xlu1 %1709  ;;  %v1715_v22 = vrot.slane %v4747_v59, %v4750_v48 }
 0x658   : > { %v1571_v40 = vsel %vm1570_vm1, %v4732_v26, %v4731_v15  ;;  %v1572_v33 = vsel %vm1570_vm1, %v4731_v15, %v4733_v5  ;;  %v1613_v60 = vsel %vm4737_vm0, %v4736_v43, %v4735_v53  ;;  %vm4753_vm0 = vmmov %vm4743_vm3  ;;  %vm4756_vm3 = vcmask 801792  }
 0x659   : > { %v1335_v3 = vadd.f32 %v1333_v19, %v1293_v46  ;;  %v1336_v42 = vadd.f32 %v1334_v1, %v1294_v30  ;;  %v1614_v19 = vsel %vm4739_vm2, %v4735_v53, %v4738_v12  ;;  %v4740_v1 = vld [vmem:[#allocation38_spill] sm:$0xff]  ;;  %v1617_v8 = vmul.f32 %v1613_v60, %v4744_v25 }
 0x65a   : > { %v1575_v46 = vmul.f32 %v1571_v40, %v4740_v1  ;;  %v1576_v30 = vmul.f32 %v1572_v33, %v4740_v1  ;;  %v4751_v33 = vld [vmem:[#allocation64_spill] sm:$0xff] }
 0x65b   : > { %v1372_v29 = vadd.f32 %v1370_v17, %v1335_v3  ;;  %v1373_v56 = vadd.f32 %v1371_v14, %v1336_v42  ;;  %v1618_v14 = vmul.f32 %v1614_v19, %v4744_v25  ;;  %v1659_v3 = vmul.f32 %v1655_v6, %v4745_v2  ;;  %v2772_v60 = vld [vmem:[%s3100_s26] sm:$0xff]  ;;  %v2773_v19 = vld [vmem:[%s3100_s26 + $0x8] sm:$0xff] }
 0x65c   : > { %v1660_v42 = vmul.f32 %v1656_v13, %v4745_v2 }
 0x65d   : > { %v1414_v44 = vadd.f32 %v1412_v34, %v1372_v29  ;;  %v1415_v63 = vadd.f32 %v1413_v50, %v1373_v56  ;;  %v1744_v29 = vpop.permute.xlu1 %1743 }
 0x65f   : > { %v1456_v16 = vadd.f32 %v1454_v35, %v1414_v44  ;;  %v1457_v23 = vadd.f32 %v1455_v49, %v1415_v63  ;;  %v4746_v35 = vld [vmem:[#allocation16_spill] sm:$0xff]  ;;  %v4749_v44 = vld [vmem:[#allocation63_spill] sm:$0xff] }
 0x660   : > { %v1682_v39 = vrot.slane %v4747_v59, %v4746_v35  ;;  %v1686_v36 = vrot.slane %v4748_v58, %v4746_v35 }
 0x661   : > { %v1498_v11 = vadd.f32 %v1496_v28, %v1456_v16  ;;  %v1499_v55 = vadd.f32 %v1497_v18, %v1457_v23  ;;  %v1760_v18 = vpop.permute.xlu1 %1759  ;;  %v1720_v16 = vmul.f32 %v1715_v22, %v1710_v0  ;;  %v4761_v22 = vmov 8  }
 0x662   : > { %v1687_v63 = vmul.f32 %v1682_v39, %v4749_v44  ;;  %v1688_v4 = vmul.f32 %v1686_v36, %v4749_v44 }
 0x663   : > { %v1540_v52 = vadd.f32 %v1538_v61, %v1498_v11  ;;  %v1541_v17 = vadd.f32 %v1539_v47, %v1499_v55 }
 0x665   : > { %v1577_v45 = vadd.f32 %v1575_v46, %v1540_v52  ;;  %v1578_v24 = vadd.f32 %v1576_v30, %v1541_v17  ;;  %v1792_v11 = vpop.permute.xlu1 %1791  ;;  %v1761_v30 = vrot.slane %v1760_v18, 4 }
 0x666   : > { %v1793_v62 = vrot.slane %v1792_v11, 4 }
 0x667   : > { %v1619_v38 = vadd.f32 %v1617_v8, %v1577_v45  ;;  %v1620_v31 = vadd.f32 %v1618_v14, %v1578_v24  ;;  %v1762_v6 = vsel %vm4753_vm0, %v1761_v30, %v1760_v18  ;;  %vm4758_vm0 = vcmask 900096  }
 0x668   : > { %v1794_v8 = vsel %vm4739_vm2, %v1793_v62, %v1792_v11 }
 0x669   : > { %v1661_v34 = vadd.f32 %v1659_v3, %v1619_v38  ;;  %v1662_v50 = vadd.f32 %v1660_v42, %v1620_v31  ;;  %v3962_v46 = vpop.permute.xlu1 %1823 }
 0x66b   : > { %v1668_v32 = vadd.f32 %v1666_v51, %v1661_v34  ;;  %v1669_v56 = vadd.f32 %v1666_v51, %v1662_v50  ;;  %v1719_v51 = vrot.slane %v4748_v58, %v4750_v48 }
 0x66d   : > { %v1670_v27 = vmax.f32 %v1668_v32, 0.0  ;;  %v1671_v37 = vmax.f32 %v1669_v56, 0.0  ;;  %v1721_v23 = vmul.f32 %v1719_v51, %v1710_v0  ;;  %v1846_v52 = vpop.permute.xlu1 %1845 }
 0x66e   : > { %v1847_v2 = vrot.slane %v1846_v52, 4 }
 0x66f   : > { %v1699_v10 = vrot.slane %v1670_v27, %v4746_v35  ;;  %v1703_v49 = vrot.slane %v1671_v37, %v4746_v35  ;;  %v1731_v9 = vrot.slane %v1670_v27, %v4750_v48  ;;  %v1735_v28 = vrot.slane %v1671_v37, %v4750_v48 }
 0x670   : > { %v1848_v38 = vsel %vm4755_vm15, %v1847_v2, %v1846_v52  ;;  %v4767_v52 = vld [vmem:[#allocation20_spill] sm:$0xff] }
 0x671   : > { %v1704_v54 = vmul.f32 %v1699_v10, %v1694_v41  ;;  %v1705_v7 = vmul.f32 %v1703_v49, %v1694_v41  ;;  %v1736_v57 = vmul.f32 %v1731_v9, %v4751_v33  ;;  %v1737_v61 = vmul.f32 %v1735_v28, %v4751_v33  ;;  %v1877_v24 = vpop.permute.xlu1 %1876 }
 0x672   : > { %v1878_v31 = vrot.slane %v1877_v24, 4 }
 0x673   : > { %v1706_v15 = vadd.f32 %v1704_v54, %v1687_v63  ;;  %v1707_v26 = vadd.f32 %v1705_v7, %v1688_v4  ;;  %v4760_v4 = vld [vmem:[#allocation43_spill] sm:$0xff] }
 0x674   : > { %v1879_v56 = vsel %vm4756_vm3, %v1878_v31, %v1877_v24  ;;  %v4762_v7 = vld [vmem:[#allocation19_spill] sm:$0xff] }
 0x675   : > { %v1722_v40 = vadd.f32 %v1720_v16, %v1706_v15  ;;  %v1723_v5 = vadd.f32 %v1721_v23, %v1707_v26  ;;  %v1908_v50 = vpop.permute.xlu1 %1907 }
 0x676   : > { %v1909_v27 = vrot.slane %v1908_v50, 4 }
 0x677   : > { %v1738_v47 = vadd.f32 %v1736_v57, %v1722_v40  ;;  %v1739_v41 = vadd.f32 %v1737_v61, %v1723_v5 }
 0x678   : > { %v1910_v39 = vsel %vm4758_vm0, %v1909_v27, %v1908_v50 }
 0x679   : > { %v1746_v55 = vadd.f32 %v1744_v29, %v1738_v47  ;;  %v3947_v53 = vadd.f32 %v1744_v29, %v1739_v41 }
 0x67b   : > { %v3950_v43 = vcombine.low %v1746_v55, %v3947_v53  ;;  %v2489_v12 = vadd.f32 %v2772_v60, %v1746_v55  ;;  %v2490_v1 = vadd.f32 %v2773_v19, %v3947_v53 }
 0x67d   : > { %1756 = vst [vmem:[#allocation3 + $0x4] sm:$0xff] %v3950_v43  ;;  %2491 = vst [vmem:[%s3958_s2] sm:$0xf] %v2489_v12 }
 0x67e   : > { %2492 = vst [vmem:[%s3958_s2 + $0x8] sm:$0xf] %v2490_v1  ;;  %v4765_v1 = vmov 12  }
 0x684   : > { %v3964_v17 = vld [vmem:[#allocation3] sm:$0xff]  ;;  %v1758_v25 = vld [vmem:[#allocation3 + $0x8] sm:$0xf] }
 0x685   : > { %v1765_v13 = vmul.f32 %v1762_v6, %v3964_v17  ;;  %1829 = vrot.lane.b32.xlu0 %v3964_v17, %s4754_s4  ;;  %v1821_v14 = vld [vmem:[#allocation3 + $0x8] sm:$0xf]  ;;  %v1797_v45 = vmul.f32 %v1794_v8, %v3964_v17  ;;  %v1766_v3 = vmul.f32 %v1761_v30, %v1758_v25  ;;  %v3977_v0 = vcombine.high %v3964_v17, %v3964_v17 }
 0x686   : > { %v1790_v42 = vld [vmem:[#allocation3 + $0x8] sm:$0xf]  ;;  %v1851_v32 = vmul.f32 %v1848_v38, %v3964_v17  ;;  %v1882_v59 = vmul.f32 %v1879_v56, %v3964_v17  ;;  %v1913_v10 = vmul.f32 %v1910_v39, %v3964_v17  ;;  %v4766_v30 = vmov 9  }
 0x687   : > { %1775 = vrot.lane.b32.xlu1 %v1765_v13, %s4660_s3  ;;  %v1798_v34 = vmul.f32 %v1793_v62, %v1790_v42  ;;  %v1844_v29 = vld [vmem:[#allocation3 + $0x8] sm:$0xf]  ;;  %v1774_v44 = vcombine.high %v1765_v13, %v1765_v13  ;;  %v1805_v63 = vcombine.high %v1797_v45, %v1797_v45 }
 0x688   : > { %v1852_v37 = vmul.f32 %v1847_v2, %v1844_v29  ;;  %v1875_v35 = vld [vmem:[#allocation3 + $0x8] sm:$0xf]  ;;  %v1859_v48 = vcombine.high %v1851_v32, %v1851_v32  ;;  %v1890_v51 = vcombine.high %v1882_v59, %v1882_v59  ;;  %v1921_v54 = vcombine.high %v1913_v10, %v1913_v10 }
 0x689   : > { %1833 = vrot.lane.b32.xlu0 %v1821_v14, %s4754_s4  ;;  %v1883_v58 = vmul.f32 %v1878_v31, %v1875_v35  ;;  %v1906_v36 = vld [vmem:[#allocation3 + $0x8] sm:$0xf] }
 0x68a   : > { %v1914_v49 = vmul.f32 %v1909_v27, %v1906_v36  ;;  %v1937_v41 = vld [vmem:[#allocation3 + $0x8] sm:$0xf] }
 0x68b   : > { %1806 = vrot.lane.b32.xlu1 %v1797_v45, %s4654_s0  ;;  %v1968_v19 = vld [vmem:[#allocation3 + $0x8] sm:$0xf] }
 0x68c   : > { %v1991_v36 = vld [vmem:[#allocation3 + $0x8] sm:$0xf] }
 0x68d   : > { %1779 = vrot.lane.b32.xlu0 %v1766_v3, %s4660_s3 }
 0x68f   : > { %1831 = vrot.lane.b32.xlu1 %v3977_v0, %s4754_s4  ;;  %s4768_s4 = smov 15  }
 0x691   : > { %1810 = vrot.lane.b32.xlu0 %v1798_v34, %s4654_s0 }
 0x693   : > { %1860 = vrot.lane.b32.xlu1 %v1851_v32, %s4757_s18 }
 0x695   : > { %1864 = vrot.lane.b32.xlu0 %v1852_v37, %s4757_s18 }
 0x697   : > { %1891 = vrot.lane.b32.xlu1 %v1882_v59, %s4759_s20 }
 0x699   : > { %1895 = vrot.lane.b32.xlu0 %v1883_v58, %s4759_s20 }
 0x69b   : > { %1922 = vrot.lane.b32.xlu1 %v1913_v10, %s4634_s27 }
 0x69d   : > { %1926 = vrot.lane.b32.xlu0 %v1914_v49, %s4634_s27 }
 0x69f   : > { %1777 = vrot.lane.b32.xlu1 %v1774_v44, %s4660_s3 }
 0x6a1   : > { %1947 = vperm.xlu0 %2746, %v4760_v4  }
 0x6a3   : > { %1808 = vrot.lane.b32.xlu1 %v1805_v63, %s4654_s0 }
 0x6a5   : > { %2748 = vset.pattern.permute.xlu0 %v4761_v22  ;;  %v4770_v22 = vld [vmem:[#allocation21_spill] sm:$0xff] }
 0x6a7   : > { %1862 = vrot.lane.b32.xlu1 %v1859_v48, %s4757_s18  ;;  %v4769_v48 = vmov 10  }
 0x6ab   : > { %1893 = vrot.lane.b32.xlu1 %v1890_v51, %s4759_s20 }
 0x6af   : > { %1924 = vrot.lane.b32.xlu1 %v1921_v54, %s4634_s27 }
 0x6b3   : > { %1938 = vrot.lane.b32.xlu1 %v4762_v7, %s4643_s28 }
 0x6f7   : > { %v4042_v6 = vpop.permute.xlu0 %1829 }
 0x6f9   : > { %v4004_v9 = vpop.permute.xlu1 %1775 }
 0x6fb   : > { %v4044_v62 = vpop.permute.xlu0 %1833 }
 0x6fd   : > { %v4006_v28 = vpop.permute.xlu1 %1806 }
 0x6ff   : > { %v4046_v13 = vpop.permute.xlu0 %1779 }
 0x701   : > { %v4008_v18 = vpop.permute.xlu1 %1831 }
 0x703   : > { %v4048_v25 = vpop.permute.xlu0 %1810 }
 0x705   : > { %v4010_v16 = vpop.permute.xlu1 %1860 }
 0x707   : > { %v4050_v8 = vpop.permute.xlu0 %1864 }
 0x709   : > { %v4012_v23 = vpop.permute.xlu1 %1891 }
 0x70b   : > { %v4052_v14 = vpop.permute.xlu0 %1895 }
 0x70d   : > { %v4014_v15 = vpop.permute.xlu1 %1922 }
 0x70f   : > { %v4054_v45 = vpop.permute.xlu0 %1926 }
 0x711   : > { %v4016_v26 = vpop.permute.xlu1 %1777 }
 0x715   : > { %v4018_v40 = vpop.permute.xlu1 %1808 }
 0x719   : > { %v4020_v5 = vpop.permute.xlu1 %1862 }
 0x71d   : > { %v4022_v33 = vpop.permute.xlu1 %1893 }
 0x720   : > { %v1948_v24 = vpop.permute.xlu0 %1947 }
 0x721   : > { %v4024_v57 = vpop.permute.xlu1 %1924 }
 0x725   : > { %v1939_v61 = vpop.permute.xlu1 %1938 }
 0x726   : > { %v1940_v47 = vrot.slane %v1939_v61, 4 }
 0x728   : > { %v1941_v11 = vsel %vm896_vm6, %v1940_v47, %v1939_v61  ;;  %v1945_v55 = vmul.f32 %v1940_v47, %v1937_v41 }
 0x729   : > { %v1944_v60 = vmul.f32 %v1941_v11, %v3964_v17 }
 0x72a   : > { %1957 = vrot.lane.b32.xlu0 %v1945_v55, %s4763_s23 }
 0x72b   : > { %1953 = vrot.lane.b32.xlu1 %v1944_v60, %s4763_s23  ;;  %v1952_v12 = vcombine.high %v1944_v60, %v1944_v60 }
 0x72e   : > { %1976 = vrot.lane.b32.xlu0 %v3964_v17, %s4764_s30 }
 0x72f   : > { %1955 = vrot.lane.b32.xlu1 %v1952_v12, %s4763_s23 }
 0x732   : > { %1980 = vrot.lane.b32.xlu0 %v1968_v19, %s4764_s30 }
 0x733   : > { %1970 = vperm.xlu1 %2747, %v4760_v4  }
 0x736   : > { %2001 = vperm.xlu0 %2748, %v4760_v4  }
 0x737   : > { %1978 = vrot.lane.b32.xlu1 %v3977_v0, %s4764_s30  ;;  %s4771_s30 = smov 14  }
 0x738   : > { %2752 = vset.pattern.permute.xlu1 %v4765_v1  ;;  %v2022_v1 = vld [vmem:[#allocation3 + $0x8] sm:$0xf] }
 0x73a   : > { %2749 = vset.pattern.permute.xlu0 %v4766_v30 }
 0x73b   : > { %1992 = vrot.lane.b32.xlu1 %v4767_v52, %s4638_s14 }
 0x79c   : > { %v1958_v3 = vpop.permute.xlu0 %1957 }
 0x79d   : > { %v1954_v2 = vpop.permute.xlu1 %1953 }
 0x7a0   : > { %v1977_v50 = vpop.permute.xlu0 %1976 }
 0x7a1   : > { %v1956_v42 = vpop.permute.xlu1 %1955 }
 0x7a2   : > { %v1959_v0 = vsel %vm927_vm14, %v1954_v2, %v1956_v42  ;;  %v1960_v38 = vsel %vm927_vm14, %v1956_v42, %v1958_v3  ;;  %v4772_v42 = vmov 11  }
 0x7a3   : > { %v4058_v31 = vmul.f32 %v1959_v0, %v1948_v24  ;;  %v4060_v34 = vmul.f32 %v1960_v38, %v1948_v24  ;;  %v4773_v0 = vld [vmem:[#allocation17_spill] sm:$0xff] }
 0x7a4   : > { %v1981_v32 = vpop.permute.xlu0 %1980 }
 0x7b2   : > { %v1971_v29 = vpop.permute.xlu1 %1970 }
 0x7b5   : > { %v2002_v51 = vpop.permute.xlu0 %2001 }
 0x7b6   : > { %v1979_v56 = vpop.permute.xlu1 %1978 }
 0x7b7   : > { %v1982_v27 = vsel %vm964_vm4, %v1977_v50, %v1979_v56  ;;  %v1983_v37 = vsel %vm964_vm4, %v1979_v56, %v1981_v32  ;;  %vm4786_vm4 = vcmask 146432  }
 0x7b8   : > { %v4064_v35 = vmul.f32 %v1982_v27, %v1971_v29  ;;  %v4066_v59 = vmul.f32 %v1983_v37, %v1971_v29 }
 0x7ba   : > { %v1993_v39 = vpop.permute.xlu1 %1992 }
 0x7bb   : > { %v1994_v58 = vrot.slane %v1993_v39, 4 }
 0x7bd   : > { %v1995_v10 = vsel %vm977_vm7, %v1994_v58, %v1993_v39  ;;  %v1999_v49 = vmul.f32 %v1994_v58, %v1991_v36 }
 0x7be   : > { %v1998_v44 = vmul.f32 %v1995_v10, %v3964_v17  ;;  %v2053_v10 = vld [vmem:[#allocation3 + $0x8] sm:$0xf] }
 0x7bf   : > { %2011 = vrot.lane.b32.xlu0 %v1999_v49, %s4768_s4 }
 0x7c0   : > { %2007 = vrot.lane.b32.xlu1 %v1998_v44, %s4768_s4  ;;  %v2006_v63 = vcombine.high %v1998_v44, %v1998_v44 }
 0x7c3   : > { %2032 = vperm.xlu0 %2749, %v4760_v4  }
 0x7c4   : > { %2009 = vrot.lane.b32.xlu1 %v2006_v63, %s4768_s4 }
 0x7c7   : > { %2750 = vset.pattern.permute.xlu0 %v4769_v48 }
 0x7c8   : > { %2023 = vrot.lane.b32.xlu1 %v4770_v22, %s4635_s15 }
 0x831   : > { %v2012_v61 = vpop.permute.xlu0 %2011 }
 0x832   : > { %v2008_v54 = vpop.permute.xlu1 %2007 }
 0x836   : > { %v2010_v47 = vpop.permute.xlu1 %2009 }
 0x837   : > { %v2013_v41 = vsel %vm1008_vm13, %v2008_v54, %v2010_v47  ;;  %v2014_v11 = vsel %vm1008_vm13, %v2010_v47, %v2012_v61 }
 0x838   : > { %v4079_v55 = vmul.f32 %v2013_v41, %v2002_v51  ;;  %v4081_v60 = vmul.f32 %v2014_v11, %v2002_v51  ;;  %v4775_v51 = vmov 13  }
 0x83a   : > { %v2024_v12 = vpop.permute.xlu1 %2023 }
 0x83b   : > { %v2025_v19 = vrot.slane %v2024_v12, 4 }
 0x83d   : > { %v2026_v30 = vsel %vm1021_vm8, %v2025_v19, %v2024_v12  ;;  %v2030_v24 = vmul.f32 %v2025_v19, %v2022_v1 }
 0x83e   : > { %v2029_v2 = vmul.f32 %v2026_v30, %v3964_v17 }
 0x83f   : > { %2042 = vrot.lane.b32.xlu0 %v2030_v24, %s4771_s30 }
 0x840   : > { %2038 = vrot.lane.b32.xlu1 %v2029_v2, %s4771_s30  ;;  %v2037_v3 = vcombine.high %v2029_v2, %v2029_v2 }
 0x842   : > { %v2033_v38 = vpop.permute.xlu0 %2032 }
 0x843   : > { %2063 = vperm.xlu0 %2750, %v4760_v4  }
 0x844   : > { %2040 = vrot.lane.b32.xlu1 %v2037_v3, %s4771_s30 }
 0x847   : > { %2751 = vset.pattern.permute.xlu0 %v4772_v42 }
 0x848   : > { %2054 = vrot.lane.b32.xlu1 %v4773_v0, %s4632_s12 }
 0x8b1   : > { %v2043_v29 = vpop.permute.xlu0 %2042 }
 0x8b2   : > { %v2039_v50 = vpop.permute.xlu1 %2038 }
 0x8b6   : > { %v2041_v32 = vpop.permute.xlu1 %2040 }
 0x8b7   : > { %v2044_v56 = vsel %vm1052_vm12, %v2039_v50, %v2041_v32  ;;  %v2045_v27 = vsel %vm1052_vm12, %v2041_v32, %v2043_v29 }
 0x8b8   : > { %v4094_v37 = vmul.f32 %v2044_v56, %v2033_v38  ;;  %v4096_v39 = vmul.f32 %v2045_v27, %v2033_v38  ;;  %v2127_v27 = vld [vmem:[#allocation3 + $0xc] sm:$0xf] }
 0x8ba   : > { %v2055_v58 = vpop.permute.xlu1 %2054 }
 0x8bb   : > { %v2056_v36 = vrot.slane %v2055_v58, 4 }
 0x8bd   : > { %v2057_v49 = vsel %vm1065_vm9, %v2056_v36, %v2055_v58  ;;  %v2061_v44 = vmul.f32 %v2056_v36, %v2053_v10  ;;  %v4777_v58 = vmov 14  }
 0x8be   : > { %v2060_v63 = vmul.f32 %v2057_v49, %v3964_v17 }
 0x8bf   : > { %2073 = vrot.lane.b32.xlu0 %v2061_v44, %s4774_s5 }
 0x8c0   : > { %2069 = vrot.lane.b32.xlu1 %v2060_v63, %s4774_s5  ;;  %v2068_v48 = vcombine.high %v2060_v63, %v2060_v63  ;;  %v2158_v63 = vld [vmem:[#allocation3 + $0xc] sm:$0xf] }
 0x8c2   : > { %v2064_v54 = vpop.permute.xlu0 %2063 }
 0x8c3   : > { %2094 = vperm.xlu0 %2751, %v4760_v4  }
 0x8c4   : > { %2071 = vrot.lane.b32.xlu1 %v2068_v48, %s4774_s5 }
 0x8c7   : > { %2190 = vrot.lane.b32.xlu0 %v4773_v0, %s4771_s30 }
 0x8c8   : > { %2085 = vrot.lane.b32.xlu1 %v4762_v7, %s4633_s19  ;;  %2753 = vset.pattern.permute.xlu0 %v4775_v51  ;;  %v4778_v51 = vmov 17  }
 0x8cb   : > { %2275 = vrot.lane.b32.xlu0 %v4767_v52, %s4763_s23 }
 0x8cc   : > { %2128 = vrot.lane.b32.xlu1 %v4767_v52, %s4776_s6 }
 0x8cf   : > { %2337 = vrot.lane.b32.xlu0 %v4773_v0, %s4759_s20  ;;  %v2084_v0 = vld [vmem:[#allocation3 + $0x8] sm:$0xf] }
 0x8d0   : > { %2159 = vrot.lane.b32.xlu1 %v4770_v22, %s4774_s5 }
 0x8d4   : > { %2221 = vrot.lane.b32.xlu1 %v4762_v7, %s4768_s4 }
 0x8d8   : > { %2306 = vrot.lane.b32.xlu1 %v4770_v22, %s4634_s27 }
 0x8dc   : > { %2368 = vrot.lane.b32.xlu1 %v4762_v7, %s4757_s18 }
 0x8e0   : > { %2422 = vrot.lane.b32.xlu1 %v4767_v52, %s4654_s0  ;;  %s4785_s0 = smov 112  }
 0x931   : > { %v2074_v47 = vpop.permute.xlu0 %2073 }
 0x932   : > { %v2070_v61 = vpop.permute.xlu1 %2069 }
 0x936   : > { %v2072_v41 = vpop.permute.xlu1 %2071 }
 0x937   : > { %v2075_v11 = vsel %vm1096_vm11, %v2070_v61, %v2072_v41  ;;  %v2076_v12 = vsel %vm1096_vm11, %v2072_v41, %v2074_v47  ;;  %v4779_v41 = vmov 15  }
 0x938   : > { %v4127_v19 = vmul.f32 %v2075_v11, %v2064_v54  ;;  %v4129_v1 = vmul.f32 %v2076_v12, %v2064_v54 }
 0x93a   : > { %v2086_v30 = vpop.permute.xlu1 %2085 }
 0x93b   : > { %v2087_v24 = vrot.slane %v2086_v30, 4 }
 0x93d   : > { %v2088_v2 = vsel %vm1109_vm10, %v2087_v24, %v2086_v30  ;;  %v2092_v50 = vmul.f32 %v2087_v24, %v2084_v0  ;;  %v2189_v30 = vld [vmem:[#allocation3 + $0xc] sm:$0xf] }
 0x93e   : > { %v2091_v7 = vmul.f32 %v2088_v2, %v3964_v17  ;;  %v2129_v3 = vpop.permute.xlu1 %2128 }
 0x93f   : > { %v2130_v42 = vrot.slane %v2129_v3, 4 }
 0x940   : > { %v2099_v52 = vcombine.high %v2091_v7, %v2091_v7  ;;  %2100 = vrot.lane.b32.xlu0 %v2091_v7, %s4776_s6 }
 0x941   : > { %v2131_v38 = vsel %vm1140_vm5, %v2130_v42, %v2129_v3  ;;  %v2135_v10 = vmul.f32 %v2130_v42, %v2127_v27 }
 0x942   : > { %2102 = vrot.lane.b32.xlu1 %v2099_v52, %s4776_s6  ;;  %v2160_v29 = vpop.permute.xlu1 %2159  ;;  %v2134_v32 = vmul.f32 %v2131_v38, %v3950_v43  ;;  %v4140_v17 = vpop.permute.xlu0 %2094  ;;  %v4780_v52 = vmov 16   ;;  %v4781_v38 = vmov 18  }
 0x943   : > { %v2161_v56 = vrot.slane %v2160_v29, 4 }
 0x944   : > { %2453 = vrot.lane.b32.xlu0 %v4770_v22, %s4660_s3  ;;  %v2142_v22 = vcombine.high %v2134_v32, %v2134_v32 }
 0x945   : > { %v2162_v36 = vsel %vm1096_vm11, %v2161_v56, %v2160_v29  ;;  %v2166_v54 = vmul.f32 %v2161_v56, %v2158_v63  ;;  %v4782_v29 = vmov 19   ;;  %v4783_v56 = vmov 20   ;;  %v2274_v63 = vld [vmem:[#allocation3 + $0xc] sm:$0xf] }
 0x946   : > { %2116 = vperm.xlu1 %2752, %v4760_v4   ;;  %v2191_v49 = vpop.permute.xlu0 %2190  ;;  %v2165_v44 = vmul.f32 %v2162_v36, %v3950_v43  ;;  %v2222_v12 = vpop.permute.xlu1 %2221  ;;  %v2251_v36 = vld [vmem:[#allocation3 + $0xc] sm:$0xf]  ;;  %vm4788_vm11 = vcmask 244736  }
 0x947   : > { %v2192_v48 = vrot.slane %v2191_v49, 4  ;;  %v2223_v24 = vrot.slane %v2222_v12, 4 }
 0x948   : > { %2104 = vrot.lane.b32.xlu0 %v2092_v50, %s4776_s6  ;;  %v2173_v61 = vcombine.high %v2165_v44, %v2165_v44  ;;  %v2220_v50 = vld [vmem:[#allocation3 + $0xc] sm:$0xf]  ;;  %s4794_s6 = smov 96  }
 0x949   : > { %v2193_v47 = vsel %vm1052_vm12, %v2192_v48, %v2191_v49  ;;  %v2197_v2 = vmul.f32 %v2192_v48, %v2189_v30  ;;  %v2224_v3 = vsel %vm1008_vm13, %v2223_v24, %v2222_v12  ;;  %v4787_v30 = vmov 21  }
 0x94a   : > { %2143 = vrot.lane.b32.xlu1 %v2134_v32, %s4633_s19  ;;  %v2196_v11 = vmul.f32 %v2193_v47, %v3950_v43  ;;  %v2227_v42 = vmul.f32 %v2224_v3, %v3950_v43  ;;  %v2228_v32 = vmul.f32 %v2223_v24, %v2220_v50  ;;  %v2276_v27 = vpop.permute.xlu0 %2275  ;;  %v2307_v49 = vpop.permute.xlu1 %2306  ;;  %vm4790_vm12 = vcmask 252928  }
 0x94b   : > { %2754 = vset.pattern.permute.xlu1 %v4777_v58  ;;  %v2277_v58 = vrot.slane %v2276_v27, 4  ;;  %vm4792_vm13 = vcmask 269312   ;;  %vm4803_vm0 = vmmov %vm4790_vm12 }
 0x94c   : > { %2137 = vperm.xlu0 %2753, %v4760_v4   ;;  %v2204_v7 = vcombine.high %v2196_v11, %v2196_v11  ;;  %v2235_v0 = vcombine.high %v2227_v42, %v2227_v42 }
 0x94e   : > { %2145 = vrot.lane.b32.xlu1 %v2142_v22, %s4633_s19  ;;  %v4784_v22 = vmov 0   ;;  %v2338_v47 = vpop.permute.xlu0 %2337  ;;  %v2369_v3 = vpop.permute.xlu1 %2368 }
 0x94f   : > { %v2339_v12 = vrot.slane %v2338_v47, 4 }
 0x950   : > { %2147 = vrot.lane.b32.xlu0 %v2135_v10, %s4633_s19  ;;  %v2278_v10 = vsel %vm927_vm14, %v2277_v58, %v2276_v27  ;;  %vm4795_vm14 = vcmask 277504  }
 0x951   : > { %2757 = vset.pattern.permute.xlu0 %v4778_v51  ;;  %v2281_v48 = vmul.f32 %v2278_v10, %v3950_v43  ;;  %v2282_v51 = vmul.f32 %v2277_v58, %v2274_v63  ;;  %v4791_v58 = vmov 23   ;;  %vm4800_vm15 = vmmov %vm4795_vm14 }
 0x952   : > { %2168 = vperm.xlu1 %2754, %v4760_v4   ;;  %vm4801_vm3 = vmmov %vm4795_vm14 }
 0x954   : > { %2174 = vrot.lane.b32.xlu0 %v2165_v44, %s4632_s12  ;;  %v4182_v44 = vcombine.low %v3947_v53, %v3947_v53 }
 0x956   : > { %2176 = vrot.lane.b32.xlu1 %v2173_v61, %s4632_s12  ;;  %v2289_v61 = vcombine.high %v2281_v48, %v2281_v48 }
 0x957   : > { %2755 = vset.pattern.permute.xlu1 %v4779_v41  ;;  %v2305_v41 = vld [vmem:[#allocation3 + $0xc] sm:$0xf] }
 0x958   : > { %2178 = vrot.lane.b32.xlu0 %v2166_v54, %s4632_s12  ;;  %v2774_v54 = vld [vmem:[%s4458_s9] sm:$0xf] }
 0x95a   : > { %2199 = vperm.xlu1 %2755, %v4760_v4  }
 0x95c   : > { %2205 = vrot.lane.b32.xlu0 %v2196_v11, %s4635_s15 }
 0x95e   : > { %2207 = vrot.lane.b32.xlu1 %v2204_v7, %s4635_s15 }
 0x95f   : > { %2756 = vset.pattern.permute.xlu1 %v4780_v52  ;;  %v2336_v52 = vld [vmem:[#allocation3 + $0xc] sm:$0xf] }
 0x960   : > { %2209 = vrot.lane.b32.xlu0 %v2197_v2, %s4635_s15  ;;  %v2340_v2 = vsel %vm4788_vm11, %v2339_v12, %v2338_v47  ;;  %v2344_v50 = vmul.f32 %v2339_v12, %v2336_v52  ;;  %v1749_v47 = vld [vmem:[%s4459_s10] sm:$0xf]  ;;  %s2524_s15 = sshll.u32 %s3958_s2, 4  ;;  %s4405_s15 = int_to_ptr.vmem [resolvable:$true] %s2524_s15 }
 0x961   : > { %s2808_s19 = scalar_lea.vmem %s4405_s15, 256 }
 0x962   : > { %2230 = vperm.xlu1 %2756, %v4760_v4   ;;  %p2809_p6 = scmp.ne.s32.totalorder %s4405_s15, %s2808_s19 }
 0x964   : > { %2253 = vperm.xlu0 %2757, %v4760_v4   ;;  %p2810_p12 = pnand %p2809_p6, %p4821_p11 }
 0x966   : > { %2758 = vset.pattern.permute.xlu1 %v4781_v38  ;;  %v4789_v38 = vmov 22   ;;  %p2811_p13 = pneg %p2810_p12 }
 0x967   : > { %2284 = vperm.xlu1 %2758, %v4760_v4  }
 0x968   : > { %2238 = vrot.lane.b32.xlu0 %v2235_v0, %s4638_s14  ;;  %v2370_v0 = vrot.slane %v2369_v3, 4 }
 0x969   : > { %2759 = vset.pattern.permute.xlu0 %v4782_v29 }
 0x96a   : > { %v2371_v29 = vsel %vm4790_vm12, %v2370_v0, %v2369_v3  ;;  %vm4805_vm12 = vmmov %vm4788_vm11 }
 0x96b   : > { %2236 = vrot.lane.b32.xlu1 %v2227_v42, %s4638_s14  ;;  %v2343_v42 = vmul.f32 %v2340_v2, %v3950_v43  ;;  %v2374_v27 = vmul.f32 %v2371_v29, %v3950_v43 }
 0x96c   : > { %2315 = vperm.xlu0 %2759, %v4760_v4   ;;  %2761 = vset.pattern.permute.xlu1 %v4783_v56  ;;  %v2367_v56 = vld [vmem:[#allocation3 + $0xc] sm:$0xf] }
 0x96f   : > { %2240 = vrot.lane.b32.xlu1 %v2228_v32, %s4638_s14  ;;  %v2351_v32 = vcombine.high %v2343_v42, %v2343_v42 }
 0x970   : > { %2760 = vset.pattern.permute.xlu0 %v4784_v22  ;;  %v2375_v22 = vmul.f32 %v2370_v0, %v2367_v56 }
 0x971   : > { %1769 = vperm.xlu0 %2760, %v4760_v4   ;;  %v2308_v4 = vrot.slane %v2307_v49, 4 }
 0x973   : > { %2259 = vrot.lane.b32.xlu1 %v3950_v43, %s4785_s0  ;;  %v2309_v53 = vsel %vm4786_vm4, %v2308_v4, %v2307_v49  ;;  %v2313_v24 = vmul.f32 %v2308_v4, %v2305_v41  ;;  %v2382_v49 = vcombine.high %v2374_v27, %v2374_v27  ;;  %v2398_v4 = vld [vmem:[#allocation3 + $0xc] sm:$0xf]  ;;  %vm4804_vm4 = vmmov %vm4803_vm0 }
 0x974   : > { %v2312_v11 = vmul.f32 %v2309_v53, %v3950_v43 }
 0x975   : > { %2263 = vrot.lane.b32.xlu0 %v2251_v36, %s4785_s0  ;;  %v2423_v36 = vpop.permute.xlu1 %2422 }
 0x976   : > { %v2320_v7 = vcombine.high %v2312_v11, %v2312_v11  ;;  %v2424_v10 = vrot.slane %v2423_v36, 4 }
 0x977   : > { %2261 = vrot.lane.b32.xlu1 %v4182_v44, %s4785_s0 }
 0x978   : > { %v2425_v63 = vsel %vm4792_vm13, %v2424_v10, %v2423_v36 }
 0x979   : > { %2290 = vrot.lane.b32.xlu0 %v2281_v48, %s4643_s28  ;;  %v4793_v48 = vmov 24  }
 0x97b   : > { %2346 = vperm.xlu1 %2761, %v2774_v54  }
 0x97d   : > { %2294 = vrot.lane.b32.xlu0 %v2282_v51, %s4643_s28  ;;  %v2428_v51 = vmul.f32 %v2425_v63, %v3950_v43 }
 0x97f   : > { %2292 = vrot.lane.b32.xlu1 %v2289_v61, %s4643_s28  ;;  %v2436_v53 = vcombine.high %v2428_v51, %v2428_v51  ;;  %v2421_v61 = vld [vmem:[#allocation3 + $0xc] sm:$0xf]  ;;  %s2611_s28 = sshll.u32 %s3010_s21, 8  ;;  %s2928_s21 = smov [#allocation7]  }
 0x980   : > { %2762 = vset.pattern.permute.xlu1 %v4787_v30  ;;  %v2429_v41 = vmul.f32 %v2424_v10, %v2421_v61  ;;  %v2452_v30 = vld [vmem:[#allocation3 + $0xc] sm:$0xf]  ;;  %s4403_s14 = scalar_lea.hbm %s4460_s11, %s2611_s28 }
 0x981   : > { %2321 = vrot.lane.b32.xlu0 %v2312_v11, %s4646_s25 }
 0x983   : > { %2377 = vperm.xlu1 %2762, %v2774_v54  }
 0x985   : > { %2325 = vrot.lane.b32.xlu0 %v2313_v24, %s4646_s25 }
 0x987   : > { %2323 = vrot.lane.b32.xlu1 %v2320_v7, %s4646_s25 }
 0x988   : > { %2763 = vset.pattern.permute.xlu1 %v4789_v38 }
 0x989   : > { %2352 = vrot.lane.b32.xlu0 %v2343_v42, %s4649_s16 }
 0x98b   : > { %2400 = vperm.xlu1 %2763, %v2774_v54  }
 0x98d   : > { %2356 = vrot.lane.b32.xlu0 %v2344_v50, %s4649_s16 }
 0x98f   : > { %2354 = vrot.lane.b32.xlu1 %v2351_v32, %s4649_s16 }
 0x990   : > { %2764 = vset.pattern.permute.xlu1 %v4791_v58 }
 0x991   : > { %2383 = vrot.lane.b32.xlu0 %v2374_v27, %s4652_s24 }
 0x993   : > { %2431 = vperm.xlu1 %2764, %v2774_v54  }
 0x995   : > { %2387 = vrot.lane.b32.xlu0 %v2375_v22, %s4652_s24 }
 0x997   : > { %2385 = vrot.lane.b32.xlu1 %v2382_v49, %s4652_s24 }
 0x998   : > { %2765 = vset.pattern.permute.xlu1 %v4793_v48 }
 0x999   : > { %2406 = vrot.lane.b32.xlu0 %v3950_v43, %s4794_s6 }
 0x99b   : > { %2462 = vperm.xlu1 %2765, %v2774_v54  }
 0x99d   : > { %2410 = vrot.lane.b32.xlu0 %v2398_v4, %s4794_s6 }
 0x99f   : > { %2408 = vrot.lane.b32.xlu1 %v4182_v44, %s4794_s6 }
 0x9a1   : > { %2439 = vrot.lane.b32.xlu0 %v2436_v53, %s4659_s22 }
 0x9a3   : > { %2437 = vrot.lane.b32.xlu1 %v2428_v51, %s4659_s22 }
 0x9a5   : > { %2484 = vperm.xlu0 %2760, %v1749_v47  }
 0x9a7   : > { %2441 = vrot.lane.b32.xlu1 %v2429_v41, %s4659_s22  ;;  %s2812_s22 = sshll.u32 %s2928_s21, 4  ;;  %s2813_s22 = int_to_ptr.vmem [resolvable:$false] %s2812_s22 }
 0x9a8   : > { %s2814_s24 = scalar_lea.vmem %s2813_s22, 512  ;;  %p2815_p7 = scmp.lt.s32.totalorder %s4405_s15, %s2813_s22 }
 0x9a9   : > { %p2816_p10 = scmp.lt.s32.totalorder %s2814_s24, %s2808_s19 }
 0x9ab   : > { %p2817_p2 = por %p2816_p10, %p2815_p7 }
 0x9ad   : > { %p2818_p4 = pnand %p2817_p2, %p2811_p13 }
 0x9b2   : > { %v2101_v54 = vpop.permute.xlu0 %2100 }
 0x9b4   : > { %v2103_v11 = vpop.permute.xlu1 %2102 }
 0x9b5   : > { %v4227_v12 = vsel %vm1140_vm5, %v2101_v54, %v2103_v11 }
 0x9b6   : > { %v2454_v24 = vpop.permute.xlu0 %2453 }
 0x9b7   : > { %v2455_v2 = vrot.slane %v2454_v24, 4 }
 0x9b9   : > { %v2456_v7 = vsel %vm4795_vm14, %v2455_v2, %v2454_v24  ;;  %v2460_v3 = vmul.f32 %v2455_v2, %v2452_v30 }
 0x9ba   : > { %v2459_v52 = vmul.f32 %v2456_v7, %v3950_v43  ;;  %v2105_v42 = vpop.permute.xlu0 %2104 }
 0x9bb   : > { %v4232_v0 = vsel %vm1140_vm5, %v2103_v11, %v2105_v42  ;;  %2472 = vrot.lane.b32.xlu0 %v2460_v3, %s4664_s1  ;;  %vm4796_vm5 = vmmov %vm4792_vm13  ;;  %vm4807_vm13 = vcmask 146432  }
 0x9bc   : > { %2468 = vrot.lane.b32.xlu1 %v2459_v52, %s4664_s1  ;;  %v2467_v38 = vcombine.high %v2459_v52, %v2459_v52  ;;  %vm4808_vm14 = vmmov %vm4807_vm13 }
 0x9c0   : > { %2470 = vrot.lane.b32.xlu1 %v2467_v38, %s4664_s1  ;;  %v1812_v38 = vsel %vm4796_vm5, %v4006_v28, %v4018_v40  ;;  %v1782_v28 = vsel %vm4801_vm3, %v4016_v26, %v4046_v13  ;;  %vm4817_vm3 = vcmask 777216  }
 0x9c5   : > { %v4237_v50 = vpop.permute.xlu1 %2116 }
 0x9c9   : > { %v2144_v29 = vpop.permute.xlu1 %2143 }
 0x9cb   : > { %v2138_v32 = vpop.permute.xlu0 %2137 }
 0x9cd   : > { %v2146_v56 = vpop.permute.xlu1 %2145 }
 0x9ce   : > { %v2149_v27 = vsel %vm1109_vm10, %v2144_v29, %v2146_v56 }
 0x9cf   : > { %v4240_v58 = vmul.f32 %v2149_v27, %v2138_v32  ;;  %v2148_v22 = vpop.permute.xlu0 %2147 }
 0x9d0   : > { %v2150_v36 = vsel %vm1109_vm10, %v2146_v56, %v2148_v22  ;;  %vm4798_vm10 = vcmask 261120   ;;  %v1781_v22 = vsel %vm4800_vm15, %v4004_v9, %v4016_v26 }
 0x9d1   : > { %v4243_v10 = vmul.f32 %v2150_v36, %v2138_v32  ;;  %v2169_v49 = vpop.permute.xlu1 %2168  ;;  %v1835_v56 = vsel %vm4798_vm10, %v4042_v6, %v4008_v18  ;;  %vm4799_vm2 = vmmov %vm4798_vm10  ;;  %v1866_v6 = vsel %vm4803_vm0, %v4010_v16, %v4020_v5  ;;  %v1898_v16 = vsel %vm4805_vm12, %v4022_v33, %v4052_v14 }
 0x9d2   : > { %v1836_v27 = vsel %vm4799_vm2, %v4008_v18, %v4044_v62  ;;  %v1867_v18 = vsel %vm4804_vm4, %v4020_v5, %v4050_v8  ;;  %v1839_v62 = vmul.f32 %v1835_v56, %v3962_v46  ;;  %vm4813_vm10 = vcmask 801792   ;;  %vm4818_vm0 = vmmov %vm4817_vm3 }
 0x9d3   : > { %v2175_v63 = vpop.permute.xlu0 %2174  ;;  %v1840_v26 = vmul.f32 %v1836_v27, %v3962_v46  ;;  %v1928_v46 = vsel %vm4807_vm13, %v4014_v15, %v4024_v57  ;;  %vm4815_vm2 = vcmask 793600  }
 0x9d4   : > { %vm4816_vm15 = vmmov %vm4815_vm2 }
 0x9d5   : > { %v2177_v48 = vpop.permute.xlu1 %2176 }
 0x9d6   : > { %v2180_v4 = vsel %vm1065_vm9, %v2175_v63, %v2177_v48 }
 0x9d7   : > { %v4246_v51 = vmul.f32 %v2180_v4, %v2169_v49  ;;  %v2179_v53 = vpop.permute.xlu0 %2178 }
 0x9d8   : > { %v2181_v61 = vsel %vm1065_vm9, %v2177_v48, %v2179_v53  ;;  %vm4797_vm9 = vmmov %vm4796_vm5  ;;  %v1897_v53 = vsel %vm4788_vm11, %v4012_v23, %v4022_v33  ;;  %v1929_v23 = vsel %vm4808_vm14, %v4024_v57, %v4054_v45  ;;  %v1902_v33 = vmul.f32 %v1898_v16, %v3758_v20 }
 0x9d9   : > { %v4249_v47 = vmul.f32 %v2181_v61, %v2169_v49  ;;  %v4251_v41 = vpop.permute.xlu1 %2199  ;;  %v1813_v29 = vsel %vm4797_vm9, %v4018_v40, %v4048_v25  ;;  %v4802_v40 = vld [vmem:[#allocation65_spill] sm:$0xff] }
 0x9da   : > { %v1816_v25 = vmul.f32 %v1812_v38, %v4802_v40  ;;  %v1817_v49 = vmul.f32 %v1813_v29, %v4802_v40  ;;  %v4806_v38 = vld [vmem:[#allocation66_spill] sm:$0xff]  ;;  %v1932_v40 = vmul.f32 %v1928_v46, %v3782_v21 }
 0x9db   : > { %v4253_v54 = vpop.permute.xlu0 %2205  ;;  %v1870_v5 = vmul.f32 %v1866_v6, %v4806_v38  ;;  %v1871_v8 = vmul.f32 %v1867_v18, %v4806_v38 }
 0x9dd   : > { %v4255_v11 = vpop.permute.xlu1 %2207 }
 0x9df   : > { %v4257_v30 = vpop.permute.xlu0 %2209 }
 0x9e1   : > { %v4259_v24 = vpop.permute.xlu1 %2230 }
 0x9e3   : > { %v4261_v2 = vpop.permute.xlu0 %2253 }
 0x9e6   : > { %v4263_v7 = vpop.permute.xlu1 %2284 }
 0x9e7   : > { %v4265_v3 = vpop.permute.xlu0 %2238 }
 0x9ea   : > { %v4267_v52 = vpop.permute.xlu1 %2236 }
 0x9eb   : > { %v4269_v42 = vpop.permute.xlu0 %2315 }
 0x9ee   : > { %v4277_v32 = vpop.permute.xlu1 %2240 }
 0x9f0   : > { %v1770_v36 = vpop.permute.xlu0 %1769 }
 0x9f1   : > { %v1785_v63 = vmul.f32 %v1781_v22, %v1770_v36  ;;  %v1786_v48 = vmul.f32 %v1782_v28, %v1770_v36  ;;  %v1901_v22 = vmul.f32 %v1897_v53, %v3758_v20 }
 0x9f2   : > { %v4299_v9 = vpop.permute.xlu1 %2259 }
 0x9f3   : > { %v1818_v13 = vadd.f32 %v1816_v25, %v1785_v63  ;;  %v1819_v4 = vadd.f32 %v1817_v49, %v1786_v48  ;;  %v1933_v25 = vmul.f32 %v1929_v23, %v3782_v21 }
 0x9f4   : > { %v4309_v61 = vpop.permute.xlu0 %2263 }
 0x9f5   : > { %v1841_v29 = vadd.f32 %v1839_v62, %v1818_v13  ;;  %v1842_v56 = vadd.f32 %v1840_v26, %v1819_v4 }
 0x9f6   : > { %v2262_v27 = vpop.permute.xlu1 %2261 }
 0x9f7   : > { %v1872_v14 = vadd.f32 %v1870_v5, %v1841_v29  ;;  %v1873_v28 = vadd.f32 %v1871_v8, %v1842_v56 }
 0x9f8   : > { %v4321_v36 = vpop.permute.xlu0 %2290 }
 0x9f9   : > { %v1903_v49 = vadd.f32 %v1901_v22, %v1872_v14  ;;  %v1904_v63 = vadd.f32 %v1902_v33, %v1873_v28 }
 0x9fa   : > { %v4325_v15 = vpop.permute.xlu1 %2346 }
 0x9fb   : > { %v1934_v48 = vadd.f32 %v1932_v40, %v1903_v49  ;;  %v1935_v6 = vadd.f32 %v1933_v25, %v1904_v63 }
 0x9fc   : > { %v2295_v57 = vpop.permute.xlu0 %2294 }
 0x9fd   : > { %v1965_v45 = vadd.f32 %v4058_v31, %v1934_v48  ;;  %v1966_v18 = vadd.f32 %v4060_v34, %v1935_v6  ;;  %v2110_v31 = vmul.f32 %v4227_v12, %v4140_v17  ;;  %v2111_v34 = vmul.f32 %v4232_v0, %v4140_v17 }
 0x9fe   : > { %v2293_v20 = vpop.permute.xlu1 %2292  ;;  %v2211_v17 = vsel %vm1021_vm8, %v4253_v54, %v4255_v11 }
 0x9ff   : > { %v1988_v62 = vadd.f32 %v4064_v35, %v1965_v45  ;;  %v1989_v26 = vadd.f32 %v4066_v59, %v1966_v18 }
 0xa00   : > { %v2322_v13 = vpop.permute.xlu0 %2321 }
 0xa01   : > { %v2019_v4 = vadd.f32 %v4079_v55, %v1988_v62  ;;  %v2020_v21 = vadd.f32 %v4081_v60, %v1989_v26  ;;  %v2122_v60 = vmul.f32 %v4237_v50, %v3950_v43 }
 0xa02   : > { %v4333_v53 = vpop.permute.xlu1 %2377 }
 0xa03   : > { %v2050_v16 = vadd.f32 %v4094_v37, %v2019_v4  ;;  %v2051_v38 = vadd.f32 %v4096_v39, %v2020_v21  ;;  %v2123_v37 = vmul.f32 %v4182_v44, %v4237_v50  ;;  %v2215_v44 = vmul.f32 %v2211_v17, %v4251_v41 }
 0xa04   : > { %v2326_v5 = vpop.permute.xlu0 %2325 }
 0xa05   : > { %v2081_v35 = vadd.f32 %v4127_v19, %v2050_v16  ;;  %v2082_v59 = vadd.f32 %v4129_v1, %v2051_v38  ;;  %v2212_v19 = vsel %vm1021_vm8, %v4255_v11, %v4257_v30  ;;  %vm4809_vm8 = vcmask 916480  }
 0xa06   : > { %v2324_v55 = vpop.permute.xlu1 %2323  ;;  %v2216_v50 = vmul.f32 %v2212_v19, %v4251_v41  ;;  %v2265_v25 = vsel %vm4809_vm8, %v4299_v9, %v2262_v27  ;;  %vm4810_vm5 = vmmov %vm4809_vm8 }
 0xa07   : > { %v2112_v8 = vadd.f32 %v2110_v31, %v2081_v35  ;;  %v2113_v39 = vadd.f32 %v2111_v34, %v2082_v59  ;;  %v2266_v49 = vsel %vm4810_vm5, %v2262_v27, %v4309_v61 }
 0xa08   : > { %v2353_v29 = vpop.permute.xlu0 %2352  ;;  %v2270_v45 = vmul.f32 %v2266_v49, %v4261_v2 }
 0xa09   : > { %v2124_v56 = vadd.f32 %v2122_v60, %v2112_v8  ;;  %v2125_v46 = vadd.f32 %v2123_v37, %v2113_v39 }
 0xa0a   : > { %v2401_v1 = vpop.permute.xlu1 %2400 }
 0xa0b   : > { %v2155_v12 = vadd.f32 %v4240_v58, %v2124_v56  ;;  %v2156_v43 = vadd.f32 %v4243_v10, %v2125_v46  ;;  %v2242_v58 = vsel %vm977_vm7, %v4267_v52, %v4265_v3  ;;  %v2243_v10 = vsel %vm977_vm7, %v4265_v3, %v4277_v32 }
 0xa0c   : > { %v2357_v0 = vpop.permute.xlu0 %2356  ;;  %v2246_v41 = vmul.f32 %v2242_v58, %v4259_v24  ;;  %v2269_v52 = vmul.f32 %v2265_v25, %v4261_v2  ;;  %v2296_v3 = vsel %vm896_vm6, %v4321_v36, %v2293_v20  ;;  %vm4811_vm7 = vcmask 900096   ;;  %v2775_v58 = vld [vmem:[%s3100_s26] sm:$0xff] }
 0xa0d   : > { %v2186_v23 = vadd.f32 %v4246_v51, %v2155_v12  ;;  %v2187_v22 = vadd.f32 %v4249_v47, %v2156_v43  ;;  %v2247_v51 = vmul.f32 %v2243_v10, %v4259_v24  ;;  %v2297_v24 = vsel %vm896_vm6, %v2293_v20, %v2295_v57  ;;  %vm4812_vm9 = vmmov %vm4811_vm7 }
 0xa0e   : > { %v2355_v33 = vpop.permute.xlu1 %2354  ;;  %v2300_v9 = vmul.f32 %v2296_v3, %v4263_v7  ;;  %v2301_v26 = vmul.f32 %v2297_v24, %v4263_v7  ;;  %v2327_v27 = vsel %vm4811_vm7, %v2322_v13, %v2324_v55  ;;  %v2328_v4 = vsel %vm4812_vm9, %v2324_v55, %v2326_v5  ;;  %vm4814_vm6 = vmmov %vm4813_vm10 }
 0xa0f   : > { %v2217_v54 = vadd.f32 %v2215_v44, %v2186_v23  ;;  %v2218_v14 = vadd.f32 %v2216_v50, %v2187_v22  ;;  %v2331_v38 = vmul.f32 %v2327_v27, %v4269_v42  ;;  %v2332_v36 = vmul.f32 %v2328_v4, %v4269_v42 }
 0xa10   : > { %v2384_v28 = vpop.permute.xlu0 %2383  ;;  %v2358_v57 = vsel %vm4813_vm10, %v2353_v29, %v2355_v33  ;;  %v2359_v20 = vsel %vm4814_vm6, %v2355_v33, %v2357_v0  ;;  %v2495_v10 = vrot.slane %v2775_v58, 4 }
 0xa11   : > { %v2248_v63 = vadd.f32 %v2246_v41, %v2217_v54  ;;  %v2249_v48 = vadd.f32 %v2247_v51, %v2218_v14  ;;  %v2362_v5 = vmul.f32 %v2358_v57, %v4325_v15  ;;  %v2363_v59 = vmul.f32 %v2359_v20, %v4325_v15  ;;  %v2776_v41 = vld [vmem:[%s3100_s26 + $0x8] sm:$0xff]  ;;  %s2510_s26 = scalar_lea.sflag [#allocation6], %s3094_s13 }
 0xa12   : > { %v2432_v40 = vpop.permute.xlu1 %2431 }
 0xa13   : > { %v2271_v32 = vadd.f32 %v2269_v52, %v2248_v63  ;;  %v2272_v62 = vadd.f32 %v2270_v45, %v2249_v48 }
 0xa14   : > { %v2388_v11 = vpop.permute.xlu0 %2387 }
 0xa15   : > { %v2302_v21 = vadd.f32 %v2300_v9, %v2271_v32  ;;  %v2303_v16 = vadd.f32 %v2301_v26, %v2272_v62 }
 0xa16   : > { %v2386_v30 = vpop.permute.xlu1 %2385 }
 0xa17   : > { %v2333_v31 = vadd.f32 %v2331_v38, %v2302_v21  ;;  %v2334_v34 = vadd.f32 %v2332_v36, %v2303_v16  ;;  %v2389_v7 = vsel %vm4815_vm2, %v2384_v28, %v2386_v30  ;;  %v2390_v13 = vsel %vm4816_vm15, %v2386_v30, %v2388_v11 }
 0xa18   : > { %v2407_v6 = vpop.permute.xlu0 %2406  ;;  %v2393_v39 = vmul.f32 %v2389_v7, %v4333_v53  ;;  %v2394_v29 = vmul.f32 %v2390_v13, %v4333_v53 }
 0xa19   : > { %v2364_v37 = vadd.f32 %v2362_v5, %v2333_v31  ;;  %v2365_v8 = vadd.f32 %v2363_v59, %v2334_v34 }
 0xa1a   : > { %v2463_v47 = vpop.permute.xlu1 %2462 }
 0xa1b   : > { %v2395_v43 = vadd.f32 %v2393_v39, %v2364_v37  ;;  %v2396_v0 = vadd.f32 %v2394_v29, %v2365_v8 }
 0xa1c   : > { %v2411_v61 = vpop.permute.xlu0 %2410 }
 0xa1e   : > { %v2409_v18 = vpop.permute.xlu1 %2408 }
 0xa1f   : > { %v2412_v60 = vsel %vm1570_vm1, %v2407_v6, %v2409_v18  ;;  %v2413_v42 = vsel %vm1570_vm1, %v2409_v18, %v2411_v61  ;;  %vm4819_vm1 = vcmask 769024  }
 0xa20   : > { %v2440_v35 = vpop.permute.xlu0 %2439  ;;  %v2416_v17 = vmul.f32 %v2412_v60, %v2401_v1  ;;  %v2417_v19 = vmul.f32 %v2413_v42, %v2401_v1  ;;  %vm4820_vm4 = vmmov %vm4819_vm1 }
 0xa22   : > { %v2438_v2 = vpop.permute.xlu1 %2437  ;;  %v2418_v23 = vadd.f32 %v2416_v17, %v2395_v43  ;;  %v2419_v22 = vadd.f32 %v2417_v19, %v2396_v0 }
 0xa23   : > { %v2443_v56 = vsel %vm4817_vm3, %v2438_v2, %v2440_v35 }
 0xa24   : > { %v2485_v12 = vpop.permute.xlu0 %2484  ;;  %v2447_v44 = vmul.f32 %v2443_v56, %v2432_v40 }
 0xa26   : > { %v2442_v55 = vpop.permute.xlu1 %2441  ;;  %v2449_v28 = vadd.f32 %v2447_v44, %v2418_v23 }
 0xa27   : > { %v2444_v46 = vsel %vm4818_vm0, %v2440_v35, %v2442_v55 }
 0xa28   : > { %v2448_v50 = vmul.f32 %v2444_v46, %v2432_v40  ;;  %v2496_v40 = vrot.slane %v2776_v41, 4 }
 0xa2a   : > { %v2450_v1 = vadd.f32 %v2448_v50, %v2419_v22 }
 0xa2d   : > { %v2473_v33 = vpop.permute.xlu0 %2472 }
 0xa2e   : > { %v2469_v15 = vpop.permute.xlu1 %2468 }
 0xa32   : > { %v2471_v54 = vpop.permute.xlu1 %2470 }
 0xa33   : > { %v2474_v53 = vsel %vm4819_vm1, %v2469_v15, %v2471_v54  ;;  %v2475_v14 = vsel %vm4820_vm4, %v2471_v54, %v2473_v33 }
 0xa34   : > { %v2478_v11 = vmul.f32 %v2474_v53, %v2463_v47  ;;  %v2479_v30 = vmul.f32 %v2475_v14, %v2463_v47 }
 0xa36   : > { %v2480_v51 = vadd.f32 %v2478_v11, %v2449_v28  ;;  %v2481_v25 = vadd.f32 %v2479_v30, %v2450_v1 }
 0xa38   : > { %v2487_v49 = vadd.f32 %v2485_v12, %v2480_v51  ;;  %v2488_v63 = vadd.f32 %v2485_v12, %v2481_v25 }
 0xa3a   : > { %v2499_v48 = vadd.f32 %v2495_v10, %v2487_v49  ;;  %v2500_v6 = vadd.f32 %v2496_v40, %v2488_v63 }
 0xa3c   : > { %v2503_v52 = vrot.slane %v2499_v48, 4  ;;  %v2504_v45 = vrot.slane %v2500_v6, 4 }
 0xa3e   : > { %2507 = vst [vmem:[%s3958_s2] sm:$0xf0] %v2503_v52  ;;  %2508 = vst [vmem:[%s3958_s2 + $0x8] sm:$0xf0] %v2504_v45 }
 0xa3f   : > { %2821 = shalt.err (!%p2818_p4)
}
 0xa40   : > { %s2822_s13 = scalar_lea.hbm %s4403_s14, 256  ;;  %s2826_s18 = scalar_lea.hbm %s4460_s11, 512 }
 0xa41   : > { %p2823_p5 = scmp.ne.s32.totalorder %s4403_s14, %s2822_s13  ;;  %p2827_p0 = scmp.lt.u32.totalorder %s4403_s14, %s4460_s11 }
 0xa42   : > { %p2828_p1 = scmp.lt.u32.totalorder %s2826_s18, %s2822_s13  ;;  %p2830_p6 = scmp.lt.u32.totalorder %s2822_s13, %s4403_s14 }
 0xa43   : > { %p2824_p8 = pnand %p2823_p5, %p4821_p11 }
 0xa44   : > { %p2829_p3 = por %p2828_p1, %p2827_p0 }
 0xa45   : > { %p2825_p9 = pneg %p2824_p8 }
 0xa46   : > { %p2831_p12 = por %p2830_p6, %p2829_p3 }
 0xa48   : > { %p2832_p13 = pnand %p2831_p12, %p2825_p9 }
 0xa4a   : > { %2835 = shalt.err (!%p2832_p13)
}
 0xa4b   : > { %2614 = dma.vmem_to_hbm [thread:$0]  (%p4821_p11), %s4405_s15, 256, %s4403_s14, %s2510_s26  }
 0xa4c PF: > { %s4822_s4 = sld [smem:[#allocation15_spill]]  ;;  %s4823_s30 = sld [smem:[#allocation12_spill]] }
 0xa4d   : > { %s2536_s0 = sand.u32 1, %s2862_s17  }
 0xa4e   : > { %s2537_s3 = scalar_lea.sflag [#allocation6], %s2536_s0 }
 0xa52   : > { %p4824_p7 = scmp.ne.s32.totalorder %s4822_s4, 0  ;;  %p4825_p10 = scmp.ge.s32.totalorder %s4823_s30, 2 }
 0xa54   : > { %p2621_p2 = pnand %p4825_p10, %p4824_p7 }
 0xa56   : > { %2857 = dma.done.wait (!%p2621_p2), %s2537_s3, 256  }
 0xa57   : > { %2859 = vsyncadd (!%p2621_p2), %s2537_s3, 4294967040  ;;  %s4826_s20 = sld [smem:[#allocation13_spill]]  ;;  %s4827_s17 = sld [smem:[#allocation10_spill]] }
 0xa58   : > { %s4828_s18 = sld [smem:[#allocation11_spill]]  ;;  %s4829_s19 = sld [smem:[#allocation14_spill]] }
 0xa5d   : > { %p24_p4 = scmp.ge.s32.totalorder %s4826_s20, 4  }
 0xa5f   :  { %26 = sbr.rel (!%p24_p4) target bundleno = 13 (0xd), region = 109 }
 0xa66   :  { %2542 = vsyncpa [#allocation5], 1 }
 0xa67   :  { %2544 = vsyncpa [#allocation5 + $0x1], 1 }
 0xa68   :  { %2545 = vsyncpa [#allocation6], 1 }
 0xa69   :  { %2547 = vsyncpa [#allocation6 + $0x1], 1 }

</bundles_post_ra>
